<compile_context>
chip_gen: v6e
topology: v6e:2x2x1
jax: 0.10.0
libtpu: 0.0.40
codegen_flags: <defaults>
</compile_context>

<pallas_src>
import functools

import jax
import jax.numpy as jnp
from jax import lax
from jax.experimental import pallas as pl
from jax.experimental.pallas import tpu as pltpu


def _round_up(x, m):
    return ((x + m - 1) // m) * m


# ----------------------------------------------------------------------------
# Pallas kernel: halo conv (27 shifted matmuls) + bias + ReLU, channel
# L2-normalize, trilinear grid_sample-as-matmul accumulated over depth tiles.
# ----------------------------------------------------------------------------
def intra_clr_kernel(w_ref, b_ref, slab_ref, smat_ref, feat_ref, q_ref, pos_ref,
                     *, hpwp, wp):
    i = pl.program_id(1)                 # inner depth-tile index (pos reduction axis)
    c_in_pad = slab_ref.shape[0]
    l_out = feat_ref.shape[1]            # padded-plane positions per tile (mult of 128)
    a0 = hpwp + wp + 1                   # slab column of the first output position

    slab = slab_ref[...]                 # (C_in_pad, SLAB_pad) bf16, small
    wmat = w_ref[...]                    # (C_out_pad, 27*C_in_pad) bf16

    # conv as 27 shifted matmuls on the halo'd slab: each tap is a static
    # lane-offset slice (XLU relayout, VMEM-only) + a tiny MXU dot, f32 acc.
    acc = jnp.zeros(feat_ref.shape, jnp.float32)
    for kd in range(3):
        for kh in range(3):
            for kw in range(3):
                k = (kd * 3 + kh) * 3 + kw
                off = (kd - 1) * hpwp + (kh - 1) * wp + (kw - 1)
                xk = slab[:, a0 + off: a0 + off + l_out]          # (C_in_pad, L)
                wk = wmat[:, k * c_in_pad: (k + 1) * c_in_pad]    # (C_out_pad, C_in_pad)
                acc = acc + jnp.dot(wk, xk, preferred_element_type=jnp.float32)

    feat = jnp.maximum(acc + b_ref[...], 0.0)                     # bias + ReLU (VPU)
    feat_bf = feat.astype(feat_ref.dtype)
    feat_ref[...] = feat_bf                                       # bf16 writeback

    # q = F.normalize(features, dim=1): L2 over channels (axis 0 here).
    # rsqrt goes to the EUP; the clamp reproduces F.normalize's eps behaviour
    # and keeps halo/garbage columns finite (they are discarded by the wrapper).
    ssq = jnp.sum(feat * feat, axis=0, keepdims=True)
    q_ref[...] = (feat * lax.rsqrt(jnp.maximum(ssq, 1e-24))).astype(q_ref.dtype)

    # grid_sample: pos += feat @ smat, accumulated over depth tiles into the
    # core-resident (C_out_pad, N_pad) block (zero-init on the first step).
    @pl.when(i == 0)
    def _():
        pos_ref[...] = jnp.zeros_like(pos_ref)
    pos_ref[...] += jnp.dot(feat_bf, smat_ref[...],
                            preferred_element_type=jnp.float32)


# ----------------------------------------------------------------------------
# Host-side glue (plain JAX): trilinear taps, padded-layout sampling matrix,
# slab packing, tile sizing.
# ----------------------------------------------------------------------------
def trilinear_taps(coords, D, H, W):
    """grid_sample-style trilinear taps (align_corners=False, zeros padding).
    coords: (N, 3) in [-1, 1], ordered (x, y, z) = (W, H, D).
    Returns (idx (N, 8, 3) int32 [z, y, x] clipped, weights (N, 8) f32,
    with out-of-bounds taps zero-weighted)."""
    c = coords.astype(jnp.float32)
    x, y, z = c[:, 0], c[:, 1], c[:, 2]
    ix = ((x + 1.0) * W - 1.0) / 2.0
    iy = ((y + 1.0) * H - 1.0) / 2.0
    iz = ((z + 1.0) * D - 1.0) / 2.0
    x0 = jnp.floor(ix); y0 = jnp.floor(iy); z0 = jnp.floor(iz)
    fx, fy, fz = ix - x0, iy - y0, iz - z0
    idxs, wts = [], []
    for dz in (0, 1):
        for dy in (0, 1):
            for dx in (0, 1):
                cx = x0 + dx; cy = y0 + dy; cz = z0 + dz
                w = (jnp.where(dx == 1, fx, 1.0 - fx) *
                     jnp.where(dy == 1, fy, 1.0 - fy) *
                     jnp.where(dz == 1, fz, 1.0 - fz))
                valid = ((cx >= 0) & (cx < W) & (cy >= 0) & (cy < H) &
                         (cz >= 0) & (cz < D))
                idxs.append(jnp.stack(
                    [jnp.clip(cz, 0, D - 1), jnp.clip(cy, 0, H - 1),
                     jnp.clip(cx, 0, W - 1)], axis=-1).astype(jnp.int32))
                wts.append(jnp.where(valid, w, 0.0))
    return jnp.stack(idxs, axis=1), jnp.stack(wts, axis=1)


def build_padded_smat(coords, D, H, W, TD, l_out_pad, hpwp, wp, n_rows, n_pad):
    """Sampling matrix with rows in the per-tile padded-plane layout used by the
    kernel's feat blocks (exact trilinear weights, bf16 storage)."""
    zyx, w = trilinear_taps(coords, D, H, W)
    z, y, x = zyx[..., 0], zyx[..., 1], zyx[..., 2]
    rows = (z // TD) * l_out_pad + (z % TD) * hpwp + (y + 1) * wp + (x + 1)
    cols = jnp.broadcast_to(jnp.arange(coords.shape[0])[:, None], rows.shape)
    smat = jnp.zeros((n_rows, n_pad), jnp.float32)
    smat = smat.at[rows, cols].add(w)
    return smat.astype(jnp.bfloat16)


def intra_clr_forward(vol, weight, bias, correspondences, *,
                      vmem_budget_bytes=8 << 20, split_tensorcores=False):
    """vol: (1, C_in, D, H, W); weight: (C_out, C_in, 3, 3, 3); bias: (C_out,).
    correspondences: dict name -> (N_k, 3) coords in [-1, 1]."""
    B, C_in, D, H, W = vol.shape
    assert B == 1, "grid_sample with a batch-1 grid implies B == 1"
    C_out = weight.shape[0]
    f32, bf16 = jnp.float32, jnp.bfloat16

    Hp, Wp = H + 2, W + 2
    HpWp = Hp * Wp
    C_in_pad = _round_up(C_in, 8)
    C_out_pad = _round_up(C_out, 8)       # sublane granularity only (review item 9)

    names = list(correspondences.keys())
    counts = [int(correspondences[k].shape[0]) for k in names]
    all_coords = jnp.concatenate([correspondences[k] for k in names], axis=0)
    N = all_coords.shape[0]
    N_pad = _round_up(N, 128)             # lane-dense pos output

    # --- depth-slab tile size from an explicit VMEM budget -------------------
    def step_bytes(td):
        l_out = _round_up(td * HpWp, 128)
        slab = _round_up(2 * (HpWp + Wp + 1) + l_out, 128)
        return (2 * (C_in_pad * slab * 2            # slab (bf16), double-buffered
                     + l_out * N_pad * 2            # smat block (bf16)
                     + 2 * C_out_pad * l_out * 2)   # feat + q out blocks (bf16)
                + C_out_pad * N_pad * 4)            # resident pos accumulator (f32)

    TD = 1
    for cand in range(1, D + 1):
        if step_bytes(cand) <= vmem_budget_bytes:
            TD = cand

    n_tiles0 = -(-D // TD)
    # 2-way TensorCore split only when it can actually help (2-TC chips, enough tiles).
    n_outer = 2 if (split_tensorcores and n_tiles0 >= 8) else 1
    n_tiles = _round_up(n_tiles0, n_outer)
    half = n_tiles // n_outer
    D_pad = n_tiles * TD

    L_out = TD * HpWp
    L_out_pad = _round_up(L_out, 128)
    SLAB_pad = _round_up(2 * (HpWp + Wp + 1) + L_out_pad, 128)

    # --- host-side packing (built directly in bf16; no 27x im2col) -----------
    x = vol[0].astype(bf16)
    x = jnp.pad(x, ((0, C_in_pad - C_in), (1, 1 + (D_pad - D)), (1, 1), (1, 1)))
    xflat = x.reshape(C_in_pad, (D_pad + 2) * HpWp)
    need = (n_tiles - 1) * TD * HpWp + SLAB_pad
    right = max(0, need - (Wp + 1) - xflat.shape[1])
    xflat = jnp.pad(xflat, ((0, 0), (Wp + 1, right)))
    slabs = jnp.concatenate(
        [lax.slice_in_dim(xflat, i * TD * HpWp, i * TD * HpWp + SLAB_pad, axis=1)
         for i in range(n_tiles)], axis=0)            # (n_tiles*C_in_pad, SLAB_pad)

    w_taps = jnp.transpose(weight, (0, 2, 3, 4, 1)).reshape(C_out, 27, C_in)
    w_taps = jnp.pad(w_taps, ((0, C_out_pad - C_out), (0, 0), (0, C_in_pad - C_in)))
    w2 = w_taps.reshape(C_out_pad, 27 * C_in_pad).astype(bf16)
    bias_p = jnp.pad(bias.astype(f32), (0, C_out_pad - C_out)).reshape(C_out_pad, 1)

    smat_p = build_padded_smat(all_coords, D, H, W, TD, L_out_pad, HpWp, Wp,
                               n_rows=n_tiles * L_out_pad, n_pad=N_pad)

    # --- pallas call ----------------------------------------------------------
    kernel = functools.partial(intra_clr_kernel, hpwp=HpWp, wp=Wp)
    grid_spec = pltpu.PrefetchScalarGridSpec(
        num_scalar_prefetch=0,
        grid=(n_outer, half),
        in_specs=[
            pl.BlockSpec((C_out_pad, 27 * C_in_pad), lambda c, i: (0, 0)),
            pl.BlockSpec((C_out_pad, 1),             lambda c, i: (0, 0)),
            pl.BlockSpec((C_in_pad, SLAB_pad),       lambda c, i: (c * half + i, 0)),
            pl.BlockSpec((L_out_pad, N_pad),         lambda c, i: (c * half + i, 0)),
        ],
        out_specs=[
            pl.BlockSpec((C_out_pad, L_out_pad),     lambda c, i: (0, c * half + i)),
            pl.BlockSpec((C_out_pad, L_out_pad),     lambda c, i: (0, c * half + i)),
            pl.BlockSpec((C_out_pad, N_pad),         lambda c, i: (c, 0)),
        ],
    )
    feat_pad, q_pad, pos_part = pl.pallas_call(
        kernel,
        out_shape=(
            jax.ShapeDtypeStruct((C_out_pad, n_tiles * L_out_pad), bf16),
            jax.ShapeDtypeStruct((C_out_pad, n_tiles * L_out_pad), bf16),
            jax.ShapeDtypeStruct((n_outer * C_out_pad, N_pad), f32),
        ),
        grid_spec=grid_spec,
        compiler_params=pltpu.CompilerParams(
            dimension_semantics=("parallel", "arbitrary"),
            vmem_limit_bytes=32 * 1024 * 1024),
    )(w2, bias_p, slabs, smat_p)

    # --- unpack padded-plane layout back to (1, C, D, H, W) -------------------
    def unpack(arr):
        a = arr[:C_out].reshape(C_out, n_tiles, L_out_pad)[:, :, :L_out]
        a = a.reshape(C_out, n_tiles * TD, Hp, Wp)[:, :D, 1:H + 1, 1:W + 1]
        return a.reshape(1, C_out, D, H, W)

    features = unpack(feat_pad)                              # bf16
    q = unpack(q_pad)                                        # bf16
    pos2d = pos_part.reshape(n_outer, C_out_pad, N_pad).sum(axis=0)[:C_out, :N]

    pos_groups = {}
    off = 0
    for name, n in zip(names, counts):
        # matches PyTorch grid_sample output shape (1, C, N, 1, 1)
        pos_groups[name] = pos2d[:, off:off + n].reshape(1, C_out, n, 1, 1)
        off += n
    return features, q, pos_groups


# ----------------------------------------------------------------------------
# Pure-JAX reference (for correctness check only).
# ----------------------------------------------------------------------------
def reference_forward(vol, weight, bias, correspondences):
    feat = lax.conv_general_dilated(
        vol, weight, window_strides=(1, 1, 1), padding="SAME",
        dimension_numbers=("NCDHW", "OIDHW", "NCDHW"),
        precision=lax.Precision.HIGHEST)
    feat = jnp.maximum(feat + bias.reshape(1, -1, 1, 1, 1), 0.0)
    norm = jnp.sqrt(jnp.sum(feat * feat, axis=1, keepdims=True))
    q = feat / jnp.maximum(norm, 1e-12)
    _, C_out, D, H, W = feat.shape
    feat2d = feat.reshape(C_out, D * H * W)
    pos = {}
    for k, coords in correspondences.items():
        zyx, w = trilinear_taps(coords, D, H, W)
        flat = (zyx[..., 0] * H + zyx[..., 1]) * W + zyx[..., 2]
        g = feat2d[:, flat]                                  # (C, N, 8)
        pos[k] = jnp.einsum('cnk,nk->cn', g, w).reshape(1, C_out, coords.shape[0], 1, 1)
    return feat, q, pos


if __name__ == "__main__":
    key = jax.random.PRNGKey(0)
    k_vol, k_w, k_b, k_c1, k_c2 = jax.random.split(key, 5)

    B, C_in, D, H, W = 1, 4, 8, 8, 8          # vol: (1, 4, 8, 8, 8)
    C_out = 8
    vol = jax.random.normal(k_vol, (B, C_in, D, H, W), jnp.float32)
    weight = 0.1 * jax.random.normal(k_w, (C_out, C_in, 3, 3, 3), jnp.float32)
    bias = 0.1 * jax.random.normal(k_b, (C_out,), jnp.float32)

    correspondences = {
        "liver":  jax.random.uniform(k_c1, (64, 3), jnp.float32, -1.0, 1.0),
        "kidney": jax.random.uniform(k_c2, (64, 3), jnp.float32, -1.0, 1.0),
    }

    features, q, pos_groups = intra_clr_forward(vol, weight, bias, correspondences)
    jax.block_until_ready((features, q, pos_groups))

    # correctness check vs. pure-JAX reference (bf16 MXU inputs / bf16 feat & q
    # writeback, f32 accumulation)
    f_ref, q_ref, pos_ref = reference_forward(vol, weight, bias, correspondences)
    assert jnp.allclose(features.astype(jnp.float32), f_ref, atol=2e-2, rtol=2e-2)
    assert jnp.allclose(q.astype(jnp.float32), q_ref, atol=2e-2, rtol=2e-2)
    for name in correspondences:
        assert jnp.allclose(pos_groups[name], pos_ref[name], atol=2e-2, rtol=2e-2)

    print("KERNEL_OK")
</pallas_src>

<mosaic_0001>
module attributes {stable_mosaic.version = 11 : i64} {
  func.func @intra_clr_kernel(%arg0: i32, %arg1: i32, %arg2: memref<8x216xbf16, #tpu.memory_space<vmem>>, %arg3: memref<8x1xf32, #tpu.memory_space<vmem>>, %arg4: memref<8x1152xbf16, #tpu.memory_space<vmem>>, %arg5: memref<896x128xbf16, #tpu.memory_space<vmem>>, %arg6: memref<8x896xbf16, #tpu.memory_space<vmem>>, %arg7: memref<8x896xbf16, #tpu.memory_space<vmem>>, %arg8: memref<8x128xf32, #tpu.memory_space<vmem>>) attributes {dimension_semantics = [#tpu.dimension_semantics<parallel>, #tpu.dimension_semantics<arbitrary>], iteration_bounds = array<i64: 1, 1>, scalar_prefetch = 0 : i64, scratch_operands = 0 : i64, tpu.core_type = #tpu.core_type<tc>, window_params = [{pipeline_mode = #tpu.pipeline_mode<synchronous>, transform_indices = @transform_0, window_bounds = array<i64: 8, 216>}, {pipeline_mode = #tpu.pipeline_mode<synchronous>, transform_indices = @transform_1, window_bounds = array<i64: 8, 1>}, {transform_indices = @transform_2, window_bounds = array<i64: 8, 1152>}, {transform_indices = @transform_3, window_bounds = array<i64: 896, 128>}, {transform_indices = @transform_4, window_bounds = array<i64: 8, 896>}, {transform_indices = @transform_5, window_bounds = array<i64: 8, 896>}, {transform_indices = @transform_6, window_bounds = array<i64: 8, 128>}]} {
    %c0 = arith.constant 0 : index
    %c0_0 = arith.constant 0 : index
    %0 = vector.load %arg4[%c0, %c0_0] : memref<8x1152xbf16, #tpu.memory_space<vmem>>, vector<8x1152xbf16>
    %c0_1 = arith.constant 0 : index
    %c0_2 = arith.constant 0 : index
    %1 = vector.load %arg2[%c0_1, %c0_2] : memref<8x216xbf16, #tpu.memory_space<vmem>>, vector<8x216xbf16>
    %cst = arith.constant 0.000000e+00 : f32
    %2 = vector.broadcast %cst : f32 to vector<8x896xf32>
    %3 = vector.extract_strided_slice %0 {offsets = [0, 0], sizes = [8, 896], strides = [1, 1]} : vector<8x1152xbf16> to vector<8x896xbf16>
    %4 = vector.extract_strided_slice %1 {offsets = [0, 0], sizes = [8, 8], strides = [1, 1]} : vector<8x216xbf16> to vector<8x8xbf16>
    %cst_3 = arith.constant dense<0.000000e+00> : vector<8x896xf32>
    %5 = tpu.matmul %4, %3, %cst_3 {dimension_numbers = #tpu.dot_dimension_numbers<[1], [0], [0], [1], [0, 0, 1, 1], [], []>} : vector<8x8xbf16>, vector<8x896xbf16>, vector<8x896xf32> -> vector<8x896xf32>
    %6 = arith.addf %2, %5 : vector<8x896xf32>
    %7 = vector.extract_strided_slice %0 {offsets = [0, 1], sizes = [8, 896], strides = [1, 1]} : vector<8x1152xbf16> to vector<8x896xbf16>
    %8 = vector.extract_strided_slice %1 {offsets = [0, 8], sizes = [8, 8], strides = [1, 1]} : vector<8x216xbf16> to vector<8x8xbf16>
    %cst_4 = arith.constant dense<0.000000e+00> : vector<8x896xf32>
    %9 = tpu.matmul %8, %7, %cst_4 {dimension_numbers = #tpu.dot_dimension_numbers<[1], [0], [0], [1], [0, 0, 1, 1], [], []>} : vector<8x8xbf16>, vector<8x896xbf16>, vector<8x896xf32> -> vector<8x896xf32>
    %10 = arith.addf %6, %9 : vector<8x896xf32>
    %11 = vector.extract_strided_slice %0 {offsets = [0, 2], sizes = [8, 896], strides = [1, 1]} : vector<8x1152xbf16> to vector<8x896xbf16>
    %12 = vector.extract_strided_slice %1 {offsets = [0, 16], sizes = [8, 8], strides = [1, 1]} : vector<8x216xbf16> to vector<8x8xbf16>
    %cst_5 = arith.constant dense<0.000000e+00> : vector<8x896xf32>
    %13 = tpu.matmul %12, %11, %cst_5 {dimension_numbers = #tpu.dot_dimension_numbers<[1], [0], [0], [1], [0, 0, 1, 1], [], []>} : vector<8x8xbf16>, vector<8x896xbf16>, vector<8x896xf32> -> vector<8x896xf32>
    %14 = arith.addf %10, %13 : vector<8x896xf32>
    %15 = vector.extract_strided_slice %0 {offsets = [0, 10], sizes = [8, 896], strides = [1, 1]} : vector<8x1152xbf16> to vector<8x896xbf16>
    %16 = vector.extract_strided_slice %1 {offsets = [0, 24], sizes = [8, 8], strides = [1, 1]} : vector<8x216xbf16> to vector<8x8xbf16>
    %cst_6 = arith.constant dense<0.000000e+00> : vector<8x896xf32>
    %17 = tpu.matmul %16, %15, %cst_6 {dimension_numbers = #tpu.dot_dimension_numbers<[1], [0], [0], [1], [0, 0, 1, 1], [], []>} : vector<8x8xbf16>, vector<8x896xbf16>, vector<8x896xf32> -> vector<8x896xf32>
    %18 = arith.addf %14, %17 : vector<8x896xf32>
    %19 = vector.extract_strided_slice %0 {offsets = [0, 11], sizes = [8, 896], strides = [1, 1]} : vector<8x1152xbf16> to vector<8x896xbf16>
    %20 = vector.extract_strided_slice %1 {offsets = [0, 32], sizes = [8, 8], strides = [1, 1]} : vector<8x216xbf16> to vector<8x8xbf16>
    %cst_7 = arith.constant dense<0.000000e+00> : vector<8x896xf32>
    %21 = tpu.matmul %20, %19, %cst_7 {dimension_numbers = #tpu.dot_dimension_numbers<[1], [0], [0], [1], [0, 0, 1, 1], [], []>} : vector<8x8xbf16>, vector<8x896xbf16>, vector<8x896xf32> -> vector<8x896xf32>
    %22 = arith.addf %18, %21 : vector<8x896xf32>
    %23 = vector.extract_strided_slice %0 {offsets = [0, 12], sizes = [8, 896], strides = [1, 1]} : vector<8x1152xbf16> to vector<8x896xbf16>
    %24 = vector.extract_strided_slice %1 {offsets = [0, 40], sizes = [8, 8], strides = [1, 1]} : vector<8x216xbf16> to vector<8x8xbf16>
    %cst_8 = arith.constant dense<0.000000e+00> : vector<8x896xf32>
    %25 = tpu.matmul %24, %23, %cst_8 {dimension_numbers = #tpu.dot_dimension_numbers<[1], [0], [0], [1], [0, 0, 1, 1], [], []>} : vector<8x8xbf16>, vector<8x896xbf16>, vector<8x896xf32> -> vector<8x896xf32>
    %26 = arith.addf %22, %25 : vector<8x896xf32>
    %27 = vector.extract_strided_slice %0 {offsets = [0, 20], sizes = [8, 896], strides = [1, 1]} : vector<8x1152xbf16> to vector<8x896xbf16>
    %28 = vector.extract_strided_slice %1 {offsets = [0, 48], sizes = [8, 8], strides = [1, 1]} : vector<8x216xbf16> to vector<8x8xbf16>
    %cst_9 = arith.constant dense<0.000000e+00> : vector<8x896xf32>
    %29 = tpu.matmul %28, %27, %cst_9 {dimension_numbers = #tpu.dot_dimension_numbers<[1], [0], [0], [1], [0, 0, 1, 1], [], []>} : vector<8x8xbf16>, vector<8x896xbf16>, vector<8x896xf32> -> vector<8x896xf32>
    %30 = arith.addf %26, %29 : vector<8x896xf32>
    %31 = vector.extract_strided_slice %0 {offsets = [0, 21], sizes = [8, 896], strides = [1, 1]} : vector<8x1152xbf16> to vector<8x896xbf16>
    %32 = vector.extract_strided_slice %1 {offsets = [0, 56], sizes = [8, 8], strides = [1, 1]} : vector<8x216xbf16> to vector<8x8xbf16>
    %cst_10 = arith.constant dense<0.000000e+00> : vector<8x896xf32>
    %33 = tpu.matmul %32, %31, %cst_10 {dimension_numbers = #tpu.dot_dimension_numbers<[1], [0], [0], [1], [0, 0, 1, 1], [], []>} : vector<8x8xbf16>, vector<8x896xbf16>, vector<8x896xf32> -> vector<8x896xf32>
    %34 = arith.addf %30, %33 : vector<8x896xf32>
    %35 = vector.extract_strided_slice %0 {offsets = [0, 22], sizes = [8, 896], strides = [1, 1]} : vector<8x1152xbf16> to vector<8x896xbf16>
    %36 = vector.extract_strided_slice %1 {offsets = [0, 64], sizes = [8, 8], strides = [1, 1]} : vector<8x216xbf16> to vector<8x8xbf16>
    %cst_11 = arith.constant dense<0.000000e+00> : vector<8x896xf32>
    %37 = tpu.matmul %36, %35, %cst_11 {dimension_numbers = #tpu.dot_dimension_numbers<[1], [0], [0], [1], [0, 0, 1, 1], [], []>} : vector<8x8xbf16>, vector<8x896xbf16>, vector<8x896xf32> -> vector<8x896xf32>
    %38 = arith.addf %34, %37 : vector<8x896xf32>
    %39 = vector.extract_strided_slice %0 {offsets = [0, 100], sizes = [8, 896], strides = [1, 1]} : vector<8x1152xbf16> to vector<8x896xbf16>
    %40 = vector.extract_strided_slice %1 {offsets = [0, 72], sizes = [8, 8], strides = [1, 1]} : vector<8x216xbf16> to vector<8x8xbf16>
    %cst_12 = arith.constant dense<0.000000e+00> : vector<8x896xf32>
    %41 = tpu.matmul %40, %39, %cst_12 {dimension_numbers = #tpu.dot_dimension_numbers<[1], [0], [0], [1], [0, 0, 1, 1], [], []>} : vector<8x8xbf16>, vector<8x896xbf16>, vector<8x896xf32> -> vector<8x896xf32>
    %42 = arith.addf %38, %41 : vector<8x896xf32>
    %43 = vector.extract_strided_slice %0 {offsets = [0, 101], sizes = [8, 896], strides = [1, 1]} : vector<8x1152xbf16> to vector<8x896xbf16>
    %44 = vector.extract_strided_slice %1 {offsets = [0, 80], sizes = [8, 8], strides = [1, 1]} : vector<8x216xbf16> to vector<8x8xbf16>
    %cst_13 = arith.constant dense<0.000000e+00> : vector<8x896xf32>
    %45 = tpu.matmul %44, %43, %cst_13 {dimension_numbers = #tpu.dot_dimension_numbers<[1], [0], [0], [1], [0, 0, 1, 1], [], []>} : vector<8x8xbf16>, vector<8x896xbf16>, vector<8x896xf32> -> vector<8x896xf32>
    %46 = arith.addf %42, %45 : vector<8x896xf32>
    %47 = vector.extract_strided_slice %0 {offsets = [0, 102], sizes = [8, 896], strides = [1, 1]} : vector<8x1152xbf16> to vector<8x896xbf16>
    %48 = vector.extract_strided_slice %1 {offsets = [0, 88], sizes = [8, 8], strides = [1, 1]} : vector<8x216xbf16> to vector<8x8xbf16>
    %cst_14 = arith.constant dense<0.000000e+00> : vector<8x896xf32>
    %49 = tpu.matmul %48, %47, %cst_14 {dimension_numbers = #tpu.dot_dimension_numbers<[1], [0], [0], [1], [0, 0, 1, 1], [], []>} : vector<8x8xbf16>, vector<8x896xbf16>, vector<8x896xf32> -> vector<8x896xf32>
    %50 = arith.addf %46, %49 : vector<8x896xf32>
    %51 = vector.extract_strided_slice %0 {offsets = [0, 110], sizes = [8, 896], strides = [1, 1]} : vector<8x1152xbf16> to vector<8x896xbf16>
    %52 = vector.extract_strided_slice %1 {offsets = [0, 96], sizes = [8, 8], strides = [1, 1]} : vector<8x216xbf16> to vector<8x8xbf16>
    %cst_15 = arith.constant dense<0.000000e+00> : vector<8x896xf32>
    %53 = tpu.matmul %52, %51, %cst_15 {dimension_numbers = #tpu.dot_dimension_numbers<[1], [0], [0], [1], [0, 0, 1, 1], [], []>} : vector<8x8xbf16>, vector<8x896xbf16>, vector<8x896xf32> -> vector<8x896xf32>
    %54 = arith.addf %50, %53 : vector<8x896xf32>
    %55 = vector.extract_strided_slice %0 {offsets = [0, 111], sizes = [8, 896], strides = [1, 1]} : vector<8x1152xbf16> to vector<8x896xbf16>
    %56 = vector.extract_strided_slice %1 {offsets = [0, 104], sizes = [8, 8], strides = [1, 1]} : vector<8x216xbf16> to vector<8x8xbf16>
    %cst_16 = arith.constant dense<0.000000e+00> : vector<8x896xf32>
    %57 = tpu.matmul %56, %55, %cst_16 {dimension_numbers = #tpu.dot_dimension_numbers<[1], [0], [0], [1], [0, 0, 1, 1], [], []>} : vector<8x8xbf16>, vector<8x896xbf16>, vector<8x896xf32> -> vector<8x896xf32>
    %58 = arith.addf %54, %57 : vector<8x896xf32>
    %59 = vector.extract_strided_slice %0 {offsets = [0, 112], sizes = [8, 896], strides = [1, 1]} : vector<8x1152xbf16> to vector<8x896xbf16>
    %60 = vector.extract_strided_slice %1 {offsets = [0, 112], sizes = [8, 8], strides = [1, 1]} : vector<8x216xbf16> to vector<8x8xbf16>
    %cst_17 = arith.constant dense<0.000000e+00> : vector<8x896xf32>
    %61 = tpu.matmul %60, %59, %cst_17 {dimension_numbers = #tpu.dot_dimension_numbers<[1], [0], [0], [1], [0, 0, 1, 1], [], []>} : vector<8x8xbf16>, vector<8x896xbf16>, vector<8x896xf32> -> vector<8x896xf32>
    %62 = arith.addf %58, %61 : vector<8x896xf32>
    %63 = vector.extract_strided_slice %0 {offsets = [0, 120], sizes = [8, 896], strides = [1, 1]} : vector<8x1152xbf16> to vector<8x896xbf16>
    %64 = vector.extract_strided_slice %1 {offsets = [0, 120], sizes = [8, 8], strides = [1, 1]} : vector<8x216xbf16> to vector<8x8xbf16>
    %cst_18 = arith.constant dense<0.000000e+00> : vector<8x896xf32>
    %65 = tpu.matmul %64, %63, %cst_18 {dimension_numbers = #tpu.dot_dimension_numbers<[1], [0], [0], [1], [0, 0, 1, 1], [], []>} : vector<8x8xbf16>, vector<8x896xbf16>, vector<8x896xf32> -> vector<8x896xf32>
    %66 = arith.addf %62, %65 : vector<8x896xf32>
    %67 = vector.extract_strided_slice %0 {offsets = [0, 121], sizes = [8, 896], strides = [1, 1]} : vector<8x1152xbf16> to vector<8x896xbf16>
    %68 = vector.extract_strided_slice %1 {offsets = [0, 128], sizes = [8, 8], strides = [1, 1]} : vector<8x216xbf16> to vector<8x8xbf16>
    %cst_19 = arith.constant dense<0.000000e+00> : vector<8x896xf32>
    %69 = tpu.matmul %68, %67, %cst_19 {dimension_numbers = #tpu.dot_dimension_numbers<[1], [0], [0], [1], [0, 0, 1, 1], [], []>} : vector<8x8xbf16>, vector<8x896xbf16>, vector<8x896xf32> -> vector<8x896xf32>
    %70 = arith.addf %66, %69 : vector<8x896xf32>
    %71 = vector.extract_strided_slice %0 {offsets = [0, 122], sizes = [8, 896], strides = [1, 1]} : vector<8x1152xbf16> to vector<8x896xbf16>
    %72 = vector.extract_strided_slice %1 {offsets = [0, 136], sizes = [8, 8], strides = [1, 1]} : vector<8x216xbf16> to vector<8x8xbf16>
    %cst_20 = arith.constant dense<0.000000e+00> : vector<8x896xf32>
    %73 = tpu.matmul %72, %71, %cst_20 {dimension_numbers = #tpu.dot_dimension_numbers<[1], [0], [0], [1], [0, 0, 1, 1], [], []>} : vector<8x8xbf16>, vector<8x896xbf16>, vector<8x896xf32> -> vector<8x896xf32>
    %74 = arith.addf %70, %73 : vector<8x896xf32>
    %75 = vector.extract_strided_slice %0 {offsets = [0, 200], sizes = [8, 896], strides = [1, 1]} : vector<8x1152xbf16> to vector<8x896xbf16>
    %76 = vector.extract_strided_slice %1 {offsets = [0, 144], sizes = [8, 8], strides = [1, 1]} : vector<8x216xbf16> to vector<8x8xbf16>
    %cst_21 = arith.constant dense<0.000000e+00> : vector<8x896xf32>
    %77 = tpu.matmul %76, %75, %cst_21 {dimension_numbers = #tpu.dot_dimension_numbers<[1], [0], [0], [1], [0, 0, 1, 1], [], []>} : vector<8x8xbf16>, vector<8x896xbf16>, vector<8x896xf32> -> vector<8x896xf32>
    %78 = arith.addf %74, %77 : vector<8x896xf32>
    %79 = vector.extract_strided_slice %0 {offsets = [0, 201], sizes = [8, 896], strides = [1, 1]} : vector<8x1152xbf16> to vector<8x896xbf16>
    %80 = vector.extract_strided_slice %1 {offsets = [0, 152], sizes = [8, 8], strides = [1, 1]} : vector<8x216xbf16> to vector<8x8xbf16>
    %cst_22 = arith.constant dense<0.000000e+00> : vector<8x896xf32>
    %81 = tpu.matmul %80, %79, %cst_22 {dimension_numbers = #tpu.dot_dimension_numbers<[1], [0], [0], [1], [0, 0, 1, 1], [], []>} : vector<8x8xbf16>, vector<8x896xbf16>, vector<8x896xf32> -> vector<8x896xf32>
    %82 = arith.addf %78, %81 : vector<8x896xf32>
    %83 = vector.extract_strided_slice %0 {offsets = [0, 202], sizes = [8, 896], strides = [1, 1]} : vector<8x1152xbf16> to vector<8x896xbf16>
    %84 = vector.extract_strided_slice %1 {offsets = [0, 160], sizes = [8, 8], strides = [1, 1]} : vector<8x216xbf16> to vector<8x8xbf16>
    %cst_23 = arith.constant dense<0.000000e+00> : vector<8x896xf32>
    %85 = tpu.matmul %84, %83, %cst_23 {dimension_numbers = #tpu.dot_dimension_numbers<[1], [0], [0], [1], [0, 0, 1, 1], [], []>} : vector<8x8xbf16>, vector<8x896xbf16>, vector<8x896xf32> -> vector<8x896xf32>
    %86 = arith.addf %82, %85 : vector<8x896xf32>
    %87 = vector.extract_strided_slice %0 {offsets = [0, 210], sizes = [8, 896], strides = [1, 1]} : vector<8x1152xbf16> to vector<8x896xbf16>
    %88 = vector.extract_strided_slice %1 {offsets = [0, 168], sizes = [8, 8], strides = [1, 1]} : vector<8x216xbf16> to vector<8x8xbf16>
    %cst_24 = arith.constant dense<0.000000e+00> : vector<8x896xf32>
    %89 = tpu.matmul %88, %87, %cst_24 {dimension_numbers = #tpu.dot_dimension_numbers<[1], [0], [0], [1], [0, 0, 1, 1], [], []>} : vector<8x8xbf16>, vector<8x896xbf16>, vector<8x896xf32> -> vector<8x896xf32>
    %90 = arith.addf %86, %89 : vector<8x896xf32>
    %91 = vector.extract_strided_slice %0 {offsets = [0, 211], sizes = [8, 896], strides = [1, 1]} : vector<8x1152xbf16> to vector<8x896xbf16>
    %92 = vector.extract_strided_slice %1 {offsets = [0, 176], sizes = [8, 8], strides = [1, 1]} : vector<8x216xbf16> to vector<8x8xbf16>
    %cst_25 = arith.constant dense<0.000000e+00> : vector<8x896xf32>
    %93 = tpu.matmul %92, %91, %cst_25 {dimension_numbers = #tpu.dot_dimension_numbers<[1], [0], [0], [1], [0, 0, 1, 1], [], []>} : vector<8x8xbf16>, vector<8x896xbf16>, vector<8x896xf32> -> vector<8x896xf32>
    %94 = arith.addf %90, %93 : vector<8x896xf32>
    %95 = vector.extract_strided_slice %0 {offsets = [0, 212], sizes = [8, 896], strides = [1, 1]} : vector<8x1152xbf16> to vector<8x896xbf16>
    %96 = vector.extract_strided_slice %1 {offsets = [0, 184], sizes = [8, 8], strides = [1, 1]} : vector<8x216xbf16> to vector<8x8xbf16>
    %cst_26 = arith.constant dense<0.000000e+00> : vector<8x896xf32>
    %97 = tpu.matmul %96, %95, %cst_26 {dimension_numbers = #tpu.dot_dimension_numbers<[1], [0], [0], [1], [0, 0, 1, 1], [], []>} : vector<8x8xbf16>, vector<8x896xbf16>, vector<8x896xf32> -> vector<8x896xf32>
    %98 = arith.addf %94, %97 : vector<8x896xf32>
    %99 = vector.extract_strided_slice %0 {offsets = [0, 220], sizes = [8, 896], strides = [1, 1]} : vector<8x1152xbf16> to vector<8x896xbf16>
    %100 = vector.extract_strided_slice %1 {offsets = [0, 192], sizes = [8, 8], strides = [1, 1]} : vector<8x216xbf16> to vector<8x8xbf16>
    %cst_27 = arith.constant dense<0.000000e+00> : vector<8x896xf32>
    %101 = tpu.matmul %100, %99, %cst_27 {dimension_numbers = #tpu.dot_dimension_numbers<[1], [0], [0], [1], [0, 0, 1, 1], [], []>} : vector<8x8xbf16>, vector<8x896xbf16>, vector<8x896xf32> -> vector<8x896xf32>
    %102 = arith.addf %98, %101 : vector<8x896xf32>
    %103 = vector.extract_strided_slice %0 {offsets = [0, 221], sizes = [8, 896], strides = [1, 1]} : vector<8x1152xbf16> to vector<8x896xbf16>
    %104 = vector.extract_strided_slice %1 {offsets = [0, 200], sizes = [8, 8], strides = [1, 1]} : vector<8x216xbf16> to vector<8x8xbf16>
    %cst_28 = arith.constant dense<0.000000e+00> : vector<8x896xf32>
    %105 = tpu.matmul %104, %103, %cst_28 {dimension_numbers = #tpu.dot_dimension_numbers<[1], [0], [0], [1], [0, 0, 1, 1], [], []>} : vector<8x8xbf16>, vector<8x896xbf16>, vector<8x896xf32> -> vector<8x896xf32>
    %106 = arith.addf %102, %105 : vector<8x896xf32>
    %107 = vector.extract_strided_slice %0 {offsets = [0, 222], sizes = [8, 896], strides = [1, 1]} : vector<8x1152xbf16> to vector<8x896xbf16>
    %108 = vector.extract_strided_slice %1 {offsets = [0, 208], sizes = [8, 8], strides = [1, 1]} : vector<8x216xbf16> to vector<8x8xbf16>
    %cst_29 = arith.constant dense<0.000000e+00> : vector<8x896xf32>
    %109 = tpu.matmul %108, %107, %cst_29 {dimension_numbers = #tpu.dot_dimension_numbers<[1], [0], [0], [1], [0, 0, 1, 1], [], []>} : vector<8x8xbf16>, vector<8x896xbf16>, vector<8x896xf32> -> vector<8x896xf32>
    %110 = arith.addf %106, %109 : vector<8x896xf32>
    %c0_30 = arith.constant 0 : index
    %c0_31 = arith.constant 0 : index
    %111 = vector.load %arg3[%c0_30, %c0_31] : memref<8x1xf32, #tpu.memory_space<vmem>>, vector<8x1xf32>
    %112 = vector.broadcast %111 : vector<8x1xf32> to vector<8x896xf32>
    %113 = arith.addf %110, %112 : vector<8x896xf32>
    %cst_32 = arith.constant 0.000000e+00 : f32
    %114 = vector.broadcast %cst_32 : f32 to vector<8x896xf32>
    %115 = arith.maximumf %113, %114 : vector<8x896xf32>
    %116 = arith.truncf %115 : vector<8x896xf32> to vector<8x896xbf16>
    %c0_33 = arith.constant 0 : index
    %c0_34 = arith.constant 0 : index
    %117 = vector.load %arg6[%c0_33, %c0_34] : memref<8x896xbf16, #tpu.memory_space<vmem>>, vector<8x896xbf16>
    tpu.vector_store %arg6[%c0_33, %c0_34], %116 {strides = array<i32>} : memref<8x896xbf16, #tpu.memory_space<vmem>>, vector<8x896xbf16>,
    %118 = arith.mulf %115, %115 : vector<8x896xf32>
    %cst_35 = arith.constant dense<0.000000e+00> : vector<896xf32>
    %119 = vector.multi_reduction <add>, %118, %cst_35 [0] : vector<8x896xf32> to vector<896xf32>
    %120 = vector.shape_cast %119 : vector<896xf32> to vector<1x896xf32>
    %cst_36 = arith.constant 1.000000e-24 : f32
    %121 = vector.broadcast %cst_36 : f32 to vector<1x896xf32>
    %122 = arith.maximumf %120, %121 : vector<1x896xf32>
    %123 = math.rsqrt %122 : vector<1x896xf32>
    %124 = vector.broadcast %123 : vector<1x896xf32> to vector<8x896xf32>
    %125 = arith.mulf %115, %124 : vector<8x896xf32>
    %126 = arith.truncf %125 : vector<8x896xf32> to vector<8x896xbf16>
    %c0_37 = arith.constant 0 : index
    %c0_38 = arith.constant 0 : index
    %127 = vector.load %arg7[%c0_37, %c0_38] : memref<8x896xbf16, #tpu.memory_space<vmem>>, vector<8x896xbf16>
    tpu.vector_store %arg7[%c0_37, %c0_38], %126 {strides = array<i32>} : memref<8x896xbf16, #tpu.memory_space<vmem>>, vector<8x896xbf16>,
    %c0_i32 = arith.constant 0 : i32
    %128 = arith.cmpi eq, %arg1, %c0_i32 : i32
    %129 = arith.extui %128 : i1 to i32
    %c0_i32_39 = arith.constant 0 : i32
    %130 = arith.cmpi ne, %129, %c0_i32_39 : i32
    scf.if %130 {
      %cst_47 = arith.constant 0.000000e+00 : f32
      %136 = vector.broadcast %cst_47 : f32 to vector<8x128xf32>
      %c0_48 = arith.constant 0 : index
      %c0_49 = arith.constant 0 : index
      %137 = vector.load %arg8[%c0_48, %c0_49] : memref<8x128xf32, #tpu.memory_space<vmem>>, vector<8x128xf32>
      tpu.vector_store %arg8[%c0_48, %c0_49], %136 {strides = array<i32>} : memref<8x128xf32, #tpu.memory_space<vmem>>, vector<8x128xf32>,
    } else {
    }
    %c0_40 = arith.constant 0 : index
    %c0_41 = arith.constant 0 : index
    %131 = vector.load %arg8[%c0_40, %c0_41] : memref<8x128xf32, #tpu.memory_space<vmem>>, vector<8x128xf32>
    %c0_42 = arith.constant 0 : index
    %c0_43 = arith.constant 0 : index
    %132 = vector.load %arg5[%c0_42, %c0_43] : memref<896x128xbf16, #tpu.memory_space<vmem>>, vector<896x128xbf16>
    %cst_44 = arith.constant dense<0.000000e+00> : vector<8x128xf32>
    %133 = tpu.matmul %116, %132, %cst_44 {dimension_numbers = #tpu.dot_dimension_numbers<[1], [0], [0], [1], [0, 0, 1, 1], [], []>} : vector<8x896xbf16>, vector<896x128xbf16>, vector<8x128xf32> -> vector<8x128xf32>
    %134 = arith.addf %131, %133 : vector<8x128xf32>
    %c0_45 = arith.constant 0 : index
    %c0_46 = arith.constant 0 : index
    %135 = vector.load %arg8[%c0_45, %c0_46] : memref<8x128xf32, #tpu.memory_space<vmem>>, vector<8x128xf32>
    tpu.vector_store %arg8[%c0_45, %c0_46], %134 {strides = array<i32>} : memref<8x128xf32, #tpu.memory_space<vmem>>, vector<8x128xf32>,
    return
  }
  func.func @transform_0(%arg0: i32, %arg1: i32) -> (i32, i32) {
    %c0_i32 = arith.constant 0 : i32
    %c0_i32_0 = arith.constant 0 : i32
    %c0_i32_1 = arith.constant 0 : i32
    return %c0_i32, %c0_i32_0 : i32, i32
  }
  func.func @transform_1(%arg0: i32, %arg1: i32) -> (i32, i32) {
    %c0_i32 = arith.constant 0 : i32
    %c0_i32_0 = arith.constant 0 : i32
    %c0_i32_1 = arith.constant 0 : i32
    return %c0_i32, %c0_i32_0 : i32, i32
  }
  func.func @transform_2(%arg0: i32, %arg1: i32) -> (i32, i32) {
    %c1_i32 = arith.constant 1 : i32
    %0 = arith.muli %arg0, %c1_i32 : i32
    %1 = arith.addi %0, %arg1 : i32
    %c0_i32 = arith.constant 0 : i32
    %c0_i32_0 = arith.constant 0 : i32
    return %1, %c0_i32 : i32, i32
  }
  func.func @transform_3(%arg0: i32, %arg1: i32) -> (i32, i32) {
    %c1_i32 = arith.constant 1 : i32
    %0 = arith.muli %arg0, %c1_i32 : i32
    %1 = arith.addi %0, %arg1 : i32
    %c0_i32 = arith.constant 0 : i32
    %c0_i32_0 = arith.constant 0 : i32
    return %1, %c0_i32 : i32, i32
  }
  func.func @transform_4(%arg0: i32, %arg1: i32) -> (i32, i32) {
    %c1_i32 = arith.constant 1 : i32
    %0 = arith.muli %arg0, %c1_i32 : i32
    %1 = arith.addi %0, %arg1 : i32
    %c0_i32 = arith.constant 0 : i32
    %c0_i32_0 = arith.constant 0 : i32
    return %c0_i32, %1 : i32, i32
  }
  func.func @transform_5(%arg0: i32, %arg1: i32) -> (i32, i32) {
    %c1_i32 = arith.constant 1 : i32
    %0 = arith.muli %arg0, %c1_i32 : i32
    %1 = arith.addi %0, %arg1 : i32
    %c0_i32 = arith.constant 0 : i32
    %c0_i32_0 = arith.constant 0 : i32
    return %c0_i32, %1 : i32, i32
  }
  func.func @transform_6(%arg0: i32, %arg1: i32) -> (i32, i32) {
    %c0_i32 = arith.constant 0 : i32
    %c0_i32_0 = arith.constant 0 : i32
    return %arg0, %c0_i32 : i32, i32
  }
}

</mosaic_0001>

<bundles_post_ra>
// kernel: tpu_custom_call.1
= control target key start
LH: loop header
LB: loop body
LE: loop exit
PB: predicated region body
PF: predicated region fallthrough
CT: control target
= control target key end

     0   :  { %12 = vsyncpa [#allocation3], 0  ;;  %s9256_s0 = inlined_call_operand.vmem [shape: bf16[8,216], index: 0, kind: input, shape index: {}]   ;;  %s9257_s1 = inlined_call_operand.vmem [shape: f32[8,1], index: 1, kind: input, shape index: {}]   ;;  %s9258_s2 = inlined_call_operand.hbm [shape: bf16[8,1152], index: 2, kind: input, shape index: {}]   ;;  %s9259_s3 = inlined_call_operand.hbm [shape: bf16[896,128], index: 3, kind: input, shape index: {}]   ;;  %s9260_s4 = inlined_call_operand.hbm [shape: bf16[8,896], index: 4, kind: output, shape index: {0}]   ;;  %s9261_s5 = inlined_call_operand.hbm [shape: bf16[8,896], index: 5, kind: output, shape index: {1}]   ;;  %s9262_s6 = inlined_call_operand.hbm [shape: f32[8,128], index: 6, kind: output, shape index: {2}]  }
   0x1   :  { %13 = vsyncpa [#allocation6], 0 }
   0x2   :  { %14 = vsyncpa [#allocation4], 0 }
   0x3   :  { %15 = vsyncpa [#allocation9], 0  ;;  %s7644_s21 = smov [#allocation2]   ;;  %s7645_s23 = smov [#allocation5]  }
   0x4   :  { %s30_s22 = sshll.u32 %s7644_s21, 4  ;;  %s43_s24 = sshll.u32 %s7645_s23, 4  ;;  %s31_s22 = int_to_ptr.vmem [resolvable:$true] %s30_s22  ;;  %s44_s24 = int_to_ptr.vmem [resolvable:$true] %s43_s24 }
   0x5   :  { %s7544_s25 = scalar_lea.vmem %s31_s22, 576  ;;  %p7549_p1 = scmp.lt.s32.totalorder %s31_s22, %s31_s22 }
   0x6   :  { %p7545_p0 = scmp.ne.s32.totalorder %s31_s22, %s7544_s25  ;;  %p7550_p2 = scmp.lt.s32.totalorder %s7544_s25, %s7544_s25 }
   0x8   :  { %p7551_p3 = por %p7550_p2, %p7549_p1 }
   0xa   :  { %p7552_p4 = pnand %p7551_p3, %p7545_p0 }
   0xc   :  { %7555 = shalt.err (!%p7552_p4)
}
   0xd   :  { %33 = dma.hbm_to_vmem [thread:$0]  %s9258_s2, 576, %s31_s22, [#allocation3]  }
   0xe   :  { %s7564_s28 = scalar_lea.vmem %s44_s24, 7168  ;;  %p7569_p6 = scmp.lt.s32.totalorder %s44_s24, %s44_s24 }
   0xf   :  { %p7565_p5 = scmp.ne.s32.totalorder %s44_s24, %s7564_s28  ;;  %p7570_p7 = scmp.lt.s32.totalorder %s7564_s28, %s7564_s28 }
  0x11   :  { %p7571_p8 = por %p7570_p7, %p7569_p6 }
  0x13   :  { %p7572_p9 = pnand %p7571_p8, %p7565_p5 }
  0x15   :  { %7575 = shalt.err (!%p7572_p9)
}
  0x16   :  { %s7646_s29 = smov 64   ;;  %s7647_s30 = smov 4  }
  0x17   :  { %49 = dma.hbm_to_vmem [thread:$0]  %s9259_s3, 7168, %s44_s24, [#allocation6], %s7646_s29, %s7646_s29, %s7647_s30  }
  0x18   :  { %7636 = dma.done.wait [#allocation3], 576  }
  0x19   :  { %7637 = vsyncadd [#allocation3], 4294966720 }
  0x1a   :  { %7638 = dma.done.wait [#allocation6], 7168  }
  0x1b   :  { %7639 = vsyncadd [#allocation6], 4294960128  ;;  %v7648_v0 = vmov 0   ;;  %v65_v1 = vld [vmem:[#allocation2 + $0x8] sm:$0xff]  ;;  %v64_v2 = vld [vmem:[#allocation2] sm:$0xff]  ;;  %s7649_s3 = smov 127  }
  0x1c   :  { %177 = vmatprep.mubr.bf16.mxu0 %v7648_v0  ;;  %218 = vmatprep.mubr.bf16.mxu1 %v7648_v0  ;;  %v7741_v3 = vld [vmem:[%s9256_s0] sm:$0xff]  ;;  %v7743_v4 = vcombine.low %v65_v1, %v65_v1  ;;  %v7745_v5 = vcombine.low %v64_v2, %v64_v2  ;;  %v66_v6 = vld [vmem:[#allocation2 + $0x10] sm:$0xff]  ;;  %v7748_v7 = vcombine.high %v64_v2, %v64_v2  ;;  %s7650_s10 = smov 120   ;;  %v67_v11 = vld [vmem:[#allocation2 + $0x18] sm:$0xff]  ;;  %s7651_s11 = smov 126   ;;  %vm111_vm0 = vcmask 1039360  }
  0x1d   :  { %7451 = vset.pattern.permute.xlu1 %v7648_v0  ;;  %7452 = vset.pattern.permute.xlu0 %v7648_v0  ;;  %v7753_v8 = vcombine.low %v7741_v3, %v7741_v3  ;;  %v7758_v9 = vcombine.low %v66_v6, %v66_v6  ;;  %v7760_v10 = vcombine.high %v65_v1, %v65_v1  ;;  %s7652_s12 = smov 112   ;;  %s7653_s13 = smov 118   ;;  %vm123_vm1 = vcmask 1043456  }
  0x1e   :  { %99 = vrot.lane.b32.xlu1 %v7743_v4, %s7649_s3  ;;  %95 = vrot.lane.b32.xlu0 %v7745_v5, %s7649_s3  ;;  %v7764_v12 = vcombine.low %v67_v11, %v67_v11  ;;  %v7766_v13 = vcombine.high %v66_v6, %v66_v6  ;;  %v7770_v14 = vcombine.high %v67_v11, %v67_v11  ;;  %s7654_s14 = smov 104   ;;  %s7655_s15 = smov 117   ;;  %vm119_vm2 = vcmask 64512  }
  0x1f   :  { %s7656_s16 = smov 96   ;;  %s7657_s17 = smov 116   ;;  %v7664_v31 = vmov 0.0   ;;  %vm7665_vm3 = vmmov 0   ;;  %v312_v36 = vsel %vm123_vm1, %v7745_v5, 0  ;;  %v318_v40 = vsel %vm123_vm1, %v7743_v4, 0 }
  0x20   :  { %s7658_s18 = smov 88   ;;  %s7659_s19 = smov 108   ;;  %vm513_vm4 = vcmask 1031168   ;;  %v324_v43 = vsel %vm123_vm1, %v7758_v9, 0  ;;  %v330_v47 = vsel %vm123_vm1, %v7764_v12, 0  ;;  %vm733_vm5 = vcmask 965632  }
  0x21   :  { %s7660_s20 = smov 80   ;;  %s7661_s21 = smov 107   ;;  %vm953_vm6 = vcmask 957440   ;;  %vm1173_vm7 = vcmask 949248   ;;  %vm1393_vm8 = vcmask 883712   ;;  %vm1613_vm9 = vcmask 875520  }
  0x22   :  { %73 = vrot.lane.b32.xlu1 %v7753_v8, %s7650_s10  ;;  %97 = vrot.lane.b32.xlu0 %v7748_v7, %s7649_s3  ;;  %s7662_s22 = smov 72   ;;  %s7663_s23 = smov 106   ;;  %vm1833_vm10 = vcmask 867328   ;;  %vm2053_vm11 = vcmask 228352   ;;  %vm2273_vm12 = vcmask 220160   ;;  %vm2493_vm13 = vcmask 211968  }
  0x23   :  { %s7666_s24 = smov 28   ;;  %s7667_s25 = smov 56   ;;  %vm2713_vm14 = vcmask 146432   ;;  %vm2933_vm15 = vcmask 138240  }
  0x24   :  { %s7668_s26 = smov 27   ;;  %s7669_s27 = smov 48  }
  0x25   :  { %s7670_s28 = smov 26   ;;  %s7671_s30 = smov 40  }
  0x26   :  { %103 = vrot.lane.b32.xlu1 %v7758_v9, %s7649_s3  ;;  %101 = vrot.lane.b32.xlu0 %v7760_v10, %s7649_s3  ;;  %s7672_s7 = smov 18   ;;  %s7673_s8 = smov 32  }
  0x27   :  { %s7674_s2 = smov 17   ;;  %s7675_s9 = smov 24  }
  0x2a   :  { %107 = vrot.lane.b32.xlu1 %v7764_v12, %s7649_s3  ;;  %105 = vrot.lane.b32.xlu0 %v7766_v13, %s7649_s3 }
  0x2e   :  { %497 = vrot.lane.b32.xlu1 %v7745_v5, %s7651_s11  ;;  %109 = vrot.lane.b32.xlu0 %v7770_v14, %s7649_s3  ;;  %s7676_s3 = smov 16  }
  0x32   :  { %501 = vrot.lane.b32.xlu1 %v7743_v4, %s7651_s11  ;;  %499 = vrot.lane.b32.xlu0 %v7748_v7, %s7651_s11 }
  0x36   :  { %503 = vrot.lane.b32.xlu1 %v7760_v10, %s7651_s11  ;;  %495 = vrot.lane.b32.xlu0 %v7753_v8, %s7652_s12 }
  0x3a   :  { %507 = vrot.lane.b32.xlu1 %v7766_v13, %s7651_s11  ;;  %505 = vrot.lane.b32.xlu0 %v7758_v9, %s7651_s11 }
  0x3e   :  { %511 = vrot.lane.b32.xlu1 %v7770_v14, %s7651_s11  ;;  %509 = vrot.lane.b32.xlu0 %v7764_v12, %s7651_s11  ;;  %s7677_s11 = smov 8  }
  0x42   :  { %719 = vrot.lane.b32.xlu1 %v7748_v7, %s7653_s13  ;;  %717 = vrot.lane.b32.xlu0 %v7745_v5, %s7653_s13 }
  0x46   :  { %715 = vrot.lane.b32.xlu1 %v7753_v8, %s7654_s14  ;;  %721 = vrot.lane.b32.xlu0 %v7743_v4, %s7653_s13 }
  0x4a   :  { %725 = vrot.lane.b32.xlu1 %v7758_v9, %s7653_s13  ;;  %723 = vrot.lane.b32.xlu0 %v7760_v10, %s7653_s13 }
  0x4e   :  { %729 = vrot.lane.b32.xlu1 %v7764_v12, %s7653_s13  ;;  %727 = vrot.lane.b32.xlu0 %v7766_v13, %s7653_s13 }
  0x52   :  { %937 = vrot.lane.b32.xlu1 %v7745_v5, %s7655_s15  ;;  %731 = vrot.lane.b32.xlu0 %v7770_v14, %s7653_s13  ;;  %s7678_s13 = smov 7  }
  0x56   :  { %941 = vrot.lane.b32.xlu1 %v7743_v4, %s7655_s15  ;;  %939 = vrot.lane.b32.xlu0 %v7748_v7, %s7655_s15 }
  0x5a   :  { %943 = vrot.lane.b32.xlu1 %v7760_v10, %s7655_s15  ;;  %935 = vrot.lane.b32.xlu0 %v7753_v8, %s7656_s16 }
  0x5e   :  { %947 = vrot.lane.b32.xlu1 %v7766_v13, %s7655_s15  ;;  %945 = vrot.lane.b32.xlu0 %v7758_v9, %s7655_s15 }
  0x62   :  { %951 = vrot.lane.b32.xlu1 %v7770_v14, %s7655_s15  ;;  %949 = vrot.lane.b32.xlu0 %v7764_v12, %s7655_s15  ;;  %s7679_s15 = smov 6  }
  0x66   :  { %1159 = vrot.lane.b32.xlu1 %v7748_v7, %s7657_s17  ;;  %1157 = vrot.lane.b32.xlu0 %v7745_v5, %s7657_s17 }
  0x6a   :  { %1155 = vrot.lane.b32.xlu1 %v7753_v8, %s7658_s18  ;;  %1161 = vrot.lane.b32.xlu0 %v7743_v4, %s7657_s17 }
  0x6e   :  { %1165 = vrot.lane.b32.xlu1 %v7758_v9, %s7657_s17  ;;  %1163 = vrot.lane.b32.xlu0 %v7760_v10, %s7657_s17 }
  0x72   :  { %1169 = vrot.lane.b32.xlu1 %v7764_v12, %s7657_s17  ;;  %1167 = vrot.lane.b32.xlu0 %v7766_v13, %s7657_s17 }
  0x76   :  { %1377 = vrot.lane.b32.xlu1 %v7745_v5, %s7659_s19  ;;  %1171 = vrot.lane.b32.xlu0 %v7770_v14, %s7657_s17 }
  0x7a   :  { %1381 = vrot.lane.b32.xlu1 %v7743_v4, %s7659_s19  ;;  %1379 = vrot.lane.b32.xlu0 %v7748_v7, %s7659_s19 }
  0x7e   :  { %1383 = vrot.lane.b32.xlu1 %v7760_v10, %s7659_s19  ;;  %1375 = vrot.lane.b32.xlu0 %v7753_v8, %s7660_s20 }
  0x82   :  { %1387 = vrot.lane.b32.xlu1 %v7766_v13, %s7659_s19  ;;  %1385 = vrot.lane.b32.xlu0 %v7758_v9, %s7659_s19 }
  0x86   :  { %1391 = vrot.lane.b32.xlu1 %v7770_v14, %s7659_s19  ;;  %1389 = vrot.lane.b32.xlu0 %v7764_v12, %s7659_s19 }
  0x8a   :  { %1599 = vrot.lane.b32.xlu1 %v7748_v7, %s7661_s21  ;;  %1597 = vrot.lane.b32.xlu0 %v7745_v5, %s7661_s21 }
  0x8e   :  { %1595 = vrot.lane.b32.xlu1 %v7753_v8, %s7662_s22  ;;  %1601 = vrot.lane.b32.xlu0 %v7743_v4, %s7661_s21 }
  0x90   :  { %v100_v15 = vpop.permute.xlu1 %99  ;;  %v96_v16 = vpop.permute.xlu0 %95 }
  0x92   :  { %1605 = vrot.lane.b32.xlu1 %v7758_v9, %s7661_s21  ;;  %1603 = vrot.lane.b32.xlu0 %v7760_v10, %s7661_s21 }
  0x94   :  { %v74_v17 = vpop.permute.xlu1 %73  ;;  %v98_v18 = vpop.permute.xlu0 %97 }
  0x95   :  { %v113_v19 = vsel %vm111_vm0, %v98_v18, %v100_v15  ;;  %v112_v20 = vsel %vm111_vm0, %v96_v16, %v98_v18 }
  0x96   :  { %1609 = vrot.lane.b32.xlu1 %v7764_v12, %s7661_s21  ;;  %1607 = vrot.lane.b32.xlu0 %v7766_v13, %s7661_s21  ;;  %v125_v21 = vsel %vm123_vm1, %v112_v20, 0 }
  0x97   :  { %6830 = vmatprep.subr.msk.bf16.mxu0 %vm123_vm1, %v113_v19 }
  0x98   :  { %160 = vmatpush1.bf16.msra.mxu0 %v125_v21  ;;  %v104_v22 = vpop.permute.xlu1 %103  ;;  %v102_v23 = vpop.permute.xlu0 %101 }
  0x99   :  { %v115_v24 = vsel %vm111_vm0, %v102_v23, %v104_v22  ;;  %v114_v25 = vsel %vm111_vm0, %v100_v15, %v102_v23 }
  0x9a   :  { %1817 = vrot.lane.b32.xlu1 %v7745_v5, %s7663_s23  ;;  %1611 = vrot.lane.b32.xlu0 %v7770_v14, %s7661_s21  ;;  %v131_v26 = vsel %vm123_vm1, %v114_v25, 0 }
  0x9b   :  { %6831 = vmatmul.mubr.msk.bf16.vlgmr.msra.gmra.mxu0 %vm119_vm2, %v74_v17  ;;  %6832 = vmatprep.subr.msk.bf16.mxu1 %vm123_vm1, %v115_v24 }
  0x9c   :  { %201 = vmatpush1.bf16.msra.mxu1 %v131_v26  ;;  %v108_v27 = vpop.permute.xlu1 %107  ;;  %v106_v28 = vpop.permute.xlu0 %105  ;;  %259 = vmatprep.mubr.bf16.mxu0 %v7648_v0 }
  0x9d   :  { %v116_v29 = vsel %vm111_vm0, %v104_v22, %v106_v28  ;;  %v117_v30 = vsel %vm111_vm0, %v106_v28, %v108_v27  ;;  %7222 = vmatprep.subr.bf16.mxu1 %v7664_v31 }
  0x9e   :  { %1821 = vrot.lane.b32.xlu1 %v7743_v4, %s7663_s23  ;;  %1819 = vrot.lane.b32.xlu0 %v7748_v7, %s7663_s23  ;;  %v137_v32 = vsel %vm123_vm1, %v116_v29, 0 }
  0x9f   :  { %6833 = vmatmul.mubr.msk.bf16.vlgmr.msra.gmra.mxu1 %vm119_vm2, %v74_v17  ;;  %6834 = vmatprep.subr.msk.bf16.mxu0 %vm123_vm1, %v117_v30 }
  0xa0   :  { %242 = vmatpush1.bf16.msra.mxu0 %v137_v32  ;;  %v498_v33 = vpop.permute.xlu1 %497  ;;  %v110_v34 = vpop.permute.xlu0 %109  ;;  %7224 = vmatprep.mubr.msk.bf16.mxu1 %vm7665_vm3, %v7664_v31 }
  0xa1   :  { %v118_v35 = vsel %vm111_vm0, %v108_v27, %v110_v34  ;;  %6837 = vmatprep.subr.msk.bf16.mxu0 %vm123_vm1, %v7748_v7  ;;  %vm3153_vm0 = vcmask 130048  }
  0xa2   :  { %v143_v37 = vsel %vm123_vm1, %v118_v35, 0  ;;  %1823 = vrot.lane.b32.xlu1 %v7760_v10, %s7663_s23  ;;  %1815 = vrot.lane.b32.xlu0 %v7753_v8, %s7646_s29 }
  0xa3   :  { %6835 = vmatmul.mubr.msk.bf16.vlgmr.msra.gmra.mxu0 %vm119_vm2, %v74_v17  ;;  %7223 = vmatpush3.bf16.msra.mxu1 %v143_v37 }
  0xa4   :  { %v502_v38 = vpop.permute.xlu1 %501  ;;  %v500_v39 = vpop.permute.xlu0 %499  ;;  %347 = vmatpush1.bf16.msra.mxu0 %v312_v36  ;;  %364 = vmatprep.mubr.bf16.mxu0 %v7648_v0 }
  0xa5   :  { %6839 = vmatprep.subr.msk.bf16.mxu1 %vm123_vm1, %v7760_v10  ;;  %6841 = vmatprep.subr.msk.bf16.mxu0 %vm123_vm1, %v7766_v13  ;;  %v515_v44 = vsel %vm513_vm4, %v500_v39, %v502_v38  ;;  %v514_v49 = vsel %vm513_vm4, %v498_v33, %v500_v39 }
  0xa6   :  { %1827 = vrot.lane.b32.xlu1 %v7766_v13, %s7663_s23  ;;  %1825 = vrot.lane.b32.xlu0 %v7758_v9, %s7663_s23  ;;  %v525_v53 = vsel %vm123_vm1, %v514_v49, 0 }
  0xa7   :  { %7225 = vmatmul.mubr.msk.bf16.vlgmr.msra.gmra.mxu1 %vm119_vm2, %v74_v17 }
  0xa8   :  { %v504_v41 = vpop.permute.xlu1 %503  ;;  %v7880_v42 = vpop.permute.xlu0 %495  ;;  %388 = vmatpush1.bf16.msra.mxu1 %v318_v40  ;;  %405 = vmatprep.mubr.bf16.mxu1 %v7648_v0 }
  0xa9   :  { %7228 = vmatprep.subr.bf16.mxu1 %v7664_v31  ;;  %v516_v54 = vsel %vm513_vm4, %v502_v38, %v504_v41 }
  0xaa   :  { %1831 = vrot.lane.b32.xlu1 %v7770_v14, %s7663_s23  ;;  %1829 = vrot.lane.b32.xlu0 %v7764_v12, %s7663_s23  ;;  %v531_v57 = vsel %vm123_vm1, %v516_v54, 0 }
  0xab   :  { %6838 = vmatmul.mubr.msk.bf16.vlgmr.msra.gmra.mxu0 %vm119_vm2, %v7741_v3 }
  0xac   :  { %429 = vmatpush1.bf16.msra.mxu0 %v324_v43  ;;  %v508_v45 = vpop.permute.xlu1 %507  ;;  %v506_v46 = vpop.permute.xlu0 %505  ;;  %446 = vmatprep.mubr.bf16.mxu0 %v7648_v0 }
  0xad   :  { %6844 = vmatprep.subr.msk.bf16.mxu0 %vm123_vm1, %v515_v44  ;;  %v517_v48 = vsel %vm513_vm4, %v504_v41, %v506_v46  ;;  %v518_v58 = vsel %vm513_vm4, %v506_v46, %v508_v45 }
  0xae   :  { %2039 = vrot.lane.b32.xlu1 %v7748_v7, %s7666_s24  ;;  %2037 = vrot.lane.b32.xlu0 %v7745_v5, %s7666_s24  ;;  %v537_v62 = vsel %vm123_vm1, %v518_v58, 0 }
  0xaf   :  { %6840 = vmatmul.mubr.msk.bf16.vlgmr.msra.gmra.mxu1 %vm119_vm2, %v7741_v3 }
  0xb0   :  { %7229 = vmatpush3.bf16.msra.mxu1 %v330_v47  ;;  %v512_v50 = vpop.permute.xlu1 %511  ;;  %v510_v51 = vpop.permute.xlu0 %509  ;;  %7230 = vmatprep.mubr.msk.bf16.mxu1 %vm7665_vm3, %v7664_v31 }
  0xb1   :  { %6846 = vmatprep.subr.msk.bf16.mxu1 %vm123_vm1, %v517_v48  ;;  %v519_v52 = vsel %vm513_vm4, %v508_v45, %v510_v51  ;;  %v520_v63 = vsel %vm513_vm4, %v510_v51, %v512_v50  ;;  %vm3593_vm4 = vcmask 56320  }
  0xb2   :  { %2035 = vrot.lane.b32.xlu1 %v7753_v8, %s7667_s25  ;;  %2041 = vrot.lane.b32.xlu0 %v7743_v4, %s7666_s24  ;;  %v543_v6 = vsel %vm123_vm1, %v520_v63, 0 }
  0xb3   :  { %6842 = vmatmul.mubr.msk.bf16.vlgmr.msra.gmra.mxu0 %vm119_vm2, %v7741_v3 }
  0xb4   :  { %560 = vmatpush1.bf16.msra.mxu0 %v525_v53  ;;  %v720_v55 = vpop.permute.xlu1 %719  ;;  %v718_v56 = vpop.permute.xlu0 %717  ;;  %577 = vmatprep.mubr.bf16.mxu0 %v7648_v0 }
  0xb5   :  { %6848 = vmatprep.subr.msk.bf16.mxu0 %vm123_vm1, %v519_v52  ;;  %v734_v11 = vsel %vm733_vm5, %v718_v56, %v720_v55 }
  0xb6   :  { %2045 = vrot.lane.b32.xlu1 %v7758_v9, %s7666_s24  ;;  %2043 = vrot.lane.b32.xlu0 %v7760_v10, %s7666_s24  ;;  %v745_v18 = vsel %vm123_vm1, %v734_v11, 0 }
  0xb7   :  { %7231 = vmatmul.mubr.msk.bf16.vlgmr.msra.gmra.mxu1 %vm119_vm2, %v7741_v3 }
  0xb8   :  { %601 = vmatpush1.bf16.msra.mxu1 %v531_v57  ;;  %v7927_v59 = vpop.permute.xlu1 %715  ;;  %v722_v60 = vpop.permute.xlu0 %721  ;;  %618 = vmatprep.mubr.bf16.mxu1 %v7648_v0 }
  0xb9   :  { %7234 = vmatprep.subr.bf16.mxu1 %v7664_v31  ;;  %v735_v61 = vsel %vm733_vm5, %v720_v55, %v722_v60 }
  0xba   :  { %2049 = vrot.lane.b32.xlu1 %v7764_v12, %s7666_s24  ;;  %2047 = vrot.lane.b32.xlu0 %v7766_v13, %s7666_s24 }
  0xbb   :  { %6845 = vmatmul.mubr.msk.bf16.vlgmr.msra.gmra.mxu0 %vm119_vm2, %v7880_v42 }
  0xbc   :  { %642 = vmatpush1.bf16.msra.mxu0 %v537_v62  ;;  %v726_v1 = vpop.permute.xlu1 %725  ;;  %v724_v2 = vpop.permute.xlu0 %723  ;;  %659 = vmatprep.mubr.bf16.mxu0 %v7648_v0 }
  0xbd   :  { %6851 = vmatprep.subr.msk.bf16.mxu0 %vm123_vm1, %v735_v61  ;;  %v737_v3 = vsel %vm733_vm5, %v724_v2, %v726_v1  ;;  %v736_v19 = vsel %vm733_vm5, %v722_v60, %v724_v2 }
  0xbe   :  { %2257 = vrot.lane.b32.xlu1 %v7745_v5, %s7668_s26  ;;  %2051 = vrot.lane.b32.xlu0 %v7770_v14, %s7666_s24  ;;  %v751_v22 = vsel %vm123_vm1, %v736_v19, 0 }
  0xbf   :  { %6847 = vmatmul.mubr.msk.bf16.vlgmr.msra.gmra.mxu1 %vm119_vm2, %v7880_v42 }
  0xc0   :  { %7235 = vmatpush3.bf16.msra.mxu1 %v543_v6  ;;  %v730_v15 = vpop.permute.xlu1 %729  ;;  %v728_v16 = vpop.permute.xlu0 %727  ;;  %7236 = vmatprep.mubr.msk.bf16.mxu1 %vm7665_vm3, %v7664_v31 }
  0xc1   :  { %6853 = vmatprep.subr.msk.bf16.mxu1 %vm123_vm1, %v737_v3  ;;  %v739_v17 = vsel %vm733_vm5, %v728_v16, %v730_v15  ;;  %v738_v23 = vsel %vm733_vm5, %v726_v1, %v728_v16 }
  0xc2   :  { %2261 = vrot.lane.b32.xlu1 %v7743_v4, %s7668_s26  ;;  %2259 = vrot.lane.b32.xlu0 %v7748_v7, %s7668_s26  ;;  %v757_v27 = vsel %vm123_vm1, %v738_v23, 0 }
  0xc3   :  { %6849 = vmatmul.mubr.msk.bf16.vlgmr.msra.gmra.mxu0 %vm119_vm2, %v7880_v42 }
  0xc4   :  { %780 = vmatpush1.bf16.msra.mxu0 %v745_v18  ;;  %v938_v20 = vpop.permute.xlu1 %937  ;;  %v732_v21 = vpop.permute.xlu0 %731  ;;  %797 = vmatprep.mubr.bf16.mxu0 %v7648_v0 }
  0xc5   :  { %6855 = vmatprep.subr.msk.bf16.mxu0 %vm123_vm1, %v739_v17  ;;  %v740_v28 = vsel %vm733_vm5, %v730_v15, %v732_v21  ;;  %vm3813_vm5 = vcmask 48128  }
  0xc6   :  { %2263 = vrot.lane.b32.xlu1 %v7760_v10, %s7668_s26  ;;  %2255 = vrot.lane.b32.xlu0 %v7753_v8, %s7669_s27  ;;  %v763_v32 = vsel %vm123_vm1, %v740_v28, 0 }
  0xc7   :  { %7237 = vmatmul.mubr.msk.bf16.vlgmr.msra.gmra.mxu1 %vm119_vm2, %v7880_v42 }
  0xc8   :  { %821 = vmatpush1.bf16.msra.mxu1 %v751_v22  ;;  %v942_v24 = vpop.permute.xlu1 %941  ;;  %v940_v25 = vpop.permute.xlu0 %939  ;;  %838 = vmatprep.mubr.bf16.mxu1 %v7648_v0 }
  0xc9   :  { %7240 = vmatprep.subr.bf16.mxu1 %v7664_v31  ;;  %v955_v26 = vsel %vm953_vm6, %v940_v25, %v942_v24  ;;  %v954_v33 = vsel %vm953_vm6, %v938_v20, %v940_v25 }
  0xca   :  { %2267 = vrot.lane.b32.xlu1 %v7766_v13, %s7668_s26  ;;  %2265 = vrot.lane.b32.xlu0 %v7758_v9, %s7668_s26  ;;  %v965_v37 = vsel %vm123_vm1, %v954_v33, 0 }
  0xcb   :  { %6852 = vmatmul.mubr.msk.bf16.vlgmr.msra.gmra.mxu0 %vm119_vm2, %v7927_v59 }
  0xcc   :  { %862 = vmatpush1.bf16.msra.mxu0 %v757_v27  ;;  %v944_v29 = vpop.permute.xlu1 %943  ;;  %v7984_v30 = vpop.permute.xlu0 %935  ;;  %879 = vmatprep.mubr.bf16.mxu0 %v7648_v0 }
  0xcd   :  { %6858 = vmatprep.subr.msk.bf16.mxu0 %vm123_vm1, %v955_v26  ;;  %v956_v38 = vsel %vm953_vm6, %v942_v24, %v944_v29 }
  0xce   :  { %2271 = vrot.lane.b32.xlu1 %v7770_v14, %s7668_s26  ;;  %2269 = vrot.lane.b32.xlu0 %v7764_v12, %s7668_s26  ;;  %v971_v42 = vsel %vm123_vm1, %v956_v38, 0 }
  0xcf   :  { %6854 = vmatmul.mubr.msk.bf16.vlgmr.msra.gmra.mxu1 %vm119_vm2, %v7927_v59 }
  0xd0   :  { %7241 = vmatpush3.bf16.msra.mxu1 %v763_v32  ;;  %v948_v34 = vpop.permute.xlu1 %947  ;;  %v946_v35 = vpop.permute.xlu0 %945  ;;  %7242 = vmatprep.mubr.msk.bf16.mxu1 %vm7665_vm3, %v7664_v31 }
  0xd1   :  { %v957_v36 = vsel %vm953_vm6, %v944_v29, %v946_v35  ;;  %v958_v43 = vsel %vm953_vm6, %v946_v35, %v948_v34 }
  0xd2   :  { %2479 = vrot.lane.b32.xlu1 %v7748_v7, %s7670_s28  ;;  %2477 = vrot.lane.b32.xlu0 %v7745_v5, %s7670_s28  ;;  %v977_v46 = vsel %vm123_vm1, %v958_v43, 0 }
  0xd3   :  { %6856 = vmatmul.mubr.msk.bf16.vlgmr.msra.gmra.mxu0 %vm119_vm2, %v7927_v59  ;;  %6860 = vmatprep.subr.msk.bf16.mxu1 %vm123_vm1, %v957_v36 }
  0xd4   :  { %1000 = vmatpush1.bf16.msra.mxu0 %v965_v37  ;;  %v952_v39 = vpop.permute.xlu1 %951  ;;  %v950_v40 = vpop.permute.xlu0 %949  ;;  %1017 = vmatprep.mubr.bf16.mxu0 %v7648_v0 }
  0xd5   :  { %v959_v41 = vsel %vm953_vm6, %v948_v34, %v950_v40  ;;  %v960_v47 = vsel %vm953_vm6, %v950_v40, %v952_v39  ;;  %vm4036_vm6 = vcmask 457728  }
  0xd6   :  { %2475 = vrot.lane.b32.xlu1 %v7753_v8, %s7671_s30  ;;  %2481 = vrot.lane.b32.xlu0 %v7743_v4, %s7670_s28  ;;  %v983_v51 = vsel %vm123_vm1, %v960_v47, 0 }
  0xd7   :  { %7243 = vmatmul.mubr.msk.bf16.vlgmr.msra.gmra.mxu1 %vm119_vm2, %v7927_v59  ;;  %6862 = vmatprep.subr.msk.bf16.mxu0 %vm123_vm1, %v959_v41 }
  0xd8   :  { %1041 = vmatpush1.bf16.msra.mxu1 %v971_v42  ;;  %v1160_v44 = vpop.permute.xlu1 %1159  ;;  %v1158_v45 = vpop.permute.xlu0 %1157  ;;  %1058 = vmatprep.mubr.bf16.mxu1 %v7648_v0 }
  0xd9   :  { %7246 = vmatprep.subr.bf16.mxu1 %v7664_v31  ;;  %v1174_v52 = vsel %vm1173_vm7, %v1158_v45, %v1160_v44 }
  0xda   :  { %2485 = vrot.lane.b32.xlu1 %v7758_v9, %s7670_s28  ;;  %2483 = vrot.lane.b32.xlu0 %v7760_v10, %s7670_s28  ;;  %v1185_v56 = vsel %vm123_vm1, %v1174_v52, 0 }
  0xdb   :  { %6859 = vmatmul.mubr.msk.bf16.vlgmr.msra.gmra.mxu0 %vm119_vm2, %v7984_v30 }
  0xdc   :  { %1082 = vmatpush1.bf16.msra.mxu0 %v977_v46  ;;  %v8028_v48 = vpop.permute.xlu1 %1155  ;;  %v1162_v49 = vpop.permute.xlu0 %1161  ;;  %1099 = vmatprep.mubr.bf16.mxu0 %v7648_v0 }
  0xdd   :  { %v1175_v50 = vsel %vm1173_vm7, %v1160_v44, %v1162_v49 }
  0xde   :  { %2489 = vrot.lane.b32.xlu1 %v7764_v12, %s7670_s28  ;;  %2487 = vrot.lane.b32.xlu0 %v7766_v13, %s7670_s28 }
  0xdf   :  { %6861 = vmatmul.mubr.msk.bf16.vlgmr.msra.gmra.mxu1 %vm119_vm2, %v7984_v30  ;;  %6865 = vmatprep.subr.msk.bf16.mxu0 %vm123_vm1, %v1175_v50 }
  0xe0   :  { %7247 = vmatpush3.bf16.msra.mxu1 %v983_v51  ;;  %v1166_v53 = vpop.permute.xlu1 %1165  ;;  %v1164_v54 = vpop.permute.xlu0 %1163  ;;  %7248 = vmatprep.mubr.msk.bf16.mxu1 %vm7665_vm3, %v7664_v31 }
  0xe1   :  { %v1177_v55 = vsel %vm1173_vm7, %v1164_v54, %v1166_v53  ;;  %v1176_v57 = vsel %vm1173_vm7, %v1162_v49, %v1164_v54 }
  0xe2   :  { %2697 = vrot.lane.b32.xlu1 %v7745_v5, %s7672_s7  ;;  %2491 = vrot.lane.b32.xlu0 %v7770_v14, %s7670_s28  ;;  %v1191_v61 = vsel %vm123_vm1, %v1176_v57, 0 }
  0xe3   :  { %6863 = vmatmul.mubr.msk.bf16.vlgmr.msra.gmra.mxu0 %vm119_vm2, %v7984_v30  ;;  %6867 = vmatprep.subr.msk.bf16.mxu1 %vm123_vm1, %v1177_v55 }
  0xe4   :  { %1220 = vmatpush1.bf16.msra.mxu0 %v1185_v56  ;;  %v1170_v58 = vpop.permute.xlu1 %1169  ;;  %v1168_v59 = vpop.permute.xlu0 %1167  ;;  %1237 = vmatprep.mubr.bf16.mxu0 %v7648_v0 }
  0xe5   :  { %v1179_v60 = vsel %vm1173_vm7, %v1168_v59, %v1170_v58  ;;  %v1178_v62 = vsel %vm1173_vm7, %v1166_v53, %v1168_v59 }
  0xe6   :  { %2701 = vrot.lane.b32.xlu1 %v7743_v4, %s7672_s7  ;;  %2699 = vrot.lane.b32.xlu0 %v7748_v7, %s7672_s7  ;;  %v1197_v2 = vsel %vm123_vm1, %v1178_v62, 0 }
  0xe7   :  { %7249 = vmatmul.mubr.msk.bf16.vlgmr.msra.gmra.mxu1 %vm119_vm2, %v7984_v30  ;;  %6869 = vmatprep.subr.msk.bf16.mxu0 %vm123_vm1, %v1179_v60 }
  0xe8   :  { %1261 = vmatpush1.bf16.msra.mxu1 %v1191_v61  ;;  %v1378_v63 = vpop.permute.xlu1 %1377  ;;  %v1172_v1 = vpop.permute.xlu0 %1171  ;;  %1278 = vmatprep.mubr.bf16.mxu1 %v7648_v0 }
  0xe9   :  { %7252 = vmatprep.subr.bf16.mxu1 %v7664_v31  ;;  %v1180_v3 = vsel %vm1173_vm7, %v1170_v58, %v1172_v1  ;;  %vm4256_vm7 = vcmask 449536  }
  0xea   :  { %2703 = vrot.lane.b32.xlu1 %v7760_v10, %s7672_s7  ;;  %2695 = vrot.lane.b32.xlu0 %v7753_v8, %s7673_s8  ;;  %v1203_v16 = vsel %vm123_vm1, %v1180_v3, 0 }
  0xeb   :  { %6866 = vmatmul.mubr.msk.bf16.vlgmr.msra.gmra.mxu0 %vm119_vm2, %v8028_v48 }
  0xec   :  { %1302 = vmatpush1.bf16.msra.mxu0 %v1197_v2  ;;  %v1382_v6 = vpop.permute.xlu1 %1381  ;;  %v1380_v11 = vpop.permute.xlu0 %1379  ;;  %1319 = vmatprep.mubr.bf16.mxu0 %v7648_v0 }
  0xed   :  { %v1395_v15 = vsel %vm1393_vm8, %v1380_v11, %v1382_v6  ;;  %v1394_v17 = vsel %vm1393_vm8, %v1378_v63, %v1380_v11 }
  0xee   :  { %2707 = vrot.lane.b32.xlu1 %v7766_v13, %s7672_s7  ;;  %2705 = vrot.lane.b32.xlu0 %v7758_v9, %s7672_s7  ;;  %v1405_v20 = vsel %vm123_vm1, %v1394_v17, 0 }
  0xef   :  { %6868 = vmatmul.mubr.msk.bf16.vlgmr.msra.gmra.mxu1 %vm119_vm2, %v8028_v48  ;;  %6872 = vmatprep.subr.msk.bf16.mxu0 %vm123_vm1, %v1395_v15 }
  0xf0   :  { %7253 = vmatpush3.bf16.msra.mxu1 %v1203_v16  ;;  %v1384_v18 = vpop.permute.xlu1 %1383  ;;  %v1376_v19 = vpop.permute.xlu0 %1375  ;;  %7254 = vmatprep.mubr.msk.bf16.mxu1 %vm7665_vm3, %v7664_v31 }
  0xf1   :  { %v1396_v21 = vsel %vm1393_vm8, %v1382_v6, %v1384_v18 }
  0xf2   :  { %2711 = vrot.lane.b32.xlu1 %v7770_v14, %s7672_s7  ;;  %2709 = vrot.lane.b32.xlu0 %v7764_v12, %s7672_s7  ;;  %v1411_v25 = vsel %vm123_vm1, %v1396_v21, 0 }
  0xf3   :  { %6870 = vmatmul.mubr.msk.bf16.vlgmr.msra.gmra.mxu0 %vm119_vm2, %v8028_v48 }
  0xf4   :  { %1440 = vmatpush1.bf16.msra.mxu0 %v1405_v20  ;;  %v1388_v22 = vpop.permute.xlu1 %1387  ;;  %v1386_v23 = vpop.permute.xlu0 %1385  ;;  %1457 = vmatprep.mubr.bf16.mxu0 %v7648_v0 }
  0xf5   :  { %v1397_v24 = vsel %vm1393_vm8, %v1384_v18, %v1386_v23  ;;  %v1398_v26 = vsel %vm1393_vm8, %v1386_v23, %v1388_v22 }
  0xf6   :  { %2919 = vrot.lane.b32.xlu1 %v7748_v7, %s7674_s2  ;;  %2917 = vrot.lane.b32.xlu0 %v7745_v5, %s7674_s2  ;;  %v1417_v30 = vsel %vm123_vm1, %v1398_v26, 0 }
  0xf7   :  { %7255 = vmatmul.mubr.msk.bf16.vlgmr.msra.gmra.mxu1 %vm119_vm2, %v8028_v48  ;;  %6874 = vmatprep.subr.msk.bf16.mxu1 %vm123_vm1, %v1397_v24 }
  0xf8   :  { %1481 = vmatpush1.bf16.msra.mxu1 %v1411_v25  ;;  %v1392_v27 = vpop.permute.xlu1 %1391  ;;  %v1390_v28 = vpop.permute.xlu0 %1389  ;;  %1498 = vmatprep.mubr.bf16.mxu1 %v7648_v0 }
  0xf9   :  { %v1399_v29 = vsel %vm1393_vm8, %v1388_v22, %v1390_v28  ;;  %7258 = vmatprep.subr.bf16.mxu1 %v7664_v31  ;;  %v1400_v32 = vsel %vm1393_vm8, %v1390_v28, %v1392_v27  ;;  %vm4476_vm8 = vcmask 441344  }
  0xfa   :  { %2915 = vrot.lane.b32.xlu1 %v7753_v8, %s7675_s9  ;;  %2921 = vrot.lane.b32.xlu0 %v7743_v4, %s7674_s2  ;;  %v1423_v35 = vsel %vm123_vm1, %v1400_v32, 0 }
  0xfb   :  { %6873 = vmatmul.mubr.msk.bf16.vlgmr.msra.gmra.mxu0 %vm119_vm2, %v1376_v19  ;;  %6876 = vmatprep.subr.msk.bf16.mxu0 %vm123_vm1, %v1399_v29 }
  0xfc   :  { %1522 = vmatpush1.bf16.msra.mxu0 %v1417_v30  ;;  %v1600_v33 = vpop.permute.xlu1 %1599  ;;  %v1598_v34 = vpop.permute.xlu0 %1597  ;;  %1539 = vmatprep.mubr.bf16.mxu0 %v7648_v0 }
  0xfd   :  { %v1614_v36 = vsel %vm1613_vm9, %v1598_v34, %v1600_v33 }
  0xfe   :  { %2925 = vrot.lane.b32.xlu1 %v7758_v9, %s7674_s2  ;;  %2923 = vrot.lane.b32.xlu0 %v7760_v10, %s7674_s2  ;;  %v1625_v40 = vsel %vm123_vm1, %v1614_v36, 0 }
  0xff   :  { %6875 = vmatmul.mubr.msk.bf16.vlgmr.msra.gmra.mxu1 %vm119_vm2, %v1376_v19 }
 0x100   :  { %7259 = vmatpush3.bf16.msra.mxu1 %v1423_v35  ;;  %v1596_v37 = vpop.permute.xlu1 %1595  ;;  %v1602_v38 = vpop.permute.xlu0 %1601  ;;  %7260 = vmatprep.mubr.msk.bf16.mxu1 %vm7665_vm3, %v7664_v31 }
 0x101   :  { %v1615_v39 = vsel %vm1613_vm9, %v1600_v33, %v1602_v38 }
 0x102   :  { %2929 = vrot.lane.b32.xlu1 %v7764_v12, %s7674_s2  ;;  %2927 = vrot.lane.b32.xlu0 %v7766_v13, %s7674_s2 }
 0x103   :  { %6877 = vmatmul.mubr.msk.bf16.vlgmr.msra.gmra.mxu0 %vm119_vm2, %v1376_v19  ;;  %6879 = vmatprep.subr.msk.bf16.mxu0 %vm123_vm1, %v1615_v39 }
 0x104   :  { %1660 = vmatpush1.bf16.msra.mxu0 %v1625_v40  ;;  %v1606_v41 = vpop.permute.xlu1 %1605  ;;  %v1604_v42 = vpop.permute.xlu0 %1603  ;;  %1677 = vmatprep.mubr.bf16.mxu0 %v7648_v0 }
 0x105   :  { %v1616_v43 = vsel %vm1613_vm9, %v1602_v38, %v1604_v42  ;;  %v1617_v44 = vsel %vm1613_vm9, %v1604_v42, %v1606_v41 }
 0x106   :  { %3137 = vrot.lane.b32.xlu1 %v7745_v5, %s7676_s3  ;;  %2931 = vrot.lane.b32.xlu0 %v7770_v14, %s7674_s2  ;;  %v1631_v45 = vsel %vm123_vm1, %v1616_v43, 0 }
 0x107   :  { %7261 = vmatmul.mubr.msk.bf16.vlgmr.msra.gmra.mxu1 %vm119_vm2, %v1376_v19  ;;  %6881 = vmatprep.subr.msk.bf16.mxu1 %vm123_vm1, %v1617_v44 }
 0x108   :  { %1701 = vmatpush1.bf16.msra.mxu1 %v1631_v45  ;;  %v1610_v46 = vpop.permute.xlu1 %1609  ;;  %v1608_v47 = vpop.permute.xlu0 %1607  ;;  %1718 = vmatprep.mubr.bf16.mxu1 %v7648_v0 }
 0x109   :  { %v1618_v48 = vsel %vm1613_vm9, %v1606_v41, %v1608_v47  ;;  %v1619_v49 = vsel %vm1613_vm9, %v1608_v47, %v1610_v46  ;;  %7264 = vmatprep.subr.bf16.mxu1 %v7664_v31 }
 0x10a   :  { %3141 = vrot.lane.b32.xlu1 %v7743_v4, %s7676_s3  ;;  %3139 = vrot.lane.b32.xlu0 %v7748_v7, %s7676_s3  ;;  %v1637_v50 = vsel %vm123_vm1, %v1618_v48, 0 }
 0x10b   :  { %6880 = vmatmul.mubr.msk.bf16.vlgmr.msra.gmra.mxu0 %vm119_vm2, %v1596_v37  ;;  %6883 = vmatprep.subr.msk.bf16.mxu0 %vm123_vm1, %v1619_v49 }
 0x10c   :  { %1742 = vmatpush1.bf16.msra.mxu0 %v1637_v50  ;;  %v1818_v51 = vpop.permute.xlu1 %1817  ;;  %v1612_v52 = vpop.permute.xlu0 %1611  ;;  %1759 = vmatprep.mubr.bf16.mxu0 %v7648_v0 }
 0x10d   :  { %v1620_v53 = vsel %vm1613_vm9, %v1610_v46, %v1612_v52  ;;  %vm4696_vm9 = vcmask 375808  }
 0x10e   :  { %v1643_v54 = vsel %vm123_vm1, %v1620_v53, 0  ;;  %3143 = vrot.lane.b32.xlu1 %v7760_v10, %s7676_s3  ;;  %3135 = vrot.lane.b32.xlu0 %v7753_v8, %s7676_s3 }
 0x10f   :  { %6882 = vmatmul.mubr.msk.bf16.vlgmr.msra.gmra.mxu1 %vm119_vm2, %v1596_v37 }
 0x110   :  { %7265 = vmatpush3.bf16.msra.mxu1 %v1643_v54  ;;  %v1822_v55 = vpop.permute.xlu1 %1821  ;;  %v1820_v56 = vpop.permute.xlu0 %1819  ;;  %7266 = vmatprep.mubr.msk.bf16.mxu1 %vm7665_vm3, %v7664_v31 }
 0x111   :  { %v1834_v57 = vsel %vm1833_vm10, %v1818_v51, %v1820_v56  ;;  %v1835_v58 = vsel %vm1833_vm10, %v1820_v56, %v1822_v55 }
 0x112   :  { %3147 = vrot.lane.b32.xlu1 %v7766_v13, %s7676_s3  ;;  %3145 = vrot.lane.b32.xlu0 %v7758_v9, %s7676_s3  ;;  %v1845_v59 = vsel %vm123_vm1, %v1834_v57, 0 }
 0x113   :  { %6884 = vmatmul.mubr.msk.bf16.vlgmr.msra.gmra.mxu0 %vm119_vm2, %v1596_v37  ;;  %6886 = vmatprep.subr.msk.bf16.mxu0 %vm123_vm1, %v1835_v58 }
 0x114   :  { %1880 = vmatpush1.bf16.msra.mxu0 %v1845_v59  ;;  %v1824_v60 = vpop.permute.xlu1 %1823  ;;  %v1816_v61 = vpop.permute.xlu0 %1815  ;;  %1897 = vmatprep.mubr.bf16.mxu0 %v7648_v0 }
 0x115   :  { %v1836_v62 = vsel %vm1833_vm10, %v1822_v55, %v1824_v60 }
 0x116   :  { %3151 = vrot.lane.b32.xlu1 %v7770_v14, %s7676_s3  ;;  %3149 = vrot.lane.b32.xlu0 %v7764_v12, %s7676_s3  ;;  %v1851_v3 = vsel %vm123_vm1, %v1836_v62, 0 }
 0x117   :  { %7267 = vmatmul.mubr.msk.bf16.vlgmr.msra.gmra.mxu1 %vm119_vm2, %v1596_v37 }
 0x118   :  { %v1828_v63 = vpop.permute.xlu1 %1827  ;;  %v1826_v1 = vpop.permute.xlu0 %1825  ;;  %1938 = vmatprep.mubr.bf16.mxu1 %v7648_v0 }
 0x119   :  { %v1837_v2 = vsel %vm1833_vm10, %v1824_v60, %v1826_v1  ;;  %v1838_v6 = vsel %vm1833_vm10, %v1826_v1, %v1828_v63 }
 0x11a   :  { %3359 = vrot.lane.b32.xlu1 %v7748_v7, %s7677_s11  ;;  %3357 = vrot.lane.b32.xlu0 %v7745_v5, %s7677_s11  ;;  %v1857_v19 = vsel %vm123_vm1, %v1838_v6, 0 }
 0x11b   :  { %6887 = vmatmul.mubr.msk.bf16.vlgmr.msra.gmra.mxu0 %vm119_vm2, %v1816_v61  ;;  %6888 = vmatprep.subr.msk.bf16.mxu1 %vm123_vm1, %v1837_v2 }
 0x11c   :  { %1921 = vmatpush1.bf16.msra.mxu1 %v1851_v3  ;;  %v1832_v11 = vpop.permute.xlu1 %1831  ;;  %v1830_v15 = vpop.permute.xlu0 %1829  ;;  %1979 = vmatprep.mubr.bf16.mxu0 %v7648_v0 }
 0x11d   :  { %v1840_v16 = vsel %vm1833_vm10, %v1830_v15, %v1832_v11  ;;  %v1839_v17 = vsel %vm1833_vm10, %v1828_v63, %v1830_v15  ;;  %7270 = vmatprep.subr.bf16.mxu1 %v7664_v31  ;;  %vm4916_vm10 = vcmask 367616  }
 0x11e   :  { %3355 = vrot.lane.b32.xlu1 %v7753_v8, %s7677_s11  ;;  %3361 = vrot.lane.b32.xlu0 %v7743_v4, %s7677_s11  ;;  %v1863_v18 = vsel %vm123_vm1, %v1840_v16, 0 }
 0x11f   :  { %6889 = vmatmul.mubr.msk.bf16.vlgmr.msra.gmra.mxu1 %vm119_vm2, %v1816_v61  ;;  %6890 = vmatprep.subr.msk.bf16.mxu0 %vm123_vm1, %v1839_v17 }
 0x120   :  { %1962 = vmatpush1.bf16.msra.mxu0 %v1857_v19  ;;  %7271 = vmatpush3.bf16.msra.mxu1 %v1863_v18  ;;  %v2040_v20 = vpop.permute.xlu1 %2039  ;;  %v2038_v21 = vpop.permute.xlu0 %2037 }
 0x121   :  { %7272 = vmatprep.mubr.msk.bf16.mxu1 %vm7665_vm3, %v7664_v31  ;;  %v2054_v8 = vsel %vm2053_vm11, %v2038_v21, %v2040_v20 }
 0x122   :  { %3365 = vrot.lane.b32.xlu1 %v7758_v9, %s7677_s11  ;;  %3363 = vrot.lane.b32.xlu0 %v7760_v10, %s7677_s11  ;;  %v2065_v25 = vsel %vm123_vm1, %v2054_v8, 0 }
 0x123   :  { %6891 = vmatmul.mubr.msk.bf16.vlgmr.msra.gmra.mxu0 %vm119_vm2, %v1816_v61 }
 0x124   :  { %v2036_v22 = vpop.permute.xlu1 %2035  ;;  %v2042_v23 = vpop.permute.xlu0 %2041  ;;  %2117 = vmatprep.mubr.bf16.mxu0 %v7648_v0 }
 0x125   :  { %v2055_v24 = vsel %vm2053_vm11, %v2040_v20, %v2042_v23 }
 0x126   :  { %3369 = vrot.lane.b32.xlu1 %v7764_v12, %s7677_s11  ;;  %3367 = vrot.lane.b32.xlu0 %v7766_v13, %s7677_s11 }
 0x127   :  { %7273 = vmatmul.mubr.msk.bf16.vlgmr.msra.gmra.mxu1 %vm119_vm2, %v1816_v61  ;;  %6893 = vmatprep.subr.msk.bf16.mxu0 %vm123_vm1, %v2055_v24 }
 0x128   :  { %2100 = vmatpush1.bf16.msra.mxu0 %v2065_v25  ;;  %v2046_v26 = vpop.permute.xlu1 %2045  ;;  %v2044_v27 = vpop.permute.xlu0 %2043  ;;  %2158 = vmatprep.mubr.bf16.mxu1 %v7648_v0 }
 0x129   :  { %v2056_v28 = vsel %vm2053_vm11, %v2042_v23, %v2044_v27  ;;  %v2057_v29 = vsel %vm2053_vm11, %v2044_v27, %v2046_v26 }
 0x12a   :  { %3577 = vrot.lane.b32.xlu1 %v7745_v5, %s7678_s13  ;;  %3371 = vrot.lane.b32.xlu0 %v7770_v14, %s7677_s11  ;;  %v2071_v30 = vsel %vm123_vm1, %v2056_v28, 0 }
 0x12b   :  { %6894 = vmatmul.mubr.msk.bf16.vlgmr.msra.gmra.mxu0 %vm119_vm2, %v2036_v22  ;;  %6895 = vmatprep.subr.msk.bf16.mxu1 %vm123_vm1, %v2057_v29 }
 0x12c   :  { %2141 = vmatpush1.bf16.msra.mxu1 %v2071_v30  ;;  %v2050_v32 = vpop.permute.xlu1 %2049  ;;  %v2048_v33 = vpop.permute.xlu0 %2047  ;;  %2199 = vmatprep.mubr.bf16.mxu0 %v7648_v0 }
 0x12d   :  { %v2058_v34 = vsel %vm2053_vm11, %v2046_v26, %v2048_v33  ;;  %v2059_v35 = vsel %vm2053_vm11, %v2048_v33, %v2050_v32  ;;  %7276 = vmatprep.subr.bf16.mxu1 %v7664_v31  ;;  %v8346_v33 = vld [vmem:[#allocation2 + $0x20] ss:$0 sps:$4 sm:$0xff]  }
 0x12e   :  { %3581 = vrot.lane.b32.xlu1 %v7743_v4, %s7678_s13  ;;  %3579 = vrot.lane.b32.xlu0 %v7748_v7, %s7678_s13  ;;  %v2077_v36 = vsel %vm123_vm1, %v2058_v34, 0 }
 0x12f   :  { %6896 = vmatmul.mubr.msk.bf16.vlgmr.msra.gmra.mxu1 %vm119_vm2, %v2036_v22  ;;  %6897 = vmatprep.subr.msk.bf16.mxu0 %vm123_vm1, %v2059_v35 }
 0x130   :  { %2182 = vmatpush1.bf16.msra.mxu0 %v2077_v36  ;;  %v2258_v37 = vpop.permute.xlu1 %2257  ;;  %v2052_v38 = vpop.permute.xlu0 %2051  ;;  %7278 = vmatprep.mubr.msk.bf16.mxu1 %vm7665_vm3, %v7664_v31 }
 0x131   :  { %v2060_v39 = vsel %vm2053_vm11, %v2050_v32, %v2052_v38  ;;  %vm5136_vm11 = vcmask 359424  }
 0x132   :  { %v2083_v40 = vsel %vm123_vm1, %v2060_v39, 0  ;;  %3585 = vrot.lane.b32.xlu1 %v7758_v9, %s7678_s13  ;;  %3583 = vrot.lane.b32.xlu0 %v7760_v10, %s7678_s13 }
 0x133   :  { %6898 = vmatmul.mubr.msk.bf16.vlgmr.msra.gmra.mxu0 %vm119_vm2, %v2036_v22  ;;  %7277 = vmatpush3.bf16.msra.mxu1 %v2083_v40 }
 0x134   :  { %v2262_v41 = vpop.permute.xlu1 %2261  ;;  %v2260_v42 = vpop.permute.xlu0 %2259  ;;  %2337 = vmatprep.mubr.bf16.mxu0 %v7648_v0 }
 0x135   :  { %v2274_v43 = vsel %vm2273_vm12, %v2258_v37, %v2260_v42  ;;  %v2275_v44 = vsel %vm2273_vm12, %v2260_v42, %v2262_v41 }
 0x136   :  { %3589 = vrot.lane.b32.xlu1 %v7764_v12, %s7678_s13  ;;  %3587 = vrot.lane.b32.xlu0 %v7766_v13, %s7678_s13  ;;  %v2285_v45 = vsel %vm123_vm1, %v2274_v43, 0 }
 0x137   :  { %7279 = vmatmul.mubr.msk.bf16.vlgmr.msra.gmra.mxu1 %vm119_vm2, %v2036_v22  ;;  %6900 = vmatprep.subr.msk.bf16.mxu0 %vm123_vm1, %v2275_v44 }
 0x138   :  { %2320 = vmatpush1.bf16.msra.mxu0 %v2285_v45  ;;  %v2264_v46 = vpop.permute.xlu1 %2263  ;;  %v2256_v47 = vpop.permute.xlu0 %2255  ;;  %2378 = vmatprep.mubr.bf16.mxu1 %v7648_v0 }
 0x139   :  { %v2276_v48 = vsel %vm2273_vm12, %v2262_v41, %v2264_v46 }
 0x13a   :  { %3797 = vrot.lane.b32.xlu1 %v7745_v5, %s7679_s15  ;;  %3591 = vrot.lane.b32.xlu0 %v7770_v14, %s7678_s13  ;;  %v7534_v5 = vld [vmem:[%s9256_s0] sm:$0xff]  ;;  %v2291_v53 = vsel %vm123_vm1, %v2276_v48, 0  ;;  %s7680_s0 = smov 55  }
 0x13b   :  { %6901 = vmatmul.mubr.msk.bf16.vlgmr.msra.gmra.mxu0 %vm119_vm2, %v2256_v47  ;;  %v8275_v52 = vcombine.high %v7534_v5, %v7534_v5 }
 0x13c   :  { %v2268_v49 = vpop.permute.xlu1 %2267  ;;  %v2266_v50 = vpop.permute.xlu0 %2265  ;;  %2419 = vmatprep.mubr.bf16.mxu0 %v7648_v0 }
 0x13d   :  { %v2277_v51 = vsel %vm2273_vm12, %v2264_v46, %v2266_v50  ;;  %v2278_v54 = vsel %vm2273_vm12, %v2266_v50, %v2268_v49 }
 0x13e   :  { %3801 = vrot.lane.b32.xlu1 %v7743_v4, %s7679_s15  ;;  %3799 = vrot.lane.b32.xlu0 %v7748_v7, %s7679_s15  ;;  %v2297_v60 = vsel %vm123_vm1, %v2278_v54, 0 }
 0x13f   :  { %6902 = vmatprep.subr.msk.bf16.mxu1 %vm123_vm1, %v2277_v51 }
 0x140   :  { %2361 = vmatpush1.bf16.msra.mxu1 %v2291_v53  ;;  %v2272_v55 = vpop.permute.xlu1 %2271  ;;  %v2270_v56 = vpop.permute.xlu0 %2269 }
 0x141   :  { %v2280_v57 = vsel %vm2273_vm12, %v2270_v56, %v2272_v55  ;;  %v2279_v58 = vsel %vm2273_vm12, %v2268_v49, %v2270_v56  ;;  %7282 = vmatprep.subr.bf16.mxu1 %v7664_v31  ;;  %vm5356_vm12 = vcmask 293888  }
 0x142   :  { %3803 = vrot.lane.b32.xlu1 %v7760_v10, %s7679_s15  ;;  %3795 = vrot.lane.b32.xlu0 %v8275_v52, %s7650_s10  ;;  %v2303_v59 = vsel %vm123_vm1, %v2280_v57, 0  ;;  %s7681_s10 = smov 54  }
 0x143   :  { %6903 = vmatmul.mubr.msk.bf16.vlgmr.msra.gmra.mxu1 %vm119_vm2, %v2256_v47  ;;  %6904 = vmatprep.subr.msk.bf16.mxu0 %vm123_vm1, %v2279_v58 }
 0x144   :  { %2402 = vmatpush1.bf16.msra.mxu0 %v2297_v60  ;;  %7283 = vmatpush3.bf16.msra.mxu1 %v2303_v59  ;;  %v2480_v61 = vpop.permute.xlu1 %2479  ;;  %v2478_v62 = vpop.permute.xlu0 %2477 }
 0x145   :  { %7284 = vmatprep.mubr.msk.bf16.mxu1 %vm7665_vm3, %v7664_v31  ;;  %v2494_v63 = vsel %vm2493_vm13, %v2478_v62, %v2480_v61 }
 0x146   :  { %3807 = vrot.lane.b32.xlu1 %v7766_v13, %s7679_s15  ;;  %3805 = vrot.lane.b32.xlu0 %v7758_v9, %s7679_s15  ;;  %v2505_v6 = vsel %vm123_vm1, %v2494_v63, 0 }
 0x147   :  { %6905 = vmatmul.mubr.msk.bf16.vlgmr.msra.gmra.mxu0 %vm119_vm2, %v2256_v47 }
 0x148   :  { %v2476_v1 = vpop.permute.xlu1 %2475  ;;  %v2482_v2 = vpop.permute.xlu0 %2481  ;;  %2557 = vmatprep.mubr.bf16.mxu0 %v7648_v0 }
 0x149   :  { %v2495_v3 = vsel %vm2493_vm13, %v2480_v61, %v2482_v2 }
 0x14a   :  { %3811 = vrot.lane.b32.xlu1 %v7770_v14, %s7679_s15  ;;  %3809 = vrot.lane.b32.xlu0 %v7764_v12, %s7679_s15 }
 0x14b   :  { %7285 = vmatmul.mubr.msk.bf16.vlgmr.msra.gmra.mxu1 %vm119_vm2, %v2256_v47  ;;  %6907 = vmatprep.subr.msk.bf16.mxu0 %vm123_vm1, %v2495_v3 }
 0x14c   :  { %2540 = vmatpush1.bf16.msra.mxu0 %v2505_v6  ;;  %v2486_v11 = vpop.permute.xlu1 %2485  ;;  %v2484_v15 = vpop.permute.xlu0 %2483  ;;  %2598 = vmatprep.mubr.bf16.mxu1 %v7648_v0 }
 0x14d   :  { %v2496_v16 = vsel %vm2493_vm13, %v2482_v2, %v2484_v15  ;;  %v2497_v17 = vsel %vm2493_vm13, %v2484_v15, %v2486_v11 }
 0x14e   :  { %4022 = vrot.lane.b32.xlu1 %v7743_v4, %s7667_s25  ;;  %4020 = vrot.lane.b32.xlu0 %v7748_v7, %s7667_s25  ;;  %v2511_v18 = vsel %vm123_vm1, %v2496_v16, 0 }
 0x14f   :  { %6908 = vmatmul.mubr.msk.bf16.vlgmr.msra.gmra.mxu0 %vm119_vm2, %v2476_v1  ;;  %6909 = vmatprep.subr.msk.bf16.mxu1 %vm123_vm1, %v2497_v17 }
 0x150   :  { %2581 = vmatpush1.bf16.msra.mxu1 %v2511_v18  ;;  %v2490_v19 = vpop.permute.xlu1 %2489  ;;  %v2488_v20 = vpop.permute.xlu0 %2487  ;;  %2639 = vmatprep.mubr.bf16.mxu0 %v7648_v0 }
 0x151   :  { %v2498_v21 = vsel %vm2493_vm13, %v2486_v11, %v2488_v20  ;;  %v2499_v8 = vsel %vm2493_vm13, %v2488_v20, %v2490_v19  ;;  %7288 = vmatprep.subr.bf16.mxu1 %v7664_v31 }
 0x152   :  { %4015 = vrot.lane.b32.xlu1 %v8275_v52, %s7652_s12  ;;  %4024 = vrot.lane.b32.xlu0 %v7760_v10, %s7667_s25  ;;  %v2517_v22 = vsel %vm123_vm1, %v2498_v21, 0  ;;  %s7682_s12 = smov 46  }
 0x153   :  { %6910 = vmatmul.mubr.msk.bf16.vlgmr.msra.gmra.mxu1 %vm119_vm2, %v2476_v1  ;;  %6911 = vmatprep.subr.msk.bf16.mxu0 %vm123_vm1, %v2499_v8 }
 0x154   :  { %2622 = vmatpush1.bf16.msra.mxu0 %v2517_v22  ;;  %v2698_v23 = vpop.permute.xlu1 %2697  ;;  %v2492_v24 = vpop.permute.xlu0 %2491  ;;  %7290 = vmatprep.mubr.msk.bf16.mxu1 %vm7665_vm3, %v7664_v31 }
 0x155   :  { %v2500_v25 = vsel %vm2493_vm13, %v2490_v19, %v2492_v24  ;;  %vm5576_vm13 = vcmask 285696  }
 0x156   :  { %v2523_v26 = vsel %vm123_vm1, %v2500_v25, 0  ;;  %4028 = vrot.lane.b32.xlu1 %v7766_v13, %s7667_s25  ;;  %4026 = vrot.lane.b32.xlu0 %v7758_v9, %s7667_s25 }
 0x157   :  { %6912 = vmatmul.mubr.msk.bf16.vlgmr.msra.gmra.mxu0 %vm119_vm2, %v2476_v1  ;;  %7289 = vmatpush3.bf16.msra.mxu1 %v2523_v26 }
 0x158   :  { %v2702_v27 = vpop.permute.xlu1 %2701  ;;  %v2700_v28 = vpop.permute.xlu0 %2699  ;;  %2777 = vmatprep.mubr.bf16.mxu0 %v7648_v0 }
 0x159   :  { %v2714_v29 = vsel %vm2713_vm14, %v2698_v23, %v2700_v28  ;;  %v2715_v30 = vsel %vm2713_vm14, %v2700_v28, %v2702_v27 }
 0x15a   :  { %4032 = vrot.lane.b32.xlu1 %v7770_v14, %s7667_s25  ;;  %4030 = vrot.lane.b32.xlu0 %v7764_v12, %s7667_s25  ;;  %v2725_v32 = vsel %vm123_vm1, %v2714_v29, 0 }
 0x15b   :  { %v179_v34 = vpop.f32.mrf.mxu0  ;;  %7291 = vmatmul.mubr.msk.bf16.vlgmr.msra.gmra.mxu1 %vm119_vm2, %v2476_v1  ;;  %6914 = vmatprep.subr.msk.bf16.mxu0 %vm123_vm1, %v2715_v30 }
 0x15c   :  { %2760 = vmatpush1.bf16.msra.mxu0 %v2725_v32  ;;  %v2704_v35 = vpop.permute.xlu1 %2703  ;;  %v8350_v36 = vpop.permute.xlu0 %2695  ;;  %2818 = vmatprep.mubr.bf16.mxu1 %v7648_v0 }
 0x15d   :  { %v181_v37 = vpop.f32.mrf.mxu0  ;;  %v2716_v40 = vsel %vm2713_vm14, %v2702_v27, %v2704_v35 }
 0x15e   :  { %4240 = vrot.lane.b32.xlu1 %v7748_v7, %s7680_s0  ;;  %4034 = vrot.lane.b32.xlu0 %v8346_v33, %s7667_s25  ;;  %v2731_v48 = vsel %vm123_vm1, %v2716_v40, 0 }
 0x15f   :  { %v183_v38 = vpop.f32.mrf.mxu0  ;;  %v220_v39 = vpop.f32.mrf.mxu1  ;;  %6915 = vmatmul.mubr.msk.bf16.vlgmr.msra.gmra.mxu0 %vm119_vm2, %v8350_v36 }
 0x160   :  { %v2708_v41 = vpop.permute.xlu1 %2707  ;;  %v2706_v42 = vpop.permute.xlu0 %2705  ;;  %2859 = vmatprep.mubr.bf16.mxu0 %v7648_v0 }
 0x161   :  { %v184_v43 = vpop.f32.mrf.mxu0  ;;  %v8361_v44 = vpop.f32.mrf.mxu1  ;;  %v2717_v45 = vsel %vm2713_vm14, %v2704_v35, %v2706_v42  ;;  %v2718_v49 = vsel %vm2713_vm14, %v2706_v42, %v2708_v41 }
 0x162   :  { %4244 = vrot.lane.b32.xlu1 %v7760_v10, %s7680_s0  ;;  %4242 = vrot.lane.b32.xlu0 %v7743_v4, %s7680_s0  ;;  %v2737_v59 = vsel %vm123_vm1, %v2718_v49, 0 }
 0x163   :  { %v224_v46 = vpop.f32.mrf.mxu1  ;;  %v8368_v47 = vpop.f32.mrf.mxu0  ;;  %6916 = vmatprep.subr.msk.bf16.mxu1 %vm123_vm1, %v2717_v45 }
 0x164   :  { %2801 = vmatpush1.bf16.msra.mxu1 %v2731_v48  ;;  %v2712_v50 = vpop.permute.xlu1 %2711  ;;  %v2710_v51 = vpop.permute.xlu0 %2709 }
 0x165   :  { %v225_v5 = vpop.f32.mrf.mxu1  ;;  %v8373_v53 = vpop.f32.mrf.mxu0  ;;  %v2720_v54 = vsel %vm2713_vm14, %v2710_v51, %v2712_v50  ;;  %v2719_v55 = vsel %vm2713_vm14, %v2708_v41, %v2710_v51  ;;  %7294 = vmatprep.subr.bf16.mxu1 %v7664_v31  ;;  %vm5796_vm14 = vcmask 277504  }
 0x166   :  { %4246 = vrot.lane.b32.xlu1 %v7758_v9, %s7680_s0  ;;  %4238 = vrot.lane.b32.xlu0 %v8275_v52, %s7654_s14  ;;  %v2743_v56 = vsel %vm123_vm1, %v2720_v54, 0  ;;  %s7683_s14 = smov 45  }
 0x167   :  { %v265_v57 = vpop.f32.mrf.mxu0  ;;  %v8383_v58 = vpop.f32.mrf.mxu1  ;;  %6917 = vmatmul.mubr.msk.bf16.vlgmr.msra.gmra.mxu1 %vm119_vm2, %v8350_v36  ;;  %6918 = vmatprep.subr.msk.bf16.mxu0 %vm123_vm1, %v2719_v55 }
 0x168   :  { %2842 = vmatpush1.bf16.msra.mxu0 %v2737_v59  ;;  %7295 = vmatpush3.bf16.msra.mxu1 %v2743_v56  ;;  %v2920_v60 = vpop.permute.xlu1 %2919  ;;  %v2918_v61 = vpop.permute.xlu0 %2917 }
 0x169   :  { %v266_v62 = vpop.f32.mrf.mxu0  ;;  %v7226_v63 = vpop.f32.mrf.mxu1  ;;  %7296 = vmatprep.mubr.msk.bf16.mxu1 %vm7665_vm3, %v7664_v31  ;;  %v2934_v3 = vsel %vm2933_vm15, %v2918_v61, %v2920_v60 }
 0x16a   :  { %4250 = vrot.lane.b32.xlu1 %v7764_v12, %s7680_s0  ;;  %4248 = vrot.lane.b32.xlu0 %v7766_v13, %s7680_s0  ;;  %v2945_v20 = vsel %vm123_vm1, %v2934_v3, 0 }
 0x16b   :  { %v305_v1 = vpop.f32.mrf.mxu1  ;;  %v366_v2 = vpop.f32.mrf.mxu0  ;;  %6919 = vmatmul.mubr.msk.bf16.vlgmr.msra.gmra.mxu0 %vm119_vm2, %v8350_v36 }
 0x16c   :  { %v8398_v6 = vadd.f32 %v366_v2, %v179_v34  ;;  %v8400_v11 = vpop.permute.xlu1 %2915  ;;  %v2922_v15 = vpop.permute.xlu0 %2921  ;;  %2997 = vmatprep.mubr.bf16.mxu0 %v7648_v0 }
 0x16d   :  { %v7227_v16 = vpop.f32.mrf.mxu1  ;;  %v368_v17 = vpop.f32.mrf.mxu0  ;;  %v2935_v18 = vsel %vm2933_vm15, %v2920_v60, %v2922_v15 }
 0x16e   :  { %v8404_v19 = vadd.f32 %v368_v17, %v181_v37  ;;  %4254 = vrot.lane.b32.xlu1 %v8346_v33, %s7680_s0  ;;  %4252 = vrot.lane.b32.xlu0 %v7770_v14, %s7680_s0 }
 0x16f   :  { %v407_v21 = vpop.f32.mrf.mxu1  ;;  %v370_v8 = vpop.f32.mrf.mxu0  ;;  %7297 = vmatmul.mubr.msk.bf16.vlgmr.msra.gmra.mxu1 %vm119_vm2, %v8350_v36  ;;  %6921 = vmatprep.subr.msk.bf16.mxu0 %vm123_vm1, %v2935_v18 }
 0x170   :  { %v8414_v22 = vadd.f32 %v407_v21, %v220_v39  ;;  %2980 = vmatpush1.bf16.msra.mxu0 %v2945_v20  ;;  %v2926_v23 = vpop.permute.xlu1 %2925  ;;  %v2924_v24 = vpop.permute.xlu0 %2923  ;;  %3038 = vmatprep.mubr.bf16.mxu1 %v7648_v0 }
 0x171   :  { %v409_v25 = vpop.f32.mrf.mxu1  ;;  %v2936_v26 = vsel %vm2933_vm15, %v2922_v15, %v2924_v24  ;;  %v371_v27 = vpop.f32.mrf.mxu0  ;;  %v2937_v28 = vsel %vm2933_vm15, %v2924_v24, %v2926_v23 }
 0x172   :  { %v8420_v29 = vadd.f32 %v409_v25, %v8361_v44  ;;  %4462 = vrot.lane.b32.xlu1 %v7743_v4, %s7681_s10  ;;  %4460 = vrot.lane.b32.xlu0 %v7748_v7, %s7681_s10  ;;  %v2951_v30 = vsel %vm123_vm1, %v2936_v26, 0 }
 0x173   :  { %v411_v32 = vpop.f32.mrf.mxu1  ;;  %v448_v34 = vpop.f32.mrf.mxu0  ;;  %6922 = vmatmul.mubr.msk.bf16.vlgmr.msra.gmra.mxu0 %vm119_vm2, %v8400_v11  ;;  %6923 = vmatprep.subr.msk.bf16.mxu1 %vm123_vm1, %v2937_v28 }
 0x174   :  { %v8431_v35 = vadd.f32 %v448_v34, %v8368_v47  ;;  %3021 = vmatpush1.bf16.msra.mxu1 %v2951_v30  ;;  %v2930_v36 = vpop.permute.xlu1 %2929  ;;  %v2928_v37 = vpop.permute.xlu0 %2927  ;;  %3079 = vmatprep.mubr.bf16.mxu0 %v7648_v0 }
 0x175   :  { %v412_v38 = vpop.f32.mrf.mxu1  ;;  %v2938_v39 = vsel %vm2933_vm15, %v2926_v23, %v2928_v37  ;;  %v450_v40 = vpop.f32.mrf.mxu0  ;;  %v2939_v41 = vsel %vm2933_vm15, %v2928_v37, %v2930_v36  ;;  %7300 = vmatprep.subr.bf16.mxu1 %v7664_v31 }
 0x176   :  { %v8438_v42 = vadd.f32 %v450_v40, %v8373_v53  ;;  %4458 = vrot.lane.b32.xlu1 %v8275_v52, %s7656_s16  ;;  %4464 = vrot.lane.b32.xlu0 %v7760_v10, %s7681_s10  ;;  %v2957_v43 = vsel %vm123_vm1, %v2938_v39, 0  ;;  %s7684_s16 = smov 44  }
 0x177   :  { %v489_v44 = vpop.f32.mrf.mxu1  ;;  %v452_v45 = vpop.f32.mrf.mxu0  ;;  %6924 = vmatmul.mubr.msk.bf16.vlgmr.msra.gmra.mxu1 %vm119_vm2, %v8400_v11  ;;  %6925 = vmatprep.subr.msk.bf16.mxu0 %vm123_vm1, %v2939_v41 }
 0x178   :  { %v8449_v46 = vadd.f32 %v489_v44, %v8383_v58  ;;  %3062 = vmatpush1.bf16.msra.mxu0 %v2957_v43  ;;  %v3138_v47 = vpop.permute.xlu1 %3137  ;;  %v2932_v48 = vpop.permute.xlu0 %2931  ;;  %7302 = vmatprep.mubr.msk.bf16.mxu1 %vm7665_vm3, %v7664_v31 }
 0x179   :  { %v7232_v49 = vpop.f32.mrf.mxu1  ;;  %v2940_v50 = vsel %vm2933_vm15, %v2930_v36, %v2932_v48  ;;  %v453_v51 = vpop.f32.mrf.mxu0 }
 0x17a   :  { %v2963_v5 = vsel %vm123_vm1, %v2940_v50, 0  ;;  %4468 = vrot.lane.b32.xlu1 %v7766_v13, %s7681_s10  ;;  %4466 = vrot.lane.b32.xlu0 %v7758_v9, %s7681_s10 }
 0x17b   :  { %v492_v53 = vpop.f32.mrf.mxu1  ;;  %v579_v54 = vpop.f32.mrf.mxu0  ;;  %6926 = vmatmul.mubr.msk.bf16.vlgmr.msra.gmra.mxu0 %vm119_vm2, %v8400_v11  ;;  %7301 = vmatpush3.bf16.msra.mxu1 %v2963_v5 }
 0x17c   :  { %v8462_v55 = vadd.f32 %v579_v54, %v8398_v6  ;;  %v3142_v56 = vpop.permute.xlu1 %3141  ;;  %v3140_v57 = vpop.permute.xlu0 %3139  ;;  %3217 = vmatprep.mubr.bf16.mxu0 %v7648_v0 }
 0x17d   :  { %v7233_v58 = vpop.f32.mrf.mxu1  ;;  %v3154_v59 = vsel %vm3153_vm0, %v3138_v47, %v3140_v57  ;;  %v581_v60 = vpop.f32.mrf.mxu0  ;;  %v3155_v61 = vsel %vm3153_vm0, %v3140_v57, %v3142_v56 }
 0x17e   :  { %v8468_v62 = vadd.f32 %v581_v60, %v8404_v19  ;;  %4472 = vrot.lane.b32.xlu1 %v7770_v14, %s7681_s10  ;;  %4470 = vrot.lane.b32.xlu0 %v7764_v12, %s7681_s10  ;;  %v3165_v63 = vsel %vm123_vm1, %v3154_v59, 0 }
 0x17f   :  { %v620_v1 = vpop.f32.mrf.mxu1  ;;  %v583_v2 = vpop.f32.mrf.mxu0  ;;  %7303 = vmatmul.mubr.msk.bf16.vlgmr.msra.gmra.mxu1 %vm119_vm2, %v8400_v11  ;;  %6928 = vmatprep.subr.msk.bf16.mxu0 %vm123_vm1, %v3155_v61 }
 0x180   :  { %v8479_v3 = vadd.f32 %v620_v1, %v8414_v22  ;;  %3200 = vmatpush1.bf16.msra.mxu0 %v3165_v63  ;;  %v3144_v6 = vpop.permute.xlu1 %3143  ;;  %v8481_v15 = vpop.permute.xlu0 %3135  ;;  %3258 = vmatprep.mubr.bf16.mxu1 %v7648_v0 }
 0x181   :  { %v622_v16 = vpop.f32.mrf.mxu1  ;;  %v584_v17 = vpop.f32.mrf.mxu0  ;;  %v3156_v20 = vsel %vm3153_vm0, %v3142_v56, %v3144_v6 }
 0x182   :  { %v8485_v18 = vadd.f32 %v622_v16, %v8420_v29  ;;  %4680 = vrot.lane.b32.xlu1 %v7748_v7, %s7682_s12  ;;  %4474 = vrot.lane.b32.xlu0 %v8346_v33, %s7681_s10  ;;  %v3171_v29 = vsel %vm123_vm1, %v3156_v20, 0 }
 0x183   :  { %v624_v11 = vpop.f32.mrf.mxu1  ;;  %v661_v19 = vpop.f32.mrf.mxu0  ;;  %6929 = vmatmul.mubr.msk.bf16.vlgmr.msra.gmra.mxu0 %vm119_vm2, %v8481_v15 }
 0x184   :  { %v712_v21 = vadd.f32 %v661_v19, %v8431_v35  ;;  %v3148_v8 = vpop.permute.xlu1 %3147  ;;  %v3146_v22 = vpop.permute.xlu0 %3145  ;;  %3299 = vmatprep.mubr.bf16.mxu0 %v7648_v0 }
 0x185   :  { %v625_v23 = vpop.f32.mrf.mxu1  ;;  %v663_v24 = vpop.f32.mrf.mxu0  ;;  %v3157_v25 = vsel %vm3153_vm0, %v3144_v6, %v3146_v22  ;;  %v3158_v30 = vsel %vm3153_vm0, %v3146_v22, %v3148_v8 }
 0x186   :  { %v8498_v26 = vadd.f32 %v663_v24, %v8438_v42  ;;  %4684 = vrot.lane.b32.xlu1 %v7760_v10, %s7682_s12  ;;  %4682 = vrot.lane.b32.xlu0 %v7743_v4, %s7682_s12  ;;  %v3177_v43 = vsel %vm123_vm1, %v3158_v30, 0 }
 0x187   :  { %v702_v27 = vpop.f32.mrf.mxu1  ;;  %v665_v28 = vpop.f32.mrf.mxu0  ;;  %6930 = vmatprep.subr.msk.bf16.mxu1 %vm123_vm1, %v3157_v25 }
 0x188   :  { %v8508_v32 = vadd.f32 %v702_v27, %v8449_v46  ;;  %3241 = vmatpush1.bf16.msra.mxu1 %v3171_v29  ;;  %v3152_v34 = vpop.permute.xlu1 %3151  ;;  %v3150_v35 = vpop.permute.xlu0 %3149 }
 0x189   :  { %v7238_v36 = vpop.f32.mrf.mxu1  ;;  %v3160_v37 = vsel %vm3153_vm0, %v3150_v35, %v3152_v34  ;;  %v666_v38 = vpop.f32.mrf.mxu0  ;;  %v3159_v39 = vsel %vm3153_vm0, %v3148_v8, %v3150_v35  ;;  %7306 = vmatprep.subr.bf16.mxu1 %v7664_v31 }
 0x18a   :  { %4686 = vrot.lane.b32.xlu1 %v7758_v9, %s7682_s12  ;;  %4678 = vrot.lane.b32.xlu0 %v8275_v52, %s7658_s18  ;;  %v3183_v40 = vsel %vm123_vm1, %v3160_v37, 0  ;;  %s7685_s18 = smov 36  }
 0x18b   :  { %v705_v41 = vpop.f32.mrf.mxu1  ;;  %v799_v42 = vpop.f32.mrf.mxu0  ;;  %6931 = vmatmul.mubr.msk.bf16.vlgmr.msra.gmra.mxu1 %vm119_vm2, %v8481_v15  ;;  %6932 = vmatprep.subr.msk.bf16.mxu0 %vm123_vm1, %v3159_v39 }
 0x18c   :  { %v8523_v44 = vadd.f32 %v799_v42, %v8462_v55  ;;  %3282 = vmatpush1.bf16.msra.mxu0 %v3177_v43  ;;  %7307 = vmatpush3.bf16.msra.mxu1 %v3183_v40  ;;  %v3360_v45 = vpop.permute.xlu1 %3359  ;;  %v3358_v46 = vpop.permute.xlu0 %3357 }
 0x18d   :  { %v7239_v47 = vpop.f32.mrf.mxu1  ;;  %v801_v48 = vpop.f32.mrf.mxu0  ;;  %7308 = vmatprep.mubr.msk.bf16.mxu1 %vm7665_vm3, %v7664_v31  ;;  %v3374_v5 = vsel %vm119_vm2, %v3358_v46, %v3360_v45 }
 0x18e   :  { %v8528_v49 = vadd.f32 %v801_v48, %v8468_v62  ;;  %4690 = vrot.lane.b32.xlu1 %v7764_v12, %s7682_s12  ;;  %4688 = vrot.lane.b32.xlu0 %v7766_v13, %s7682_s12  ;;  %v3385_v60 = vsel %vm123_vm1, %v3374_v5, 0 }
 0x18f   :  { %v840_v50 = vpop.f32.mrf.mxu1  ;;  %v803_v51 = vpop.f32.mrf.mxu0  ;;  %6933 = vmatmul.mubr.msk.bf16.vlgmr.msra.gmra.mxu0 %vm119_vm2, %v8481_v15 }
 0x190   :  { %v8538_v53 = vadd.f32 %v840_v50, %v8479_v3  ;;  %v8540_v54 = vpop.permute.xlu1 %3355  ;;  %v3362_v55 = vpop.permute.xlu0 %3361  ;;  %3437 = vmatprep.mubr.bf16.mxu0 %v7648_v0 }
 0x191   :  { %v842_v56 = vpop.f32.mrf.mxu1  ;;  %v804_v57 = vpop.f32.mrf.mxu0  ;;  %v3375_v58 = vsel %vm119_vm2, %v3360_v45, %v3362_v55 }
 0x192   :  { %v8545_v59 = vadd.f32 %v842_v56, %v8485_v18  ;;  %4694 = vrot.lane.b32.xlu1 %v8346_v33, %s7682_s12  ;;  %4692 = vrot.lane.b32.xlu0 %v7770_v14, %s7682_s12 }
 0x193   :  { %v844_v61 = vpop.f32.mrf.mxu1  ;;  %v881_v62 = vpop.f32.mrf.mxu0  ;;  %7309 = vmatmul.mubr.msk.bf16.vlgmr.msra.gmra.mxu1 %vm119_vm2, %v8481_v15  ;;  %6935 = vmatprep.subr.msk.bf16.mxu0 %vm123_vm1, %v3375_v58 }
 0x194   :  { %v8555_v63 = vadd.f32 %v881_v62, %v712_v21  ;;  %3420 = vmatpush1.bf16.msra.mxu0 %v3385_v60  ;;  %v3366_v1 = vpop.permute.xlu1 %3365  ;;  %v3364_v2 = vpop.permute.xlu0 %3363  ;;  %3478 = vmatprep.mubr.bf16.mxu1 %v7648_v0 }
 0x195   :  { %v845_v3 = vpop.f32.mrf.mxu1  ;;  %v3376_v6 = vsel %vm119_vm2, %v3362_v55, %v3364_v2  ;;  %v883_v16 = vpop.f32.mrf.mxu0  ;;  %v3377_v17 = vsel %vm119_vm2, %v3364_v2, %v3366_v1 }
 0x196   :  { %v8561_v18 = vadd.f32 %v883_v16, %v8498_v26  ;;  %4902 = vrot.lane.b32.xlu1 %v7743_v4, %s7683_s14  ;;  %4900 = vrot.lane.b32.xlu0 %v7748_v7, %s7683_s14  ;;  %v3391_v15 = vsel %vm123_vm1, %v3376_v6, 0 }
 0x197   :  { %v922_v11 = vpop.f32.mrf.mxu1  ;;  %v885_v19 = vpop.f32.mrf.mxu0  ;;  %6936 = vmatmul.mubr.msk.bf16.vlgmr.msra.gmra.mxu0 %vm119_vm2, %v8540_v54  ;;  %6937 = vmatprep.subr.msk.bf16.mxu1 %vm123_vm1, %v3377_v17 }
 0x198   :  { %v8572_v20 = vadd.f32 %v922_v11, %v8508_v32  ;;  %3461 = vmatpush1.bf16.msra.mxu1 %v3391_v15  ;;  %v3370_v21 = vpop.permute.xlu1 %3369  ;;  %v3368_v8 = vpop.permute.xlu0 %3367  ;;  %3519 = vmatprep.mubr.bf16.mxu0 %v7648_v0 }
 0x199   :  { %v7244_v22 = vpop.f32.mrf.mxu1  ;;  %v3378_v23 = vsel %vm119_vm2, %v3366_v1, %v3368_v8  ;;  %v886_v24 = vpop.f32.mrf.mxu0  ;;  %v3379_v25 = vsel %vm119_vm2, %v3368_v8, %v3370_v21  ;;  %7312 = vmatprep.subr.bf16.mxu1 %v7664_v31 }
 0x19a   :  { %4898 = vrot.lane.b32.xlu1 %v8275_v52, %s7660_s20  ;;  %4904 = vrot.lane.b32.xlu0 %v7760_v10, %s7683_s14  ;;  %v3397_v26 = vsel %vm123_vm1, %v3378_v23, 0  ;;  %s7687_s20 = smov 34  }
 0x19b   :  { %v925_v27 = vpop.f32.mrf.mxu1  ;;  %v1019_v28 = vpop.f32.mrf.mxu0  ;;  %6938 = vmatmul.mubr.msk.bf16.vlgmr.msra.gmra.mxu1 %vm119_vm2, %v8540_v54  ;;  %6939 = vmatprep.subr.msk.bf16.mxu0 %vm123_vm1, %v3379_v25 }
 0x19c   :  { %v8587_v29 = vadd.f32 %v1019_v28, %v8523_v44  ;;  %3502 = vmatpush1.bf16.msra.mxu0 %v3397_v26  ;;  %v3578_v30 = vpop.permute.xlu1 %3577  ;;  %v3372_v32 = vpop.permute.xlu0 %3371  ;;  %7314 = vmatprep.mubr.msk.bf16.mxu1 %vm7665_vm3, %v7664_v31 }
 0x19d   :  { %v7245_v34 = vpop.f32.mrf.mxu1  ;;  %v3380_v35 = vsel %vm119_vm2, %v3370_v21, %v3372_v32  ;;  %v1021_v36 = vpop.f32.mrf.mxu0 }
 0x19e   :  { %v3403_v37 = vsel %vm123_vm1, %v3380_v35, 0  ;;  %v8594_v38 = vadd.f32 %v1021_v36, %v8528_v49  ;;  %4908 = vrot.lane.b32.xlu1 %v7766_v13, %s7683_s14  ;;  %4906 = vrot.lane.b32.xlu0 %v7758_v9, %s7683_s14 }
 0x19f   :  { %v1060_v39 = vpop.f32.mrf.mxu1  ;;  %v1023_v40 = vpop.f32.mrf.mxu0  ;;  %6940 = vmatmul.mubr.msk.bf16.vlgmr.msra.gmra.mxu0 %vm119_vm2, %v8540_v54  ;;  %7313 = vmatpush3.bf16.msra.mxu1 %v3403_v37 }
 0x1a0   :  { %v8603_v41 = vadd.f32 %v1060_v39, %v8538_v53  ;;  %v3582_v42 = vpop.permute.xlu1 %3581  ;;  %v3580_v43 = vpop.permute.xlu0 %3579  ;;  %3657 = vmatprep.mubr.bf16.mxu0 %v7648_v0 }
 0x1a1   :  { %v1062_v44 = vpop.f32.mrf.mxu1  ;;  %v3594_v45 = vsel %vm3593_vm4, %v3578_v30, %v3580_v43  ;;  %v3595_v46 = vsel %vm3593_vm4, %v3580_v43, %v3582_v42  ;;  %v1024_v47 = vpop.f32.mrf.mxu0 }
 0x1a2   :  { %v8609_v48 = vadd.f32 %v1062_v44, %v8545_v59  ;;  %v3605_v49 = vsel %vm123_vm1, %v3594_v45, 0  ;;  %4912 = vrot.lane.b32.xlu1 %v7770_v14, %s7683_s14  ;;  %4910 = vrot.lane.b32.xlu0 %v7764_v12, %s7683_s14 }
 0x1a3   :  { %v1064_v50 = vpop.f32.mrf.mxu1  ;;  %v1101_v51 = vpop.f32.mrf.mxu0  ;;  %7315 = vmatmul.mubr.msk.bf16.vlgmr.msra.gmra.mxu1 %vm119_vm2, %v8540_v54  ;;  %6943 = vmatprep.subr.msk.bf16.mxu0 %vm123_vm1, %v3595_v46 }
 0x1a4   :  { %v8620_v5 = vadd.f32 %v1101_v51, %v8555_v63  ;;  %3640 = vmatpush1.bf16.msra.mxu0 %v3605_v49  ;;  %v3586_v53 = vpop.permute.xlu1 %3585  ;;  %v3584_v55 = vpop.permute.xlu0 %3583  ;;  %3698 = vmatprep.mubr.bf16.mxu1 %v7648_v0 }
 0x1a5   :  { %v1065_v56 = vpop.f32.mrf.mxu1  ;;  %v3596_v57 = vsel %vm3593_vm4, %v3582_v42, %v3584_v55  ;;  %v3597_v58 = vsel %vm3593_vm4, %v3584_v55, %v3586_v53  ;;  %v1103_v59 = vpop.f32.mrf.mxu0 }
 0x1a6   :  { %v3611_v60 = vsel %vm123_vm1, %v3596_v57, 0  ;;  %v8627_v54 = vadd.f32 %v1103_v59, %v8561_v18  ;;  %5120 = vrot.lane.b32.xlu1 %v7748_v7, %s7684_s16  ;;  %4914 = vrot.lane.b32.xlu0 %v8346_v33, %s7683_s14 }
 0x1a7   :  { %v1142_v61 = vpop.f32.mrf.mxu1  ;;  %v1105_v62 = vpop.f32.mrf.mxu0  ;;  %6944 = vmatmul.mubr.msk.bf16.vlgmr.msra.gmra.mxu0 %vm119_vm2, %v8275_v52  ;;  %6945 = vmatprep.subr.msk.bf16.mxu1 %vm123_vm1, %v3597_v58 }
 0x1a8   :  { %v8637_v63 = vadd.f32 %v1142_v61, %v8572_v20  ;;  %3681 = vmatpush1.bf16.msra.mxu1 %v3611_v60  ;;  %v3590_v1 = vpop.permute.xlu1 %3589  ;;  %v3588_v2 = vpop.permute.xlu0 %3587  ;;  %3739 = vmatprep.mubr.bf16.mxu0 %v7648_v0 }
 0x1a9   :  { %v7250_v3 = vpop.f32.mrf.mxu1  ;;  %v3598_v6 = vsel %vm3593_vm4, %v3586_v53, %v3588_v2  ;;  %v3599_v16 = vsel %vm3593_vm4, %v3588_v2, %v3590_v1  ;;  %v1106_v17 = vpop.f32.mrf.mxu0  ;;  %7318 = vmatprep.subr.bf16.mxu1 %v7664_v31 }
 0x1aa   :  { %v3617_v18 = vsel %vm123_vm1, %v3598_v6, 0  ;;  %5124 = vrot.lane.b32.xlu1 %v7760_v10, %s7684_s16  ;;  %5122 = vrot.lane.b32.xlu0 %v7743_v4, %s7684_s16 }
 0x1ab   :  { %v1145_v15 = vpop.f32.mrf.mxu1  ;;  %v1239_v11 = vpop.f32.mrf.mxu0  ;;  %6946 = vmatmul.mubr.msk.bf16.vlgmr.msra.gmra.mxu1 %vm119_vm2, %v8275_v52  ;;  %6947 = vmatprep.subr.msk.bf16.mxu0 %vm123_vm1, %v3599_v16 }
 0x1ac   :  { %v8652_v19 = vadd.f32 %v1239_v11, %v8587_v29  ;;  %3722 = vmatpush1.bf16.msra.mxu0 %v3617_v18  ;;  %v3798_v20 = vpop.permute.xlu1 %3797  ;;  %v3592_v21 = vpop.permute.xlu0 %3591  ;;  %7320 = vmatprep.mubr.msk.bf16.mxu1 %vm7665_vm3, %v7664_v31 }
 0x1ad   :  { %v7251_v8 = vpop.f32.mrf.mxu1  ;;  %v3600_v22 = vsel %vm3593_vm4, %v3590_v1, %v3592_v21  ;;  %v1241_v23 = vpop.f32.mrf.mxu0 }
 0x1ae   :  { %v3623_v24 = vsel %vm123_vm1, %v3600_v22, 0  ;;  %v8659_v25 = vadd.f32 %v1241_v23, %v8594_v38  ;;  %5126 = vrot.lane.b32.xlu1 %v7758_v9, %s7684_s16  ;;  %5118 = vrot.lane.b32.xlu0 %v8275_v52, %s7662_s22 }
 0x1af   :  { %v1280_v26 = vpop.f32.mrf.mxu1  ;;  %v1243_v27 = vpop.f32.mrf.mxu0  ;;  %6948 = vmatmul.mubr.msk.bf16.vlgmr.msra.gmra.mxu0 %vm119_vm2, %v8275_v52  ;;  %7319 = vmatpush3.bf16.msra.mxu1 %v3623_v24 }
 0x1b0   :  { %v8668_v28 = vadd.f32 %v1280_v26, %v8603_v41  ;;  %v3802_v29 = vpop.permute.xlu1 %3801  ;;  %v3800_v30 = vpop.permute.xlu0 %3799  ;;  %3877 = vmatprep.mubr.bf16.mxu0 %v7648_v0 }
 0x1b1   :  { %v1282_v32 = vpop.f32.mrf.mxu1  ;;  %v3814_v34 = vsel %vm3813_vm5, %v3798_v20, %v3800_v30  ;;  %v3815_v35 = vsel %vm3813_vm5, %v3800_v30, %v3802_v29  ;;  %v1244_v36 = vpop.f32.mrf.mxu0 }
 0x1b2   :  { %v8674_v37 = vadd.f32 %v1282_v32, %v8609_v48  ;;  %v3825_v38 = vsel %vm123_vm1, %v3814_v34, 0  ;;  %5130 = vrot.lane.b32.xlu1 %v7764_v12, %s7684_s16  ;;  %5128 = vrot.lane.b32.xlu0 %v7766_v13, %s7684_s16 }
 0x1b3   :  { %v1284_v39 = vpop.f32.mrf.mxu1  ;;  %v1321_v40 = vpop.f32.mrf.mxu0  ;;  %7321 = vmatmul.mubr.msk.bf16.vlgmr.msra.gmra.mxu1 %vm119_vm2, %v8275_v52  ;;  %6950 = vmatprep.subr.msk.bf16.mxu0 %vm123_vm1, %v3815_v35 }
 0x1b4   :  { %v8685_v41 = vadd.f32 %v1321_v40, %v8620_v5  ;;  %3860 = vmatpush1.bf16.msra.mxu0 %v3825_v38  ;;  %v3804_v42 = vpop.permute.xlu1 %3803  ;;  %v8687_v43 = vpop.permute.xlu0 %3795  ;;  %3918 = vmatprep.mubr.bf16.mxu1 %v7648_v0 }
 0x1b5   :  { %v1285_v44 = vpop.f32.mrf.mxu1  ;;  %v1323_v45 = vpop.f32.mrf.mxu0  ;;  %v3816_v49 = vsel %vm3813_vm5, %v3802_v29, %v3804_v42 }
 0x1b6   :  { %v8691_v46 = vadd.f32 %v1323_v45, %v8627_v54  ;;  %5134 = vrot.lane.b32.xlu1 %v8346_v33, %s7684_s16  ;;  %5132 = vrot.lane.b32.xlu0 %v7770_v14, %s7684_s16  ;;  %v3831_v57 = vsel %vm123_vm1, %v3816_v49, 0 }
 0x1b7   :  { %v1362_v47 = vpop.f32.mrf.mxu1  ;;  %v1325_v48 = vpop.f32.mrf.mxu0  ;;  %6951 = vmatmul.mubr.msk.bf16.vlgmr.msra.gmra.mxu0 %vm119_vm2, %v8687_v43 }
 0x1b8   :  { %v8701_v50 = vadd.f32 %v1362_v47, %v8637_v63  ;;  %v3808_v51 = vpop.permute.xlu1 %3807  ;;  %v3806_v5 = vpop.permute.xlu0 %3805  ;;  %3959 = vmatprep.mubr.bf16.mxu0 %v7648_v0 }
 0x1b9   :  { %v7256_v53 = vpop.f32.mrf.mxu1  ;;  %v3817_v55 = vsel %vm3813_vm5, %v3804_v42, %v3806_v5  ;;  %v1326_v56 = vpop.f32.mrf.mxu0  ;;  %v3818_v60 = vsel %vm3813_vm5, %v3806_v5, %v3808_v51 }
 0x1ba   :  { %5342 = vrot.lane.b32.xlu1 %v7743_v4, %s7685_s18  ;;  %5340 = vrot.lane.b32.xlu0 %v7748_v7, %s7685_s18  ;;  %v3837_v17 = vsel %vm123_vm1, %v3818_v60, 0 }
 0x1bb   :  { %v1365_v58 = vpop.f32.mrf.mxu1  ;;  %v1459_v59 = vpop.f32.mrf.mxu0  ;;  %6952 = vmatprep.subr.msk.bf16.mxu1 %vm123_vm1, %v3817_v55 }
 0x1bc   :  { %v8713_v54 = vadd.f32 %v1459_v59, %v8652_v19  ;;  %3901 = vmatpush1.bf16.msra.mxu1 %v3831_v57  ;;  %v3812_v61 = vpop.permute.xlu1 %3811  ;;  %v3810_v62 = vpop.permute.xlu0 %3809 }
 0x1bd   :  { %v7257_v63 = vpop.f32.mrf.mxu1  ;;  %v3819_v1 = vsel %vm3813_vm5, %v3808_v51, %v3810_v62  ;;  %v3820_v2 = vsel %vm3813_vm5, %v3810_v62, %v3812_v61  ;;  %v1461_v3 = vpop.f32.mrf.mxu0  ;;  %7324 = vmatprep.subr.bf16.mxu1 %v7664_v31 }
 0x1be   :  { %v3843_v6 = vsel %vm123_vm1, %v3820_v2, 0  ;;  %v8720_v16 = vadd.f32 %v1461_v3, %v8659_v25  ;;  %5338 = vrot.lane.b32.xlu1 %v8275_v52, %s7646_s29  ;;  %5344 = vrot.lane.b32.xlu0 %v7760_v10, %s7685_s18  ;;  %s7686_s29 = smov 35  }
 0x1bf   :  { %v1500_v18 = vpop.f32.mrf.mxu1  ;;  %v1463_v15 = vpop.f32.mrf.mxu0  ;;  %6953 = vmatmul.mubr.msk.bf16.vlgmr.msra.gmra.mxu1 %vm119_vm2, %v8687_v43  ;;  %6954 = vmatprep.subr.msk.bf16.mxu0 %vm123_vm1, %v3819_v1 }
 0x1c0   :  { %v8731_v11 = vadd.f32 %v1500_v18, %v8668_v28  ;;  %3942 = vmatpush1.bf16.msra.mxu0 %v3837_v17  ;;  %7325 = vmatpush3.bf16.msra.mxu1 %v3843_v6  ;;  %v4023_v19 = vpop.permute.xlu1 %4022  ;;  %v4021_v20 = vpop.permute.xlu0 %4020 }
 0x1c1   :  { %v1502_v21 = vpop.f32.mrf.mxu1  ;;  %v1464_v8 = vpop.f32.mrf.mxu0  ;;  %7326 = vmatprep.mubr.msk.bf16.mxu1 %vm7665_vm3, %v7664_v31  ;;  %v4037_v25 = vsel %vm4036_vm6, %v4021_v20, %v4023_v19 }
 0x1c2   :  { %v8736_v22 = vadd.f32 %v1502_v21, %v8674_v37  ;;  %5348 = vrot.lane.b32.xlu1 %v7766_v13, %s7685_s18  ;;  %5346 = vrot.lane.b32.xlu0 %v7758_v9, %s7685_s18  ;;  %v4048_v35 = vsel %vm123_vm1, %v4037_v25, 0 }
 0x1c3   :  { %v1504_v23 = vpop.f32.mrf.mxu1  ;;  %v1541_v24 = vpop.f32.mrf.mxu0  ;;  %6955 = vmatmul.mubr.msk.bf16.vlgmr.msra.gmra.mxu0 %vm119_vm2, %v8687_v43 }
 0x1c4   :  { %v8746_v26 = vadd.f32 %v1541_v24, %v8685_v41  ;;  %v8748_v27 = vpop.permute.xlu1 %4015  ;;  %v4025_v28 = vpop.permute.xlu0 %4024  ;;  %4100 = vmatprep.mubr.bf16.mxu0 %v7648_v0 }
 0x1c5   :  { %v1505_v29 = vpop.f32.mrf.mxu1  ;;  %v4038_v30 = vsel %vm4036_vm6, %v4023_v19, %v4025_v28  ;;  %v1543_v32 = vpop.f32.mrf.mxu0 }
 0x1c6   :  { %v8753_v34 = vadd.f32 %v1543_v32, %v8691_v46  ;;  %5352 = vrot.lane.b32.xlu1 %v7770_v14, %s7685_s18  ;;  %5350 = vrot.lane.b32.xlu0 %v7764_v12, %s7685_s18 }
 0x1c7   :  { %v1582_v36 = vpop.f32.mrf.mxu1  ;;  %v1545_v37 = vpop.f32.mrf.mxu0  ;;  %7327 = vmatmul.mubr.msk.bf16.vlgmr.msra.gmra.mxu1 %vm119_vm2, %v8687_v43  ;;  %6958 = vmatprep.subr.msk.bf16.mxu0 %vm123_vm1, %v4038_v30 }
 0x1c8   :  { %v8764_v38 = vadd.f32 %v1582_v36, %v8701_v50  ;;  %4083 = vmatpush1.bf16.msra.mxu0 %v4048_v35  ;;  %v4029_v39 = vpop.permute.xlu1 %4028  ;;  %v4027_v40 = vpop.permute.xlu0 %4026  ;;  %4141 = vmatprep.mubr.bf16.mxu1 %v7648_v0 }
 0x1c9   :  { %v7262_v41 = vpop.f32.mrf.mxu1  ;;  %v4039_v42 = vsel %vm4036_vm6, %v4025_v28, %v4027_v40  ;;  %v4040_v44 = vsel %vm4036_vm6, %v4027_v40, %v4029_v39  ;;  %v1546_v45 = vpop.f32.mrf.mxu0 }
 0x1ca   :  { %v4054_v46 = vsel %vm123_vm1, %v4039_v42, 0  ;;  %5560 = vrot.lane.b32.xlu1 %v7748_v7, %s7686_s29  ;;  %5354 = vrot.lane.b32.xlu0 %v8346_v33, %s7685_s18 }
 0x1cb   :  { %v1585_v43 = vpop.f32.mrf.mxu1  ;;  %v1679_v47 = vpop.f32.mrf.mxu0  ;;  %6959 = vmatmul.mubr.msk.bf16.vlgmr.msra.gmra.mxu0 %vm119_vm2, %v8748_v27  ;;  %6960 = vmatprep.subr.msk.bf16.mxu1 %vm123_vm1, %v4040_v44 }
 0x1cc   :  { %v8778_v48 = vadd.f32 %v1679_v47, %v8713_v54  ;;  %4124 = vmatpush1.bf16.msra.mxu1 %v4054_v46  ;;  %v4033_v49 = vpop.permute.xlu1 %4032  ;;  %v4031_v50 = vpop.permute.xlu0 %4030  ;;  %4182 = vmatprep.mubr.bf16.mxu0 %v7648_v0 }
 0x1cd   :  { %v7263_v51 = vpop.f32.mrf.mxu1  ;;  %v4041_v5 = vsel %vm4036_vm6, %v4029_v39, %v4031_v50  ;;  %v4042_v53 = vsel %vm4036_vm6, %v4031_v50, %v4033_v49  ;;  %v1681_v55 = vpop.f32.mrf.mxu0  ;;  %7330 = vmatprep.subr.bf16.mxu1 %v7664_v31 }
 0x1ce   :  { %v4060_v56 = vsel %vm123_vm1, %v4041_v5, 0  ;;  %v1809_v57 = vadd.f32 %v1681_v55, %v8720_v16  ;;  %5564 = vrot.lane.b32.xlu1 %v7760_v10, %s7686_s29  ;;  %5562 = vrot.lane.b32.xlu0 %v7743_v4, %s7686_s29 }
 0x1cf   :  { %v1720_v58 = vpop.f32.mrf.mxu1  ;;  %v1683_v59 = vpop.f32.mrf.mxu0  ;;  %6961 = vmatmul.mubr.msk.bf16.vlgmr.msra.gmra.mxu1 %vm119_vm2, %v8748_v27  ;;  %6962 = vmatprep.subr.msk.bf16.mxu0 %vm123_vm1, %v4042_v53 }
 0x1d0   :  { %v8794_v60 = vadd.f32 %v1720_v58, %v8731_v11  ;;  %4165 = vmatpush1.bf16.msra.mxu0 %v4060_v56  ;;  %v4241_v54 = vpop.permute.xlu1 %4240  ;;  %v4035_v61 = vpop.permute.xlu0 %4034  ;;  %7332 = vmatprep.mubr.msk.bf16.mxu1 %vm7665_vm3, %v7664_v31 }
 0x1d1   :  { %v1722_v62 = vpop.f32.mrf.mxu1  ;;  %v4043_v63 = vsel %vm4036_vm6, %v4033_v49, %v4035_v61  ;;  %v1684_v1 = vpop.f32.mrf.mxu0 }
 0x1d2   :  { %v8800_v2 = vadd.f32 %v1722_v62, %v8736_v22  ;;  %v4066_v3 = vsel %vm123_vm1, %v4043_v63, 0  ;;  %5566 = vrot.lane.b32.xlu1 %v7758_v9, %s7686_s29  ;;  %5558 = vrot.lane.b32.xlu0 %v8275_v52, %s7667_s25 }
 0x1d3   :  { %v1724_v6 = vpop.f32.mrf.mxu1  ;;  %v1761_v16 = vpop.f32.mrf.mxu0  ;;  %6963 = vmatmul.mubr.msk.bf16.vlgmr.msra.gmra.mxu0 %vm119_vm2, %v8748_v27  ;;  %7331 = vmatpush3.bf16.msra.mxu1 %v4066_v3 }
 0x1d4   :  { %v8810_v17 = vadd.f32 %v1761_v16, %v8746_v26  ;;  %v4245_v18 = vpop.permute.xlu1 %4244  ;;  %v4243_v15 = vpop.permute.xlu0 %4242  ;;  %4320 = vmatprep.mubr.bf16.mxu0 %v7648_v0 }
 0x1d5   :  { %v1725_v11 = vpop.f32.mrf.mxu1  ;;  %v4257_v19 = vsel %vm4256_vm7, %v4241_v54, %v4243_v15  ;;  %v4258_v20 = vsel %vm4256_vm7, %v4243_v15, %v4245_v18  ;;  %v1763_v21 = vpop.f32.mrf.mxu0 }
 0x1d6   :  { %v4268_v8 = vsel %vm123_vm1, %v4257_v19, 0  ;;  %v8817_v22 = vadd.f32 %v1763_v21, %v8753_v34  ;;  %5570 = vrot.lane.b32.xlu1 %v7764_v12, %s7686_s29  ;;  %5568 = vrot.lane.b32.xlu0 %v7766_v13, %s7686_s29 }
 0x1d7   :  { %v1802_v23 = vpop.f32.mrf.mxu1  ;;  %v1765_v24 = vpop.f32.mrf.mxu0  ;;  %7333 = vmatmul.mubr.msk.bf16.vlgmr.msra.gmra.mxu1 %vm119_vm2, %v8748_v27  ;;  %6965 = vmatprep.subr.msk.bf16.mxu0 %vm123_vm1, %v4258_v20 }
 0x1d8   :  { %v8827_v25 = vadd.f32 %v1802_v23, %v8764_v38  ;;  %4303 = vmatpush1.bf16.msra.mxu0 %v4268_v8  ;;  %v4247_v26 = vpop.permute.xlu1 %4246  ;;  %v8829_v28 = vpop.permute.xlu0 %4238  ;;  %4361 = vmatprep.mubr.bf16.mxu1 %v7648_v0  ;;  %v7535_v8 = vld [vmem:[#allocation2 + $0x20] ss:$0 sps:$4 sm:$0xff]  }
 0x1d9   :  { %v7268_v29 = vpop.f32.mrf.mxu1  ;;  %v1766_v30 = vpop.f32.mrf.mxu0  ;;  %v4259_v34 = vsel %vm4256_vm7, %v4245_v18, %v4247_v26 }
 0x1da   :  { %5574 = vrot.lane.b32.xlu1 %v8346_v33, %s7686_s29  ;;  %5572 = vrot.lane.b32.xlu0 %v7770_v14, %s7686_s29  ;;  %v4274_v41 = vsel %vm123_vm1, %v4259_v34, 0 }
 0x1db   :  { %v1805_v27 = vpop.f32.mrf.mxu1  ;;  %v1899_v32 = vpop.f32.mrf.mxu0  ;;  %6966 = vmatmul.mubr.msk.bf16.vlgmr.msra.gmra.mxu0 %vm119_vm2, %v8829_v28 }
 0x1dc   :  { %v8840_v35 = vadd.f32 %v1899_v32, %v8778_v48  ;;  %v4251_v36 = vpop.permute.xlu1 %4250  ;;  %v4249_v37 = vpop.permute.xlu0 %4248  ;;  %4402 = vmatprep.mubr.bf16.mxu0 %v7648_v0 }
 0x1dd   :  { %v7269_v38 = vpop.f32.mrf.mxu1  ;;  %v4260_v33 = vsel %vm4256_vm7, %v4247_v26, %v4249_v37  ;;  %v1901_v39 = vpop.f32.mrf.mxu0  ;;  %v4261_v45 = vsel %vm4256_vm7, %v4249_v37, %v4251_v36 }
 0x1de   :  { %v8844_v40 = vadd.f32 %v1901_v39, %v1809_v57  ;;  %5782 = vrot.lane.b32.xlu1 %v7743_v4, %s7687_s20  ;;  %5780 = vrot.lane.b32.xlu0 %v7748_v7, %s7687_s20  ;;  %v4280_v5 = vsel %vm123_vm1, %v4261_v45, 0 }
 0x1df   :  { %v1940_v42 = vpop.f32.mrf.mxu1  ;;  %v1903_v44 = vpop.f32.mrf.mxu0  ;;  %6967 = vmatprep.subr.msk.bf16.mxu1 %vm123_vm1, %v4260_v33 }
 0x1e0   :  { %v8854_v46 = vadd.f32 %v1940_v42, %v8794_v60  ;;  %4344 = vmatpush1.bf16.msra.mxu1 %v4274_v41  ;;  %v4255_v43 = vpop.permute.xlu1 %4254  ;;  %v4253_v47 = vpop.permute.xlu0 %4252 }
 0x1e1   :  { %v1942_v48 = vpop.f32.mrf.mxu1  ;;  %v4262_v4 = vsel %vm4256_vm7, %v4251_v36, %v4253_v47  ;;  %v4263_v49 = vsel %vm4256_vm7, %v4253_v47, %v4255_v43  ;;  %v1904_v7 = vpop.f32.mrf.mxu0  ;;  %7336 = vmatprep.subr.bf16.mxu1 %v7664_v31 }
 0x1e2   :  { %v8860_v50 = vadd.f32 %v1942_v48, %v8800_v2  ;;  %v4286_v51 = vsel %vm123_vm1, %v4263_v49, 0  ;;  %5778 = vrot.lane.b32.xlu1 %v8275_v52, %s7669_s27  ;;  %5784 = vrot.lane.b32.xlu0 %v7760_v10, %s7687_s20 }
 0x1e3   :  { %v1944_v53 = vpop.f32.mrf.mxu1  ;;  %v1981_v55 = vpop.f32.mrf.mxu0  ;;  %6968 = vmatmul.mubr.msk.bf16.vlgmr.msra.gmra.mxu1 %vm119_vm2, %v8829_v28  ;;  %6969 = vmatprep.subr.msk.bf16.mxu0 %vm123_vm1, %v4262_v4 }
 0x1e4   :  { %v8872_v56 = vadd.f32 %v1981_v55, %v8810_v17  ;;  %4385 = vmatpush1.bf16.msra.mxu0 %v4280_v5  ;;  %7337 = vmatpush3.bf16.msra.mxu1 %v4286_v51  ;;  %v4463_v57 = vpop.permute.xlu1 %4462  ;;  %v4461_v58 = vpop.permute.xlu0 %4460 }
 0x1e5   :  { %v1945_v52 = vpop.f32.mrf.mxu1  ;;  %v1983_v59 = vpop.f32.mrf.mxu0  ;;  %7338 = vmatprep.mubr.msk.bf16.mxu1 %vm7665_vm3, %v7664_v31  ;;  %v4477_v61 = vsel %vm4476_vm8, %v4461_v58, %v4463_v57 }
 0x1e6   :  { %v8877_v10 = vadd.f32 %v1983_v59, %v8817_v22  ;;  %5788 = vrot.lane.b32.xlu1 %v7766_v13, %s7687_s20  ;;  %5786 = vrot.lane.b32.xlu0 %v7758_v9, %s7687_s20  ;;  %v4488_v9 = vsel %vm123_vm1, %v4477_v61, 0 }
 0x1e7   :  { %v2022_v60 = vpop.f32.mrf.mxu1  ;;  %v1985_v54 = vpop.f32.mrf.mxu0  ;;  %6970 = vmatmul.mubr.msk.bf16.vlgmr.msra.gmra.mxu0 %vm119_vm2, %v8829_v28 }
 0x1e8   :  { %v2034_v62 = vadd.f32 %v2022_v60, %v8827_v25  ;;  %v8887_v63 = vpop.permute.xlu1 %4458  ;;  %v4465_v1 = vpop.permute.xlu0 %4464  ;;  %4540 = vmatprep.mubr.bf16.mxu0 %v7648_v0 }
 0x1e9   :  { %v7274_v2 = vpop.f32.mrf.mxu1  ;;  %v4478_v13 = vsel %vm4476_vm8, %v4463_v57, %v4465_v1  ;;  %v1986_v3 = vpop.f32.mrf.mxu0 }
 0x1ea   :  { %5792 = vrot.lane.b32.xlu1 %v7770_v14, %s7687_s20  ;;  %5790 = vrot.lane.b32.xlu0 %v7764_v12, %s7687_s20 }
 0x1eb   :  { %v2025_v6 = vpop.f32.mrf.mxu1  ;;  %v2119_v16 = vpop.f32.mrf.mxu0  ;;  %7339 = vmatmul.mubr.msk.bf16.vlgmr.msra.gmra.mxu1 %vm119_vm2, %v8829_v28  ;;  %6972 = vmatprep.subr.msk.bf16.mxu0 %vm123_vm1, %v4478_v13 }
 0x1ec   :  { %v2248_v17 = vadd.f32 %v2119_v16, %v8840_v35  ;;  %4523 = vmatpush1.bf16.msra.mxu0 %v4488_v9  ;;  %v4469_v18 = vpop.permute.xlu1 %4468  ;;  %v4467_v15 = vpop.permute.xlu0 %4466  ;;  %4581 = vmatprep.mubr.bf16.mxu1 %v7648_v0 }
 0x1ed   :  { %v7275_v14 = vpop.f32.mrf.mxu1  ;;  %v4479_v11 = vsel %vm4476_vm8, %v4465_v1, %v4467_v15  ;;  %v4480_v12 = vsel %vm4476_vm8, %v4467_v15, %v4469_v18  ;;  %v2121_v19 = vpop.f32.mrf.mxu0 }
 0x1ee   :  { %v4494_v20 = vsel %vm123_vm1, %v4479_v11, 0  ;;  %v2249_v21 = vadd.f32 %v2121_v19, %v8844_v40  ;;  %5794 = vrot.lane.b32.xlu0 %v7535_v8, %s7687_s20  ;;  %6974 = vmatprep.subr.msk.bf16.mxu1 %vm123_vm1, %v4480_v12 }
 0x1ef   :  { %v2160_v22 = vpop.f32.mrf.mxu1  ;;  %v2123_v23 = vpop.f32.mrf.mxu0  ;;  %6973 = vmatmul.mubr.msk.bf16.vlgmr.msra.gmra.mxu0 %vm119_vm2, %v8887_v63  ;;  %4564 = vmatpush1.bf16.msra.mxu1 %v4494_v20 }
 0x1f0   :  { %v8910_v24 = vadd.f32 %v2160_v22, %v8854_v46  ;;  %v4473_v25 = vpop.permute.xlu1 %4472  ;;  %v4471_v26 = vpop.permute.xlu0 %4470  ;;  %4622 = vmatprep.mubr.bf16.mxu0 %v7648_v0  ;;  %7342 = vmatprep.subr.bf16.mxu1 %v7664_v31 }
 0x1f1   :  { %v2162_v28 = vpop.f32.mrf.mxu1  ;;  %v4481_v29 = vsel %vm4476_vm8, %v4469_v18, %v4471_v26  ;;  %v4482_v30 = vsel %vm4476_vm8, %v4471_v26, %v4473_v25  ;;  %v2124_v27 = vpop.f32.mrf.mxu0 }
 0x1f2   :  { %v8917_v32 = vadd.f32 %v2162_v28, %v8860_v50  ;;  %v4500_v34 = vsel %vm123_vm1, %v4481_v29, 0  ;;  %6976 = vmatprep.subr.msk.bf16.mxu0 %vm123_vm1, %v4482_v30 }
 0x1f3   :  { %v2164_v35 = vpop.f32.mrf.mxu1  ;;  %v2201_v36 = vpop.f32.mrf.mxu0  ;;  %6975 = vmatmul.mubr.msk.bf16.vlgmr.msra.gmra.mxu1 %vm119_vm2, %v8887_v63  ;;  %4605 = vmatpush1.bf16.msra.mxu0 %v4500_v34 }
 0x1f4   :  { %v8924_v37 = vadd.f32 %v2201_v36, %v8872_v56  ;;  %v4681_v38 = vpop.permute.xlu1 %4680  ;;  %v4475_v33 = vpop.permute.xlu0 %4474  ;;  %7344 = vmatprep.mubr.msk.bf16.mxu1 %vm7665_vm3, %v7664_v31 }
 0x1f5   :  { %v2165_v39 = vpop.f32.mrf.mxu1  ;;  %v4483_v40 = vsel %vm4476_vm8, %v4473_v25, %v4475_v33  ;;  %v2203_v41 = vpop.f32.mrf.mxu0 }
 0x1f6   :  { %v4506_v42 = vsel %vm123_vm1, %v4483_v40, 0  ;;  %v8931_v44 = vadd.f32 %v2203_v41, %v8877_v10 }
 0x1f7   :  { %v2205_v45 = vpop.f32.mrf.mxu0  ;;  %v2242_v46 = vpop.f32.mrf.mxu1  ;;  %6977 = vmatmul.mubr.msk.bf16.vlgmr.msra.gmra.mxu0 %vm119_vm2, %v8887_v63  ;;  %7343 = vmatpush3.bf16.msra.mxu1 %v4506_v42 }
 0x1f8   :  { %v8935_v43 = vadd.f32 %v2242_v46, %v2034_v62  ;;  %v4685_v47 = vpop.permute.xlu1 %4684  ;;  %v4683_v48 = vpop.permute.xlu0 %4682  ;;  %4760 = vmatprep.mubr.bf16.mxu0 %v7648_v0 }
 0x1f9   :  { %v7280_v4 = vpop.f32.mrf.mxu1  ;;  %v4697_v49 = vsel %vm4696_vm9, %v4681_v38, %v4683_v48  ;;  %v4698_v7 = vsel %vm4696_vm9, %v4683_v48, %v4685_v47  ;;  %v2206_v50 = vpop.f32.mrf.mxu0 }
 0x1fa   :  { %v4708_v51 = vsel %vm123_vm1, %v4697_v49, 0  ;;  %6979 = vmatprep.subr.msk.bf16.mxu0 %vm123_vm1, %v4698_v7 }
 0x1fb   :  { %v2245_v5 = vpop.f32.mrf.mxu1  ;;  %v2339_v53 = vpop.f32.mrf.mxu0  ;;  %7345 = vmatmul.mubr.msk.bf16.vlgmr.msra.gmra.mxu1 %vm119_vm2, %v8887_v63  ;;  %4743 = vmatpush1.bf16.msra.mxu0 %v4708_v51 }
 0x1fc   :  { %v2468_v55 = vadd.f32 %v2339_v53, %v2248_v17  ;;  %v4687_v56 = vpop.permute.xlu1 %4686  ;;  %v4679_v57 = vpop.permute.xlu0 %4678  ;;  %4801 = vmatprep.mubr.bf16.mxu1 %v7648_v0 }
 0x1fd   :  { %v7281_v58 = vpop.f32.mrf.mxu1  ;;  %v2341_v52 = vpop.f32.mrf.mxu0  ;;  %v4699_v10 = vsel %vm4696_vm9, %v4685_v47, %v4687_v56 }
 0x1fe   :  { %v8945_v59 = vadd.f32 %v2341_v52, %v2249_v21  ;;  %v4714_v1 = vsel %vm123_vm1, %v4699_v10, 0 }
 0x1ff   :  { %v2343_v60 = vpop.f32.mrf.mxu0  ;;  %6980 = vmatmul.mubr.msk.bf16.vlgmr.msra.gmra.mxu0 %vm119_vm2, %v4679_v57 }
 0x200   :  { %v4691_v54 = vpop.permute.xlu1 %4690  ;;  %v4689_v61 = vpop.permute.xlu0 %4688  ;;  %4842 = vmatprep.mubr.bf16.mxu0 %v7648_v0 }
 0x201   :  { %v4700_v62 = vsel %vm4696_vm9, %v4687_v56, %v4689_v61  ;;  %v2344_v63 = vpop.f32.mrf.mxu0  ;;  %v4701_v2 = vsel %vm4696_vm9, %v4689_v61, %v4691_v54 }
 0x202   :  { %6981 = vmatprep.subr.msk.bf16.mxu1 %vm123_vm1, %v4700_v62  ;;  %v4720_v15 = vsel %vm123_vm1, %v4701_v2, 0 }
 0x203   :  { %v2380_v13 = vpop.f32.mrf.mxu1  ;;  %4784 = vmatpush1.bf16.msra.mxu1 %v4714_v1 }
 0x204   :  { %v2470_v3 = vadd.f32 %v2380_v13, %v8910_v24  ;;  %v4695_v9 = vpop.permute.xlu1 %4694  ;;  %v4693_v6 = vpop.permute.xlu0 %4692  ;;  %7348 = vmatprep.subr.bf16.mxu1 %v7664_v31 }
 0x205   :  { %v2382_v16 = vpop.f32.mrf.mxu1  ;;  %v4702_v17 = vsel %vm4696_vm9, %v4691_v54, %v4693_v6  ;;  %v4703_v18 = vsel %vm4696_vm9, %v4693_v6, %v4695_v9 }
 0x206   :  { %v2471_v14 = vadd.f32 %v2382_v16, %v8917_v32  ;;  %v4726_v11 = vsel %vm123_vm1, %v4703_v18, 0  ;;  %6982 = vmatmul.mubr.msk.bf16.vlgmr.msra.gmra.mxu1 %vm119_vm2, %v4679_v57  ;;  %6983 = vmatprep.subr.msk.bf16.mxu0 %vm123_vm1, %v4702_v17 }
 0x207   :  { %v2384_v12 = vpop.f32.mrf.mxu1  ;;  %v2421_v19 = vpop.f32.mrf.mxu0  ;;  %4825 = vmatpush1.bf16.msra.mxu0 %v4720_v15  ;;  %7349 = vmatpush3.bf16.msra.mxu1 %v4726_v11 }
 0x208   :  { %v2472_v20 = vadd.f32 %v2421_v19, %v8924_v37  ;;  %v4903_v21 = vpop.permute.xlu1 %4902  ;;  %v4901_v8 = vpop.permute.xlu0 %4900  ;;  %7350 = vmatprep.mubr.msk.bf16.mxu1 %vm7665_vm3, %v7664_v31 }
 0x209   :  { %v2385_v22 = vpop.f32.mrf.mxu1  ;;  %v2423_v23 = vpop.f32.mrf.mxu0  ;;  %v4917_v25 = vsel %vm4916_vm10, %v4901_v8, %v4903_v21 }
 0x20a   :  { %v2473_v24 = vadd.f32 %v2423_v23, %v8931_v44  ;;  %6984 = vmatmul.mubr.msk.bf16.vlgmr.msra.gmra.mxu0 %vm119_vm2, %v4679_v57  ;;  %v4928_v36 = vsel %vm123_vm1, %v4917_v25, 0  ;;  %v5998_v22 = vld [vmem:[%s9257_s1] sm:$0xff]  ;;  %s7688_s1 = smov [#allocation8]  }
 0x20b   :  { %v2425_v26 = vpop.f32.mrf.mxu0  ;;  %v2462_v28 = vpop.f32.mrf.mxu1  ;;  %4980 = vmatprep.mubr.bf16.mxu0 %v7648_v0  ;;  %6001 = vperm.xlu1 %7451, %v5998_v22   ;;  %s6794_s23 = sshll.u32 %s7688_s1, 4  ;;  %s6795_s23 = int_to_ptr.vmem [resolvable:$true] %s6794_s23 }
 0x20c   :  { %v2474_v29 = vadd.f32 %v2462_v28, %v8935_v43  ;;  %v8971_v30 = vpop.permute.xlu1 %4898  ;;  %v4905_v27 = vpop.permute.xlu0 %4904  ;;  %s7576_s24 = scalar_lea.vmem %s6795_s23, 448  ;;  %p7581_p11 = scmp.lt.s32.totalorder %s6795_s23, %s6795_s23 }
 0x20d   :  { %v7286_v32 = vpop.f32.mrf.mxu1  ;;  %v4918_v34 = vsel %vm4916_vm10, %v4903_v21, %v4905_v27  ;;  %v2426_v35 = vpop.f32.mrf.mxu0  ;;  %p7577_p10 = scmp.ne.s32.totalorder %s6795_s23, %s7576_s24  ;;  %p7582_p12 = scmp.lt.s32.totalorder %s7576_s24, %s7576_s24 }
 0x20e   :  { %7351 = vmatmul.mubr.msk.bf16.vlgmr.msra.gmra.mxu1 %vm119_vm2, %v4679_v57  ;;  %6986 = vmatprep.subr.msk.bf16.mxu0 %vm123_vm1, %v4918_v34 }
 0x20f   :  { %v2465_v37 = vpop.f32.mrf.mxu1  ;;  %v2559_v38 = vpop.f32.mrf.mxu0  ;;  %4963 = vmatpush1.bf16.msra.mxu0 %v4928_v36  ;;  %5021 = vmatprep.mubr.bf16.mxu1 %v7648_v0  ;;  %p7583_p13 = por %p7582_p12, %p7581_p11 }
 0x210   :  { %v2688_v33 = vadd.f32 %v2559_v38, %v2468_v55  ;;  %v4909_v39 = vpop.permute.xlu1 %4908  ;;  %v4907_v40 = vpop.permute.xlu0 %4906 }
 0x211   :  { %v7287_v41 = vpop.f32.mrf.mxu1  ;;  %v4919_v42 = vsel %vm4916_vm10, %v4905_v27, %v4907_v40  ;;  %v4920_v44 = vsel %vm4916_vm10, %v4907_v40, %v4909_v39  ;;  %v2561_v45 = vpop.f32.mrf.mxu0  ;;  %p7584_p0 = pnand %p7583_p13, %p7577_p10 }
 0x212   :  { %v4934_v46 = vsel %vm123_vm1, %v4919_v42, 0  ;;  %v2689_v43 = vadd.f32 %v2561_v45, %v8945_v59  ;;  %6987 = vmatmul.mubr.msk.bf16.vlgmr.msra.gmra.mxu0 %vm119_vm2, %v8971_v30  ;;  %6988 = vmatprep.subr.msk.bf16.mxu1 %vm123_vm1, %v4920_v44 }
 0x213   :  { %v2563_v47 = vpop.f32.mrf.mxu0  ;;  %v2600_v48 = vpop.f32.mrf.mxu1  ;;  %5004 = vmatpush1.bf16.msra.mxu1 %v4934_v46  ;;  %5062 = vmatprep.mubr.bf16.mxu0 %v7648_v0 }
 0x214   :  { %v8986_v4 = vadd.f32 %v2600_v48, %v2470_v3  ;;  %v4913_v49 = vpop.permute.xlu1 %4912  ;;  %v4911_v7 = vpop.permute.xlu0 %4910  ;;  %7354 = vmatprep.subr.bf16.mxu1 %v7664_v31 }
 0x215   :  { %v2602_v50 = vpop.f32.mrf.mxu1  ;;  %v4921_v51 = vsel %vm4916_vm10, %v4909_v39, %v4911_v7  ;;  %v4922_v5 = vsel %vm4916_vm10, %v4911_v7, %v4913_v49  ;;  %v2564_v53 = vpop.f32.mrf.mxu0 }
 0x216   :  { %v8991_v55 = vadd.f32 %v2602_v50, %v2471_v14  ;;  %v4940_v56 = vsel %vm123_vm1, %v4921_v51, 0  ;;  %6989 = vmatmul.mubr.msk.bf16.vlgmr.msra.gmra.mxu1 %vm119_vm2, %v8971_v30  ;;  %6990 = vmatprep.subr.msk.bf16.mxu0 %vm123_vm1, %v4922_v5 }
 0x217   :  { %v2604_v57 = vpop.f32.mrf.mxu1  ;;  %v2641_v58 = vpop.f32.mrf.mxu0  ;;  %5045 = vmatpush1.bf16.msra.mxu0 %v4940_v56  ;;  %7356 = vmatprep.mubr.msk.bf16.mxu1 %vm7665_vm3, %v7664_v31 }
 0x218   :  { %v8999_v52 = vadd.f32 %v2641_v58, %v2472_v20  ;;  %v5121_v59 = vpop.permute.xlu1 %5120  ;;  %v4915_v10 = vpop.permute.xlu0 %4914 }
 0x219   :  { %v2605_v60 = vpop.f32.mrf.mxu1  ;;  %v4923_v54 = vsel %vm4916_vm10, %v4913_v49, %v4915_v10  ;;  %v2643_v61 = vpop.f32.mrf.mxu0 }
 0x21a   :  { %v4946_v62 = vsel %vm123_vm1, %v4923_v54, 0  ;;  %v9003_v63 = vadd.f32 %v2643_v61, %v2473_v24  ;;  %6991 = vmatmul.mubr.msk.bf16.vlgmr.msra.gmra.mxu0 %vm119_vm2, %v8971_v30 }
 0x21b   :  { %v2645_v1 = vpop.f32.mrf.mxu0  ;;  %v2682_v2 = vpop.f32.mrf.mxu1  ;;  %7355 = vmatpush3.bf16.msra.mxu1 %v4946_v62  ;;  %5200 = vmatprep.mubr.bf16.mxu0 %v7648_v0 }
 0x21c   :  { %v9008_v13 = vadd.f32 %v2682_v2, %v2474_v29  ;;  %v5125_v3 = vpop.permute.xlu1 %5124  ;;  %v5123_v9 = vpop.permute.xlu0 %5122 }
 0x21d   :  { %v7292_v6 = vpop.f32.mrf.mxu1  ;;  %v5137_v16 = vsel %vm5136_vm11, %v5121_v59, %v5123_v9  ;;  %v5138_v17 = vsel %vm5136_vm11, %v5123_v9, %v5125_v3  ;;  %v2646_v18 = vpop.f32.mrf.mxu0 }
 0x21e   :  { %v5148_v15 = vsel %vm123_vm1, %v5137_v16, 0  ;;  %7357 = vmatmul.mubr.msk.bf16.vlgmr.msra.gmra.mxu1 %vm119_vm2, %v8971_v30  ;;  %6993 = vmatprep.subr.msk.bf16.mxu0 %vm123_vm1, %v5138_v17 }
 0x21f   :  { %v2685_v14 = vpop.f32.mrf.mxu1  ;;  %v2779_v11 = vpop.f32.mrf.mxu0  ;;  %5183 = vmatpush1.bf16.msra.mxu0 %v5148_v15  ;;  %5241 = vmatprep.mubr.bf16.mxu1 %v7648_v0 }
 0x220   :  { %v9017_v12 = vadd.f32 %v2779_v11, %v2688_v33  ;;  %v5127_v19 = vpop.permute.xlu1 %5126  ;;  %v5119_v20 = vpop.permute.xlu0 %5118 }
 0x221   :  { %v7293_v21 = vpop.f32.mrf.mxu1  ;;  %v2781_v8 = vpop.f32.mrf.mxu0  ;;  %v5139_v24 = vsel %vm5136_vm11, %v5125_v3, %v5127_v19 }
 0x222   :  { %v9022_v23 = vadd.f32 %v2781_v8, %v2689_v43  ;;  %6994 = vmatmul.mubr.msk.bf16.vlgmr.msra.gmra.mxu0 %vm119_vm2, %v5119_v20  ;;  %v5154_v27 = vsel %vm123_vm1, %v5139_v24, 0 }
 0x223   :  { %v2783_v25 = vpop.f32.mrf.mxu0  ;;  %5282 = vmatprep.mubr.bf16.mxu0 %v7648_v0 }
 0x224   :  { %v5131_v26 = vpop.permute.xlu1 %5130  ;;  %v5129_v28 = vpop.permute.xlu0 %5128 }
 0x225   :  { %v5140_v29 = vsel %vm5136_vm11, %v5127_v19, %v5129_v28  ;;  %v2784_v30 = vpop.f32.mrf.mxu0  ;;  %v5141_v32 = vsel %vm5136_vm11, %v5129_v28, %v5131_v26 }
 0x226   :  { %6995 = vmatprep.subr.msk.bf16.mxu1 %vm123_vm1, %v5140_v29  ;;  %v5160_v40 = vsel %vm123_vm1, %v5141_v32, 0 }
 0x227   :  { %v2820_v34 = vpop.f32.mrf.mxu1  ;;  %5224 = vmatpush1.bf16.msra.mxu1 %v5154_v27 }
 0x228   :  { %v2910_v35 = vadd.f32 %v2820_v34, %v8986_v4  ;;  %v5135_v36 = vpop.permute.xlu1 %5134  ;;  %v5133_v37 = vpop.permute.xlu0 %5132  ;;  %7360 = vmatprep.subr.bf16.mxu1 %v7664_v31 }
 0x229   :  { %v2822_v38 = vpop.f32.mrf.mxu1  ;;  %v5142_v33 = vsel %vm5136_vm11, %v5131_v26, %v5133_v37  ;;  %v5143_v39 = vsel %vm5136_vm11, %v5133_v37, %v5135_v36 }
 0x22a   :  { %v2911_v41 = vadd.f32 %v2822_v38, %v8991_v55  ;;  %v5166_v42 = vsel %vm123_vm1, %v5143_v39, 0  ;;  %6996 = vmatmul.mubr.msk.bf16.vlgmr.msra.gmra.mxu1 %vm119_vm2, %v5119_v20  ;;  %6997 = vmatprep.subr.msk.bf16.mxu0 %vm123_vm1, %v5142_v33 }
 0x22b   :  { %v2824_v44 = vpop.f32.mrf.mxu1  ;;  %v2861_v45 = vpop.f32.mrf.mxu0  ;;  %5265 = vmatpush1.bf16.msra.mxu0 %v5160_v40  ;;  %7361 = vmatpush3.bf16.msra.mxu1 %v5166_v42 }
 0x22c   :  { %v2912_v46 = vadd.f32 %v2861_v45, %v8999_v52  ;;  %v5343_v43 = vpop.permute.xlu1 %5342  ;;  %v5341_v47 = vpop.permute.xlu0 %5340  ;;  %7362 = vmatprep.mubr.msk.bf16.mxu1 %vm7665_vm3, %v7664_v31 }
 0x22d   :  { %v2825_v48 = vpop.f32.mrf.mxu1  ;;  %v2863_v4 = vpop.f32.mrf.mxu0  ;;  %v5357_v7 = vsel %vm5356_vm12, %v5341_v47, %v5343_v43 }
 0x22e   :  { %v2913_v49 = vadd.f32 %v2863_v4, %v9003_v63  ;;  %6998 = vmatmul.mubr.msk.bf16.vlgmr.msra.gmra.mxu0 %vm119_vm2, %v5119_v20  ;;  %v5368_v52 = vsel %vm123_vm1, %v5357_v7, 0 }
 0x22f   :  { %v2865_v50 = vpop.f32.mrf.mxu0  ;;  %v2902_v51 = vpop.f32.mrf.mxu1  ;;  %5420 = vmatprep.mubr.bf16.mxu0 %v7648_v0 }
 0x230   :  { %v2914_v5 = vadd.f32 %v2902_v51, %v9008_v13  ;;  %v9048_v53 = vpop.permute.xlu1 %5338  ;;  %v5345_v55 = vpop.permute.xlu0 %5344 }
 0x231   :  { %v7298_v56 = vpop.f32.mrf.mxu1  ;;  %v5358_v57 = vsel %vm5356_vm12, %v5343_v43, %v5345_v55  ;;  %v2866_v58 = vpop.f32.mrf.mxu0 }
 0x232   :  { %7363 = vmatmul.mubr.msk.bf16.vlgmr.msra.gmra.mxu1 %vm119_vm2, %v5119_v20  ;;  %7000 = vmatprep.subr.msk.bf16.mxu0 %vm123_vm1, %v5358_v57 }
 0x233   :  { %v2905_v59 = vpop.f32.mrf.mxu1  ;;  %v2999_v10 = vpop.f32.mrf.mxu0  ;;  %5403 = vmatpush1.bf16.msra.mxu0 %v5368_v52  ;;  %5461 = vmatprep.mubr.bf16.mxu1 %v7648_v0 }
 0x234   :  { %v3128_v60 = vadd.f32 %v2999_v10, %v9017_v12  ;;  %v5349_v54 = vpop.permute.xlu1 %5348  ;;  %v5347_v61 = vpop.permute.xlu0 %5346 }
 0x235   :  { %v7299_v62 = vpop.f32.mrf.mxu1  ;;  %v5359_v63 = vsel %vm5356_vm12, %v5345_v55, %v5347_v61  ;;  %v5360_v1 = vsel %vm5356_vm12, %v5347_v61, %v5349_v54  ;;  %v3001_v2 = vpop.f32.mrf.mxu0 }
 0x236   :  { %v5374_v13 = vsel %vm123_vm1, %v5359_v63, 0  ;;  %v3129_v3 = vadd.f32 %v3001_v2, %v9022_v23  ;;  %7001 = vmatmul.mubr.msk.bf16.vlgmr.msra.gmra.mxu0 %vm119_vm2, %v9048_v53  ;;  %7002 = vmatprep.subr.msk.bf16.mxu1 %vm123_vm1, %v5360_v1 }
 0x237   :  { %v3003_v9 = vpop.f32.mrf.mxu0  ;;  %v3040_v6 = vpop.f32.mrf.mxu1  ;;  %5444 = vmatpush1.bf16.msra.mxu1 %v5374_v13  ;;  %5502 = vmatprep.mubr.bf16.mxu0 %v7648_v0 }
 0x238   :  { %v9064_v16 = vadd.f32 %v3040_v6, %v2910_v35  ;;  %v5353_v17 = vpop.permute.xlu1 %5352  ;;  %v5351_v18 = vpop.permute.xlu0 %5350  ;;  %7366 = vmatprep.subr.bf16.mxu1 %v7664_v31 }
 0x239   :  { %v3042_v15 = vpop.f32.mrf.mxu1  ;;  %v5361_v14 = vsel %vm5356_vm12, %v5349_v54, %v5351_v18  ;;  %v5362_v11 = vsel %vm5356_vm12, %v5351_v18, %v5353_v17  ;;  %v3004_v12 = vpop.f32.mrf.mxu0 }
 0x23a   :  { %v9069_v19 = vadd.f32 %v3042_v15, %v2911_v41  ;;  %v5380_v20 = vsel %vm123_vm1, %v5361_v14, 0  ;;  %7003 = vmatmul.mubr.msk.bf16.vlgmr.msra.gmra.mxu1 %vm119_vm2, %v9048_v53  ;;  %7004 = vmatprep.subr.msk.bf16.mxu0 %vm123_vm1, %v5362_v11 }
 0x23b   :  { %v3044_v21 = vpop.f32.mrf.mxu1  ;;  %v3081_v8 = vpop.f32.mrf.mxu0  ;;  %5485 = vmatpush1.bf16.msra.mxu0 %v5380_v20  ;;  %7368 = vmatprep.mubr.msk.bf16.mxu1 %vm7665_vm3, %v7664_v31 }
 0x23c   :  { %v9077_v22 = vadd.f32 %v3081_v8, %v2912_v46  ;;  %v5561_v23 = vpop.permute.xlu1 %5560  ;;  %v5355_v24 = vpop.permute.xlu0 %5354 }
 0x23d   :  { %v3045_v25 = vpop.f32.mrf.mxu1  ;;  %v5363_v26 = vsel %vm5356_vm12, %v5353_v17, %v5355_v24  ;;  %v3083_v28 = vpop.f32.mrf.mxu0 }
 0x23e   :  { %v5386_v29 = vsel %vm123_vm1, %v5363_v26, 0  ;;  %v9081_v30 = vadd.f32 %v3083_v28, %v2913_v49  ;;  %7005 = vmatmul.mubr.msk.bf16.vlgmr.msra.gmra.mxu0 %vm119_vm2, %v9048_v53 }
 0x23f   :  { %v3085_v27 = vpop.f32.mrf.mxu0  ;;  %v3122_v32 = vpop.f32.mrf.mxu1  ;;  %7367 = vmatpush3.bf16.msra.mxu1 %v5386_v29  ;;  %5640 = vmatprep.mubr.bf16.mxu0 %v7648_v0 }
 0x240   :  { %v3134_v34 = vadd.f32 %v3122_v32, %v2914_v5  ;;  %v5565_v35 = vpop.permute.xlu1 %5564  ;;  %v5563_v36 = vpop.permute.xlu0 %5562 }
 0x241   :  { %v7304_v37 = vpop.f32.mrf.mxu1  ;;  %v5577_v38 = vsel %vm5576_vm13, %v5561_v23, %v5563_v36  ;;  %v5578_v33 = vsel %vm5576_vm13, %v5563_v36, %v5565_v35  ;;  %v3086_v39 = vpop.f32.mrf.mxu0 }
 0x242   :  { %v5588_v40 = vsel %vm123_vm1, %v5577_v38, 0  ;;  %7369 = vmatmul.mubr.msk.bf16.vlgmr.msra.gmra.mxu1 %vm119_vm2, %v9048_v53  ;;  %7007 = vmatprep.subr.msk.bf16.mxu0 %vm123_vm1, %v5578_v33 }
 0x243   :  { %v3125_v41 = vpop.f32.mrf.mxu1  ;;  %v3219_v42 = vpop.f32.mrf.mxu0  ;;  %5623 = vmatpush1.bf16.msra.mxu0 %v5588_v40  ;;  %5681 = vmatprep.mubr.bf16.mxu1 %v7648_v0 }
 0x244   :  { %v3348_v44 = vadd.f32 %v3219_v42, %v3128_v60  ;;  %v5567_v45 = vpop.permute.xlu1 %5566  ;;  %v5559_v46 = vpop.permute.xlu0 %5558 }
 0x245   :  { %v7305_v43 = vpop.f32.mrf.mxu1  ;;  %v3221_v47 = vpop.f32.mrf.mxu0  ;;  %v5579_v4 = vsel %vm5576_vm13, %v5565_v35, %v5567_v45 }
 0x246   :  { %v9093_v48 = vadd.f32 %v3221_v47, %v3129_v3  ;;  %7008 = vmatmul.mubr.msk.bf16.vlgmr.msra.gmra.mxu0 %vm119_vm2, %v5559_v46  ;;  %v5594_v53 = vsel %vm123_vm1, %v5579_v4, 0 }
 0x247   :  { %v3223_v49 = vpop.f32.mrf.mxu0  ;;  %5722 = vmatprep.mubr.bf16.mxu0 %v7648_v0 }
 0x248   :  { %v5571_v7 = vpop.permute.xlu1 %5570  ;;  %v5569_v50 = vpop.permute.xlu0 %5568 }
 0x249   :  { %v5580_v51 = vsel %vm5576_vm13, %v5567_v45, %v5569_v50  ;;  %v3224_v5 = vpop.f32.mrf.mxu0  ;;  %v5581_v55 = vsel %vm5576_vm13, %v5569_v50, %v5571_v7 }
 0x24a   :  { %7009 = vmatprep.subr.msk.bf16.mxu1 %vm123_vm1, %v5580_v51  ;;  %v5600_v54 = vsel %vm123_vm1, %v5581_v55, 0 }
 0x24b   :  { %v3260_v56 = vpop.f32.mrf.mxu1  ;;  %5664 = vmatpush1.bf16.msra.mxu1 %v5594_v53 }
 0x24c   :  { %v3350_v57 = vadd.f32 %v3260_v56, %v9064_v16  ;;  %v5575_v58 = vpop.permute.xlu1 %5574  ;;  %v5573_v52 = vpop.permute.xlu0 %5572  ;;  %7372 = vmatprep.subr.bf16.mxu1 %v7664_v31 }
 0x24d   :  { %v3262_v59 = vpop.f32.mrf.mxu1  ;;  %v5582_v10 = vsel %vm5576_vm13, %v5571_v7, %v5573_v52  ;;  %v5583_v60 = vsel %vm5576_vm13, %v5573_v52, %v5575_v58 }
 0x24e   :  { %v3351_v61 = vadd.f32 %v3262_v59, %v9069_v19  ;;  %v5606_v62 = vsel %vm123_vm1, %v5583_v60, 0  ;;  %7010 = vmatmul.mubr.msk.bf16.vlgmr.msra.gmra.mxu1 %vm119_vm2, %v5559_v46  ;;  %7011 = vmatprep.subr.msk.bf16.mxu0 %vm123_vm1, %v5582_v10 }
 0x24f   :  { %v3264_v63 = vpop.f32.mrf.mxu1  ;;  %v3301_v1 = vpop.f32.mrf.mxu0  ;;  %5705 = vmatpush1.bf16.msra.mxu0 %v5600_v54  ;;  %7373 = vmatpush3.bf16.msra.mxu1 %v5606_v62 }
 0x250   :  { %v3352_v2 = vadd.f32 %v3301_v1, %v9077_v22  ;;  %v5783_v13 = vpop.permute.xlu1 %5782  ;;  %v5781_v3 = vpop.permute.xlu0 %5780  ;;  %7374 = vmatprep.mubr.msk.bf16.mxu1 %vm7665_vm3, %v7664_v31 }
 0x251   :  { %v3265_v9 = vpop.f32.mrf.mxu1  ;;  %v3303_v6 = vpop.f32.mrf.mxu0  ;;  %v5797_v17 = vsel %vm5796_vm14, %v5781_v3, %v5783_v13 }
 0x252   :  { %v3353_v16 = vadd.f32 %v3303_v6, %v9081_v30  ;;  %7012 = vmatmul.mubr.msk.bf16.vlgmr.msra.gmra.mxu0 %vm119_vm2, %v5559_v46  ;;  %v5808_v8 = vsel %vm123_vm1, %v5797_v17, 0 }
 0x253   :  { %v3305_v18 = vpop.f32.mrf.mxu0  ;;  %v3342_v15 = vpop.f32.mrf.mxu1  ;;  %5860 = vmatprep.mubr.bf16.mxu0 %v7648_v0 }
 0x254   :  { %v3354_v14 = vadd.f32 %v3342_v15, %v3134_v34  ;;  %v5779_v11 = vpop.permute.xlu1 %5778  ;;  %v5785_v12 = vpop.permute.xlu0 %5784 }
 0x255   :  { %v7310_v19 = vpop.f32.mrf.mxu1  ;;  %v5798_v20 = vsel %vm5796_vm14, %v5783_v13, %v5785_v12  ;;  %v3306_v21 = vpop.f32.mrf.mxu0 }
 0x256   :  { %7375 = vmatmul.mubr.msk.bf16.vlgmr.msra.gmra.mxu1 %vm119_vm2, %v5559_v46  ;;  %7014 = vmatprep.subr.msk.bf16.mxu0 %vm123_vm1, %v5798_v20 }
 0x257   :  { %v3345_v22 = vpop.f32.mrf.mxu1  ;;  %v3439_v23 = vpop.f32.mrf.mxu0  ;;  %5843 = vmatpush1.bf16.msra.mxu0 %v5808_v8  ;;  %5901 = vmatprep.mubr.bf16.mxu1 %v7648_v0 }
 0x258   :  { %v3568_v24 = vadd.f32 %v3439_v23, %v3348_v44  ;;  %v5789_v25 = vpop.permute.xlu1 %5788  ;;  %v5787_v26 = vpop.permute.xlu0 %5786 }
 0x259   :  { %v7311_v28 = vpop.f32.mrf.mxu1  ;;  %v5799_v29 = vsel %vm5796_vm14, %v5785_v12, %v5787_v26  ;;  %v5800_v30 = vsel %vm5796_vm14, %v5787_v26, %v5789_v25  ;;  %v3441_v27 = vpop.f32.mrf.mxu0 }
 0x25a   :  { %v5814_v32 = vsel %vm123_vm1, %v5799_v29, 0  ;;  %v3569_v34 = vadd.f32 %v3441_v27, %v9093_v48  ;;  %7015 = vmatmul.mubr.msk.bf16.vlgmr.msra.gmra.mxu0 %vm119_vm2, %v5779_v11  ;;  %7016 = vmatprep.subr.msk.bf16.mxu1 %vm123_vm1, %v5800_v30 }
 0x25b   :  { %v3443_v35 = vpop.f32.mrf.mxu0  ;;  %v3480_v36 = vpop.f32.mrf.mxu1  ;;  %5884 = vmatpush1.bf16.msra.mxu1 %v5814_v32  ;;  %5942 = vmatprep.mubr.bf16.mxu0 %v7648_v0 }
 0x25c   :  { %v3570_v37 = vadd.f32 %v3480_v36, %v3350_v57  ;;  %v5793_v38 = vpop.permute.xlu1 %5792  ;;  %v5791_v33 = vpop.permute.xlu0 %5790  ;;  %7378 = vmatprep.subr.bf16.mxu1 %v7664_v31  ;;  %v7464_v35 = vld [vmem:[#allocation5 + $0x78] sm:$0xff]  }
 0x25d   :  { %v3482_v39 = vpop.f32.mrf.mxu1  ;;  %v5801_v40 = vsel %vm5796_vm14, %v5789_v25, %v5791_v33  ;;  %v5802_v41 = vsel %vm5796_vm14, %v5791_v33, %v5793_v38  ;;  %v3444_v42 = vpop.f32.mrf.mxu0  ;;  %v7465_v33 = vld [vmem:[#allocation5 + $0x38] sm:$0xff]  }
 0x25e   :  { %v3571_v44 = vadd.f32 %v3482_v39, %v3351_v61  ;;  %v5820_v45 = vsel %vm123_vm1, %v5801_v40, 0  ;;  %7017 = vmatmul.mubr.msk.bf16.vlgmr.msra.gmra.mxu1 %vm119_vm2, %v5779_v11  ;;  %7018 = vmatprep.subr.msk.bf16.mxu0 %vm123_vm1, %v5802_v41 }
 0x25f   :  { %v3484_v46 = vpop.f32.mrf.mxu1  ;;  %v3521_v0 = vpop.f32.mrf.mxu0  ;;  %5925 = vmatpush1.bf16.msra.mxu0 %v5820_v45  ;;  %7380 = vmatprep.mubr.msk.bf16.mxu1 %vm7665_vm3, %v7664_v31  ;;  %v7466_v45 = vld [vmem:[#allocation5 + $0x70] sm:$0xff]  }
 0x260   :  { %v3572_v43 = vadd.f32 %v3521_v0, %v3352_v2  ;;  %v5795_v47 = vpop.permute.xlu0 %5794  ;;  %7147 = vmatprep.subr.bf16.mxu0 %v7464_v35  ;;  %v7467_v46 = vld [vmem:[#allocation5 + $0xf8] sm:$0xff]   ;;  %v7468_v0 = vld [vmem:[#allocation5 + $0x30] sm:$0xff]  }
 0x261   :  { %v3485_v48 = vpop.f32.mrf.mxu1  ;;  %v5803_v4 = vsel %vm5796_vm14, %v5793_v38, %v5795_v47  ;;  %v3523_v49 = vpop.f32.mrf.mxu0 }
 0x262   :  { %v5826_v7 = vsel %vm123_vm1, %v5803_v4, 0  ;;  %v3573_v50 = vadd.f32 %v3523_v49, %v3353_v16  ;;  %7019 = vmatmul.mubr.msk.bf16.vlgmr.msra.gmra.mxu0 %vm119_vm2, %v5779_v11  ;;  %v7470_v49 = vld [vmem:[#allocation5 + $0x68] sm:$0xff]  }
 0x263   :  { %v3525_v51 = vpop.f32.mrf.mxu0  ;;  %v3562_v5 = vpop.f32.mrf.mxu1  ;;  %7379 = vmatpush3.bf16.msra.mxu1 %v5826_v7  ;;  %7148 = vmatpush3.bf16.msra.mxu0 %v7465_v33  ;;  %v7471_v7 = vld [vmem:[#allocation5 + $0xf0] sm:$0xff]   ;;  %v7492_v33 = vld [vmem:[#allocation5] sm:$0xff]  }
 0x264   :  { %v3574_v53 = vadd.f32 %v3562_v5, %v3354_v14  ;;  %7149 = vmatprep.subr.bf16.mxu0 %v7466_v45  ;;  %7169 = vmatprep.subr.bf16.mxu1 %v7467_v46  ;;  %v7495_v45 = vld [vmem:[#allocation5 + $0x178] sm:$0xff]  }
 0x265   :  { %v3526_v55 = vpop.f32.mrf.mxu0  ;;  %v7316_v56 = vpop.f32.mrf.mxu1 }
 0x266   :  { %7381 = vmatmul.mubr.msk.bf16.vlgmr.msra.gmra.mxu1 %vm119_vm2, %v5779_v11  ;;  %v7473_v55 = vld [vmem:[#allocation5 + $0xb0] sm:$0xff]  }
 0x267   :  { %v3565_v57 = vpop.f32.mrf.mxu1  ;;  %v3659_v58 = vpop.f32.mrf.mxu0  ;;  %7150 = vmatpush3.bf16.msra.mxu0 %v7468_v0  ;;  %v7496_v0 = vld [vmem:[#allocation5 + $0x80] sm:$0xff]  }
 0x268   :  { %v3788_v52 = vadd.f32 %v3659_v58, %v3568_v24  ;;  %7151 = vmatprep.subr.bf16.mxu0 %v7470_v49 }
 0x269   :  { %v7317_v59 = vpop.f32.mrf.mxu1  ;;  %v3661_v10 = vpop.f32.mrf.mxu0 }
 0x26a   :  { %v3789_v60 = vadd.f32 %v3661_v10, %v3569_v34  ;;  %v7474_v10 = vld [vmem:[#allocation5 + $0x60] sm:$0xff]  }
 0x26b   :  { %v3663_v54 = vpop.f32.mrf.mxu0  ;;  %v3700_v61 = vpop.f32.mrf.mxu1 }
 0x26c   :  { %v3790_v62 = vadd.f32 %v3700_v61, %v3570_v37  ;;  %v7476_v61 = vld [vmem:[#allocation5 + $0x20] sm:$0xff]  }
 0x26d   :  { %v3664_v63 = vpop.f32.mrf.mxu0  ;;  %v3702_v1 = vpop.f32.mrf.mxu1 }
 0x26e   :  { %v3791_v2 = vadd.f32 %v3702_v1, %v3571_v44 }
 0x26f   :  { %v3704_v13 = vpop.f32.mrf.mxu1  ;;  %v3741_v3 = vpop.f32.mrf.mxu0 }
 0x270   :  { %v3792_v9 = vadd.f32 %v3741_v3, %v3572_v43  ;;  %v7469_v43 = vld [vmem:[#allocation5 + $0xb8] sm:$0xff]  }
 0x271   :  { %v3705_v6 = vpop.f32.mrf.mxu1  ;;  %v3743_v16 = vpop.f32.mrf.mxu0  ;;  %7170 = vmatpush3.bf16.msra.mxu1 %v7469_v43 }
 0x272   :  { %v3793_v17 = vadd.f32 %v3743_v16, %v3573_v50  ;;  %7171 = vmatprep.subr.bf16.mxu1 %v7471_v7  ;;  %v7479_v6 = vld [vmem:[#allocation5 + $0xe0] sm:$0xff]  }
 0x273   :  { %v3745_v18 = vpop.f32.mrf.mxu0  ;;  %v3782_v15 = vpop.f32.mrf.mxu1 }
 0x274   :  { %v3794_v14 = vadd.f32 %v3782_v15, %v3574_v53  ;;  %v7472_v53 = vld [vmem:[#allocation5 + $0x28] sm:$0xff]   ;;  %v7481_v18 = vld [vmem:[#allocation5 + $0xa0] sm:$0xff]  }
 0x275   :  { %v3746_v11 = vpop.f32.mrf.mxu0  ;;  %v7322_v12 = vpop.f32.mrf.mxu1  ;;  %7152 = vmatpush3.bf16.msra.mxu0 %v7472_v53  ;;  %7172 = vmatpush3.bf16.msra.mxu1 %v7473_v55 }
 0x276   :  { %7153 = vmatprep.subr.bf16.mxu0 %v7474_v10  ;;  %v7482_v12 = vld [vmem:[#allocation5 + $0x50] sm:$0xff]  }
 0x277   :  { %v3879_v19 = vpop.f32.mrf.mxu0  ;;  %v3785_v20 = vpop.f32.mrf.mxu1 }
 0x278   :  { %v4008_v21 = vadd.f32 %v3879_v19, %v3788_v52  ;;  %v7483_v19 = vld [vmem:[#allocation5 + $0xd8] sm:$0xff]  }
 0x279   :  { %v3881_v8 = vpop.f32.mrf.mxu0  ;;  %v7323_v22 = vpop.f32.mrf.mxu1  ;;  %7154 = vmatpush3.bf16.msra.mxu0 %v7476_v61 }
 0x27a   :  { %v4009_v23 = vadd.f32 %v3881_v8, %v3789_v60  ;;  %v7475_v60 = vld [vmem:[#allocation5 + $0xe8] sm:$0xff]   ;;  %v7484_v8 = vld [vmem:[#allocation5 + $0x10] sm:$0xff]   ;;  %v7485_v22 = vld [vmem:[#allocation5 + $0x98] sm:$0xff]  }
 0x27b   :  { %v3883_v24 = vpop.f32.mrf.mxu0  ;;  %7173 = vmatprep.subr.bf16.mxu1 %v7475_v60 }
 0x27d   :  { %v3884_v25 = vpop.f32.mrf.mxu0 }
 0x27f   :  { %v3920_v26 = vpop.f32.mrf.mxu1 }
 0x280   :  { %v4010_v28 = vadd.f32 %v3920_v26, %v3790_v62  ;;  %v7477_v62 = vld [vmem:[#allocation5 + $0xa8] sm:$0xff]  }
 0x281   :  { %v3922_v29 = vpop.f32.mrf.mxu1  ;;  %7174 = vmatpush3.bf16.msra.mxu1 %v7477_v62 }
 0x282   :  { %v4011_v30 = vadd.f32 %v3922_v29, %v3791_v2  ;;  %7175 = vmatprep.subr.bf16.mxu1 %v7479_v6  ;;  %v7486_v29 = vld [vmem:[#allocation5 + $0x48] sm:$0xff]  }
 0x283   :  { %v3924_v27 = vpop.f32.mrf.mxu1  ;;  %v3961_v32 = vpop.f32.mrf.mxu0 }
 0x284   :  { %v4012_v34 = vadd.f32 %v3961_v32, %v3792_v9  ;;  %v7478_v9 = vld [vmem:[#allocation5 + $0x58] sm:$0xff]   ;;  %v7488_v32 = vld [vmem:[#allocation5 + $0x8] sm:$0xff]  }
 0x285   :  { %v3925_v36 = vpop.f32.mrf.mxu1  ;;  %v3963_v37 = vpop.f32.mrf.mxu0  ;;  %7155 = vmatprep.subr.bf16.mxu0 %v7478_v9  ;;  %7176 = vmatpush3.bf16.msra.mxu1 %v7481_v18 }
 0x286   :  { %v4013_v38 = vadd.f32 %v3963_v37, %v3793_v17  ;;  %v7480_v17 = vld [vmem:[#allocation5 + $0x18] sm:$0xff]   ;;  %7177 = vmatprep.subr.bf16.mxu1 %v7483_v19  ;;  %v7490_v37 = vld [vmem:[#allocation5 + $0x40] sm:$0xff]  }
 0x287   :  { %v3965_v39 = vpop.f32.mrf.mxu0  ;;  %v4002_v40 = vpop.f32.mrf.mxu1  ;;  %7156 = vmatpush3.bf16.msra.mxu0 %v7480_v17 }
 0x288   :  { %v4014_v41 = vadd.f32 %v4002_v40, %v3794_v14  ;;  %7157 = vmatprep.subr.bf16.mxu0 %v7482_v12  ;;  %v7493_v39 = vld [vmem:[#allocation5 + $0x88] sm:$0xff]  }
 0x289   :  { %v3966_v42 = vpop.f32.mrf.mxu0  ;;  %v7328_v44 = vpop.f32.mrf.mxu1  ;;  %7178 = vmatpush3.bf16.msra.mxu1 %v7485_v22 }
 0x28a   :  { %v7494_v44 = vld [vmem:[#allocation5 + $0xc0] sm:$0xff]  }
 0x28b   :  { %v4005_v47 = vpop.f32.mrf.mxu1  ;;  %v4102_v48 = vpop.f32.mrf.mxu0  ;;  %7158 = vmatpush3.bf16.msra.mxu0 %v7484_v8 }
 0x28c   :  { %v4231_v4 = vadd.f32 %v4102_v48, %v4008_v21  ;;  %7159 = vmatprep.subr.bf16.mxu0 %v7486_v29 }
 0x28d   :  { %v7329_v50 = vpop.f32.mrf.mxu1  ;;  %v4104_v51 = vpop.f32.mrf.mxu0 }
 0x28e   :  { %v4232_v5 = vadd.f32 %v4104_v51, %v4009_v23 }
 0x28f   :  { %v4106_v56 = vpop.f32.mrf.mxu0  ;;  %v4143_v57 = vpop.f32.mrf.mxu1  ;;  %7160 = vmatpush3.bf16.msra.mxu0 %v7488_v32 }
 0x290   :  { %v9142_v58 = vadd.f32 %v4143_v57, %v4010_v28  ;;  %7161 = vmatprep.subr.bf16.mxu0 %v7490_v37 }
 0x291   :  { %v4107_v52 = vpop.f32.mrf.mxu0  ;;  %v4145_v59 = vpop.f32.mrf.mxu1 }
 0x292   :  { %v9144_v54 = vadd.f32 %v4145_v59, %v4011_v30  ;;  %v7487_v30 = vld [vmem:[#allocation5 + $0xd0] sm:$0xff]  }
 0x293   :  { %v4147_v63 = vpop.f32.mrf.mxu1  ;;  %v4184_v1 = vpop.f32.mrf.mxu0  ;;  %7179 = vmatprep.subr.bf16.mxu1 %v7487_v30  ;;  %7162 = vmatpush3.bf16.msra.mxu0 %v7492_v33 }
 0x294   :  { %v4235_v2 = vadd.f32 %v4184_v1, %v4012_v34  ;;  %v7489_v34 = vld [vmem:[#allocation5 + $0x90] sm:$0xff]   ;;  %7191 = vmatprep.subr.bf16.mxu0 %v7495_v45 }
 0x295   :  { %v4148_v13 = vpop.f32.mrf.mxu1  ;;  %v4186_v3 = vpop.f32.mrf.mxu0  ;;  %7180 = vmatpush3.bf16.msra.mxu1 %v7489_v34 }
 0x296   :  { %v4236_v16 = vadd.f32 %v4186_v3, %v4013_v38  ;;  %v7491_v38 = vld [vmem:[#allocation5 + $0xc8] sm:$0xff]  }
 0x297   :  { %v4188_v15 = vpop.f32.mrf.mxu0  ;;  %v4225_v14 = vpop.f32.mrf.mxu1  ;;  %7181 = vmatprep.subr.bf16.mxu1 %v7491_v38 }
 0x298   :  { %v4237_v11 = vadd.f32 %v4225_v14, %v4014_v41 }
 0x299   :  { %v4189_v20 = vpop.f32.mrf.mxu0  ;;  %v7334_v21 = vpop.f32.mrf.mxu1  ;;  %7182 = vmatpush3.bf16.msra.mxu1 %v7493_v39 }
 0x29a   :  { %7183 = vmatprep.subr.bf16.mxu1 %v7494_v44 }
 0x29b   :  { %v4228_v23 = vpop.f32.mrf.mxu1  ;;  %v4322_v24 = vpop.f32.mrf.mxu0 }
 0x29c   :  { %v4451_v25 = vadd.f32 %v4322_v24, %v4231_v4 }
 0x29d   :  { %v7335_v26 = vpop.f32.mrf.mxu1  ;;  %v4324_v28 = vpop.f32.mrf.mxu0  ;;  %7184 = vmatpush3.bf16.msra.mxu1 %v7496_v0 }
 0x29e   :  { %v4452_v27 = vadd.f32 %v4324_v28, %v4232_v5  ;;  %7384 = vmatprep.subr.bf16.mxu1 %v7664_v31 }
 0x29f   :  { %v4326_v35 = vpop.f32.mrf.mxu0 }
 0x2a1   :  { %v4327_v36 = vpop.f32.mrf.mxu0 }
 0x2a3   :  { %v4363_v40 = vpop.f32.mrf.mxu1 }
 0x2a4   :  { %v4453_v41 = vadd.f32 %v4363_v40, %v9142_v58 }
 0x2a5   :  { %v4365_v42 = vpop.f32.mrf.mxu1 }
 0x2a6   :  { %v4454_v46 = vadd.f32 %v4365_v42, %v9144_v54 }
 0x2a7   :  { %v4367_v43 = vpop.f32.mrf.mxu1  ;;  %v4404_v47 = vpop.f32.mrf.mxu0 }
 0x2a8   :  { %v4455_v48 = vadd.f32 %v4404_v47, %v4235_v2 }
 0x2a9   :  { %v4368_v4 = vpop.f32.mrf.mxu1  ;;  %v4406_v49 = vpop.f32.mrf.mxu0 }
 0x2aa   :  { %v4456_v7 = vadd.f32 %v4406_v49, %v4236_v16 }
 0x2ab   :  { %v4408_v50 = vpop.f32.mrf.mxu0  ;;  %v4445_v51 = vpop.f32.mrf.mxu1 }
 0x2ac   :  { %v4457_v5 = vadd.f32 %v4445_v51, %v4237_v11 }
 0x2ad   :  { %v4409_v53 = vpop.f32.mrf.mxu0  ;;  %v7340_v55 = vpop.f32.mrf.mxu1 }
 0x2af   :  { %v4448_v56 = vpop.f32.mrf.mxu1  ;;  %v4542_v57 = vpop.f32.mrf.mxu0 }
 0x2b0   :  { %v4671_v58 = vadd.f32 %v4542_v57, %v4451_v25 }
 0x2b1   :  { %v7341_v52 = vpop.f32.mrf.mxu1  ;;  %v4544_v59 = vpop.f32.mrf.mxu0 }
 0x2b2   :  { %v4672_v10 = vadd.f32 %v4544_v59, %v4452_v27 }
 0x2b3   :  { %v4546_v60 = vpop.f32.mrf.mxu0  ;;  %v4583_v54 = vpop.f32.mrf.mxu1 }
 0x2b4   :  { %v4673_v61 = vadd.f32 %v4583_v54, %v4453_v41 }
 0x2b5   :  { %v4547_v62 = vpop.f32.mrf.mxu0  ;;  %v4585_v63 = vpop.f32.mrf.mxu1 }
 0x2b6   :  { %v4674_v1 = vadd.f32 %v4585_v63, %v4454_v46 }
 0x2b7   :  { %v4587_v2 = vpop.f32.mrf.mxu1  ;;  %v4624_v13 = vpop.f32.mrf.mxu0 }
 0x2b8   :  { %v4675_v3 = vadd.f32 %v4624_v13, %v4455_v48 }
 0x2b9   :  { %v4588_v9 = vpop.f32.mrf.mxu1  ;;  %v4626_v6 = vpop.f32.mrf.mxu0 }
 0x2ba   :  { %v4676_v16 = vadd.f32 %v4626_v6, %v4456_v7 }
 0x2bb   :  { %v4628_v17 = vpop.f32.mrf.mxu0  ;;  %v4665_v18 = vpop.f32.mrf.mxu1 }
 0x2bc   :  { %v4677_v15 = vadd.f32 %v4665_v18, %v4457_v5 }
 0x2bd   :  { %v4629_v14 = vpop.f32.mrf.mxu0  ;;  %v7346_v11 = vpop.f32.mrf.mxu1 }
 0x2bf   :  { %v4668_v12 = vpop.f32.mrf.mxu1  ;;  %v4762_v19 = vpop.f32.mrf.mxu0 }
 0x2c0   :  { %v4891_v20 = vadd.f32 %v4762_v19, %v4671_v58 }
 0x2c1   :  { %v7347_v21 = vpop.f32.mrf.mxu1  ;;  %v4764_v8 = vpop.f32.mrf.mxu0 }
 0x2c2   :  { %v4892_v22 = vadd.f32 %v4764_v8, %v4672_v10 }
 0x2c3   :  { %v4766_v23 = vpop.f32.mrf.mxu0 }
 0x2c5   :  { %v4767_v24 = vpop.f32.mrf.mxu0 }
 0x2c6   :  { %v4803_v25 = vpop.f32.mrf.mxu1 }
 0x2c7   :  { %v4893_v26 = vadd.f32 %v4803_v25, %v4673_v61 }
 0x2c8   :  { %v4805_v28 = vpop.f32.mrf.mxu1 }
 0x2c9   :  { %v4894_v29 = vadd.f32 %v4805_v28, %v4674_v1 }
 0x2ca   :  { %v4807_v30 = vpop.f32.mrf.mxu1  ;;  %v4844_v27 = vpop.f32.mrf.mxu0 }
 0x2cb   :  { %v4895_v32 = vadd.f32 %v4844_v27, %v4675_v3 }
 0x2cc   :  { %v4808_v34 = vpop.f32.mrf.mxu1  ;;  %v4846_v35 = vpop.f32.mrf.mxu0 }
 0x2cd   :  { %v4896_v36 = vadd.f32 %v4846_v35, %v4676_v16 }
 0x2ce   :  { %v4848_v37 = vpop.f32.mrf.mxu0  ;;  %v4885_v38 = vpop.f32.mrf.mxu1 }
 0x2cf   :  { %v4897_v33 = vadd.f32 %v4885_v38, %v4677_v15 }
 0x2d0   :  { %v4849_v39 = vpop.f32.mrf.mxu0  ;;  %v7352_v40 = vpop.f32.mrf.mxu1 }
 0x2d2   :  { %v4888_v41 = vpop.f32.mrf.mxu1  ;;  %v4982_v42 = vpop.f32.mrf.mxu0 }
 0x2d3   :  { %v9149_v44 = vadd.f32 %v4982_v42, %v4891_v20 }
 0x2d4   :  { %v7353_v45 = vpop.f32.mrf.mxu1  ;;  %v4984_v46 = vpop.f32.mrf.mxu0 }
 0x2d5   :  { %v9151_v0 = vadd.f32 %v4984_v46, %v4892_v22 }
 0x2d6   :  { %v4986_v43 = vpop.f32.mrf.mxu0  ;;  %v5023_v47 = vpop.f32.mrf.mxu1 }
 0x2d7   :  { %v9153_v48 = vadd.f32 %v5023_v47, %v4893_v26 }
 0x2d8   :  { %v4987_v4 = vpop.f32.mrf.mxu0  ;;  %v5025_v49 = vpop.f32.mrf.mxu1 }
 0x2d9   :  { %v9155_v7 = vadd.f32 %v5025_v49, %v4894_v29 }
 0x2da   :  { %v5027_v50 = vpop.f32.mrf.mxu1  ;;  %v5064_v51 = vpop.f32.mrf.mxu0 }
 0x2db   :  { %v9157_v5 = vadd.f32 %v5064_v51, %v4895_v32 }
 0x2dc   :  { %v5028_v53 = vpop.f32.mrf.mxu1  ;;  %v5066_v55 = vpop.f32.mrf.mxu0 }
 0x2dd   :  { %v9159_v56 = vadd.f32 %v5066_v55, %v4896_v36 }
 0x2de   :  { %v5068_v57 = vpop.f32.mrf.mxu0  ;;  %v5105_v58 = vpop.f32.mrf.mxu1 }
 0x2df   :  { %v9161_v52 = vadd.f32 %v5105_v58, %v4897_v33 }
 0x2e0   :  { %v5069_v59 = vpop.f32.mrf.mxu0  ;;  %v7358_v10 = vpop.f32.mrf.mxu1 }
 0x2e1   :  { %v9166_v59 = vpop.permute.xlu1 %6001 }
 0x2e2   :  { %v5108_v60 = vpop.f32.mrf.mxu1  ;;  %v5202_v54 = vpop.f32.mrf.mxu0 }
 0x2e3   :  { %v5331_v43 = vadd.f32 %v5202_v54, %v9149_v44 }
 0x2e4   :  { %v7359_v61 = vpop.f32.mrf.mxu1  ;;  %v5204_v62 = vpop.f32.mrf.mxu0 }
 0x2e5   :  { %v5332_v49 = vadd.f32 %v5204_v62, %v9151_v0 }
 0x2e6   :  { %v5206_v63 = vpop.f32.mrf.mxu0 }
 0x2e8   :  { %v5207_v1 = vpop.f32.mrf.mxu0 }
 0x2ea   :  { %v5243_v2 = vpop.f32.mrf.mxu1 }
 0x2eb   :  { %v5333_v55 = vadd.f32 %v5243_v2, %v9153_v48 }
 0x2ec   :  { %v5245_v13 = vpop.f32.mrf.mxu1 }
 0x2ed   :  { %v5334_v61 = vadd.f32 %v5245_v13, %v9155_v7 }
 0x2ee   :  { %v5247_v3 = vpop.f32.mrf.mxu1  ;;  %v5284_v9 = vpop.f32.mrf.mxu0 }
 0x2ef   :  { %v5335_v48 = vadd.f32 %v5284_v9, %v9157_v5 }
 0x2f0   :  { %v5248_v6 = vpop.f32.mrf.mxu1  ;;  %v5286_v16 = vpop.f32.mrf.mxu0 }
 0x2f1   :  { %v5336_v2 = vadd.f32 %v5286_v16, %v9159_v56 }
 0x2f2   :  { %v5288_v17 = vpop.f32.mrf.mxu0  ;;  %v5325_v18 = vpop.f32.mrf.mxu1 }
 0x2f4   :  { %v5289_v15 = vpop.f32.mrf.mxu0  ;;  %v7364_v14 = vpop.f32.mrf.mxu1 }
 0x2f6   :  { %v5328_v11 = vpop.f32.mrf.mxu1  ;;  %v5422_v12 = vpop.f32.mrf.mxu0 }
 0x2f7   :  { %v5551_v50 = vadd.f32 %v5422_v12, %v5331_v43 }
 0x2f8   :  { %v7365_v19 = vpop.f32.mrf.mxu1  ;;  %v5424_v20 = vpop.f32.mrf.mxu0 }
 0x2f9   :  { %v5552_v57 = vadd.f32 %v5424_v20, %v5332_v49  ;;  %v5337_v19 = vadd.f32 %v5325_v18, %v9161_v52 }
 0x2fa   :  { %v5426_v21 = vpop.f32.mrf.mxu0  ;;  %v5463_v8 = vpop.f32.mrf.mxu1 }
 0x2fb   :  { %v5553_v63 = vadd.f32 %v5463_v8, %v5333_v55 }
 0x2fc   :  { %v5427_v22 = vpop.f32.mrf.mxu0  ;;  %v5465_v23 = vpop.f32.mrf.mxu1 }
 0x2fd   :  { %v5554_v6 = vadd.f32 %v5465_v23, %v5334_v61 }
 0x2fe   :  { %v5467_v24 = vpop.f32.mrf.mxu1  ;;  %v5504_v25 = vpop.f32.mrf.mxu0 }
 0x2ff   :  { %v5555_v20 = vadd.f32 %v5504_v25, %v5335_v48 }
 0x300   :  { %v5468_v26 = vpop.f32.mrf.mxu1  ;;  %v5506_v28 = vpop.f32.mrf.mxu0 }
 0x301   :  { %v5556_v21 = vadd.f32 %v5506_v28, %v5336_v2 }
 0x302   :  { %v5508_v29 = vpop.f32.mrf.mxu0  ;;  %v5545_v30 = vpop.f32.mrf.mxu1 }
 0x303   :  { %v5557_v16 = vadd.f32 %v5545_v30, %v5337_v19  ;;  %v7497_v30 = vld [vmem:[#allocation5 + $0x138] sm:$0xff]  }
 0x304   :  { %v5509_v27 = vpop.f32.mrf.mxu0  ;;  %v7370_v32 = vpop.f32.mrf.mxu1 }
 0x306   :  { %v5548_v34 = vpop.f32.mrf.mxu1  ;;  %v5642_v35 = vpop.f32.mrf.mxu0 }
 0x307   :  { %v5771_v58 = vadd.f32 %v5642_v35, %v5551_v50 }
 0x308   :  { %v7371_v36 = vpop.f32.mrf.mxu1  ;;  %v5644_v37 = vpop.f32.mrf.mxu0 }
 0x309   :  { %v5772_v1 = vadd.f32 %v5644_v37, %v5552_v57 }
 0x30a   :  { %v5646_v38 = vpop.f32.mrf.mxu0 }
 0x30c   :  { %v5647_v33 = vpop.f32.mrf.mxu0 }
 0x30e   :  { %v5683_v39 = vpop.f32.mrf.mxu1 }
 0x30f   :  { %v5773_v0 = vadd.f32 %v5683_v39, %v5553_v63 }
 0x310   :  { %v5685_v40 = vpop.f32.mrf.mxu1 }
 0x311   :  { %v5774_v11 = vadd.f32 %v5685_v40, %v5554_v6 }
 0x312   :  { %v5687_v41 = vpop.f32.mrf.mxu1  ;;  %v5724_v42 = vpop.f32.mrf.mxu0 }
 0x313   :  { %v5775_v24 = vadd.f32 %v5724_v42, %v5555_v20  ;;  %v7498_v42 = vld [vmem:[#allocation5 + $0x170] sm:$0xff]  }
 0x314   :  { %v5688_v45 = vpop.f32.mrf.mxu1  ;;  %v5726_v46 = vpop.f32.mrf.mxu0 }
 0x315   :  { %v5776_v26 = vadd.f32 %v5726_v46, %v5556_v21 }
 0x316   :  { %v5728_v47 = vpop.f32.mrf.mxu0  ;;  %v5765_v4 = vpop.f32.mrf.mxu1 }
 0x317   :  { %v5777_v28 = vadd.f32 %v5765_v4, %v5557_v16 }
 0x318   :  { %v5729_v51 = vpop.f32.mrf.mxu0  ;;  %v7376_v53 = vpop.f32.mrf.mxu1 }
 0x31a   :  { %v5768_v10 = vpop.f32.mrf.mxu1  ;;  %v5862_v60 = vpop.f32.mrf.mxu0 }
 0x31b   :  { %v5991_v44 = vadd.f32 %v5862_v60, %v5771_v58 }
 0x31c   :  { %v7377_v54 = vpop.f32.mrf.mxu1  ;;  %v5864_v3 = vpop.f32.mrf.mxu0 }
 0x31d   :  { %v6004_v62 = vadd.f32 %v9166_v59, %v5991_v44  ;;  %v5992_v17 = vadd.f32 %v5864_v3, %v5772_v1  ;;  %v7499_v1 = vld [vmem:[#allocation5 + $0x130] sm:$0xff]   ;;  %v7500_v44 = vld [vmem:[#allocation5 + $0x1b8] sm:$0xff]  }
 0x31e   :  { %v5866_v15 = vpop.f32.mrf.mxu0  ;;  %v5903_v14 = vpop.f32.mrf.mxu1 }
 0x31f   :  { %v9172_v12 = vmax.f32 %v6004_v62, 0.0  ;;  %v6005_v7 = vadd.f32 %v9166_v59, %v5992_v17  ;;  %v5993_v13 = vadd.f32 %v5903_v14, %v5773_v0  ;;  %v7501_v62 = vld [vmem:[#allocation5 + $0x168] sm:$0xff]  }
 0x320   :  { %v5867_v8 = vpop.f32.mrf.mxu0  ;;  %v5905_v22 = vpop.f32.mrf.mxu1 }
 0x321   :  { %v6051_v23 = vmul.f32 %v9172_v12, %v9172_v12  ;;  %v9178_v5 = vmax.f32 %v6005_v7, 0.0  ;;  %v6006_v56 = vadd.f32 %v9166_v59, %v5993_v13  ;;  %v5994_v9 = vadd.f32 %v5905_v22, %v5774_v11  ;;  %v7502_v22 = vld [vmem:[#allocation5 + $0x128] sm:$0xff]  }
 0x322   :  { %v5907_v29 = vpop.f32.mrf.mxu1  ;;  %v5944_v27 = vpop.f32.mrf.mxu0  ;;  %v6018_v41 = vpack.c.bf16 %v9172_v12, %v9172_v12 }
 0x323   :  { %v6058_v32 = vrot.slane %v6051_v23, 4  ;;  %v6052_v52 = vmul.f32 %v9178_v5, %v9178_v5  ;;  %v9183_v18 = vmax.f32 %v6006_v56, 0.0  ;;  %v6007_v25 = vadd.f32 %v9166_v59, %v5994_v9 }
 0x324   :  { %v5995_v34 = vadd.f32 %v5944_v27, %v5775_v24  ;;  %v5908_v35 = vpop.f32.mrf.mxu1  ;;  %v5946_v36 = vpop.f32.mrf.mxu0  ;;  %v6019_v37 = vpack.c.bf16 %v9178_v5, %v9178_v5  ;;  %v7085_v38 = vpack.c.bf16 %v9178_v5, %v9172_v12 }
 0x325   :  { %v6059_v33 = vadd.f32 %v6058_v32, %v6051_v23  ;;  %v6064_v39 = vrot.slane %v6052_v52, 4  ;;  %v6053_v40 = vmul.f32 %v9183_v18, %v9183_v18  ;;  %v6020_v45 = vpack.c.bf16 %v9183_v18, %v9183_v18  ;;  %v7503_v23 = vld [vmem:[#allocation5 + $0x1b0] sm:$0xff]  }
 0x326   :  { %v9196_v46 = vmax.f32 %v6007_v25, 0.0  ;;  %v6008_v43 = vadd.f32 %v9166_v59, %v5995_v34  ;;  %v5996_v47 = vadd.f32 %v5946_v36, %v5776_v26  ;;  %6640 = vmatprep.mubr.bf16.mxu0 %v6019_v37  ;;  %v5948_v4 = vpop.f32.mrf.mxu0  ;;  %v5985_v49 = vpop.f32.mrf.mxu1  ;;  %6047 = vst [vmem:[#allocation7] sm:$0xff] %v7085_v38  ;;  %v7504_v26 = vld [vmem:[#allocation5 + $0x160] sm:$0xff]  }
 0x327   :  { %v6060_v50 = vrot.slane %v6059_v33, 2  ;;  %v6065_v51 = vadd.f32 %v6064_v39, %v6052_v52  ;;  %v6070_v53 = vrot.slane %v6053_v40, 4  ;;  %v5997_v55 = vadd.f32 %v5985_v49, %v5777_v28  ;;  %6641 = vmatmul.mubr.bf16.vlgmr.msra.gmra.mxu0 %v6018_v41  ;;  %v7506_v39 = vld [vmem:[#allocation5 + $0x1a8] sm:$0xff]  }
 0x328   :  { %v6054_v57 = vmul.f32 %v9196_v46, %v9196_v46  ;;  %v9201_v58 = vmax.f32 %v6008_v43, 0.0  ;;  %v6009_v10 = vadd.f32 %v9166_v59, %v5996_v47  ;;  %7192 = vmatpush3.bf16.msra.mxu0 %v7497_v30  ;;  %v5949_v60 = vpop.f32.mrf.mxu0  ;;  %v7382_v61 = vpop.f32.mrf.mxu1  ;;  %v6021_v63 = vpack.c.bf16 %v9196_v46, %v9196_v46 }
 0x329   :  { %v6061_v54 = vadd.f32 %v6060_v50, %v6059_v33  ;;  %v6066_v3 = vrot.slane %v6065_v51, 2  ;;  %v6071_v6 = vadd.f32 %v6070_v53, %v6053_v40  ;;  %v6010_v0 = vadd.f32 %v9166_v59, %v5997_v55  ;;  %7193 = vmatprep.subr.bf16.mxu0 %v7498_v42  ;;  %v7505_v33 = vld [vmem:[#allocation5 + $0x120] sm:$0xff]   ;;  %v7507_v42 = vld [vmem:[#allocation5 + $0x158] sm:$0xff]   ;;  %v7510_v61 = vld [vmem:[#allocation5 + $0x150] sm:$0xff]  }
 0x32a   :  { %v6076_v17 = vrot.slane %v6054_v57, 4  ;;  %v6055_v48 = vmul.f32 %v9201_v58, %v9201_v58  ;;  %v9209_v2 = vmax.f32 %v6009_v10, 0.0  ;;  %6680 = vmatprep.mubr.bf16.mxu1 %v6021_v63  ;;  %v5988_v15 = vpop.f32.mrf.mxu1  ;;  %v7086_v35 = vpack.c.bf16 %v9196_v46, %v9183_v18  ;;  %v7508_v10 = vld [vmem:[#allocation5 + $0x118] sm:$0xff]   ;;  %v7509_v60 = vld [vmem:[#allocation5 + $0x1a0] sm:$0xff]  }
 0x32b   :  { %v6062_v14 = vrot.slane %v6061_v54, 1  ;;  %v6067_v11 = vadd.f32 %v6066_v3, %v6065_v51  ;;  %v6072_v7 = vrot.slane %v6071_v6, 2  ;;  %v9211_v13 = vmax.f32 %v6010_v0, 0.0  ;;  %6681 = vmatmul.mubr.bf16.vlgmr.msra.gmra.mxu1 %v6020_v45 }
 0x32c   :  { %v6077_v19 = vadd.f32 %v6076_v17, %v6054_v57  ;;  %v6082_v20 = vrot.slane %v6055_v48, 4  ;;  %v6056_v59 = vmul.f32 %v9209_v2, %v9209_v2  ;;  %7194 = vmatpush3.bf16.msra.mxu0 %v7499_v1  ;;  %7385 = vmatpush3.bf16.msra.mxu1 %v7500_v44  ;;  %v7383_v21 = vpop.f32.mrf.mxu1  ;;  %v6023_v8 = vpack.c.bf16 %v9209_v2, %v9209_v2  ;;  %v7512_v17 = vld [vmem:[#allocation5 + $0x198] sm:$0xff]  }
 0x32d   :  { %v6063_v56 = vadd.f32 %v6062_v14, %v6061_v54  ;;  %v6068_v9 = vrot.slane %v6067_v11, 1  ;;  %v6073_v16 = vadd.f32 %v6072_v7, %v6071_v6  ;;  %v9219_v24 = vpack.c.bf16 %v9211_v13, %v9211_v13  ;;  %7195 = vmatprep.subr.bf16.mxu0 %v7501_v62  ;;  %7386 = vmatprep.subr.bf16.mxu1 %v7664_v31  ;;  %v7511_v62 = vld [vmem:[#allocation5 + $0x110] sm:$0xff]   ;;  %v7514_v7 = vld [vmem:[#allocation5 + $0x108] sm:$0xff]  }
 0x32e   :  { %v6078_v29 = vrot.slane %v6077_v19, 2  ;;  %v6083_v27 = vadd.f32 %v6082_v20, %v6055_v48  ;;  %v6088_v32 = vrot.slane %v6056_v59, 4  ;;  %v6057_v52 = vmul.f32 %v9211_v13, %v9211_v13  ;;  %6720 = vmatprep.mubr.bf16.mxu0 %v6023_v8  ;;  %7400 = vmatprep.mubr.msk.bf16.mxu1 %vm7665_vm3, %v7664_v31  ;;  %6048 = vst [vmem:[#allocation7 + $0x8] sm:$0xff] %v7086_v35  ;;  %v7513_v48 = vld [vmem:[#allocation5 + $0x148] sm:$0xff]   ;;  %v7516_v20 = vld [vmem:[#allocation5 + $0x140] sm:$0xff]  }
 0x32f   :  { %v6100_v25 = vmax.f32 %v6063_v56, 1e-24  ;;  %v6069_v28 = vadd.f32 %v6068_v9, %v6067_v11  ;;  %v6074_v34 = vrot.slane %v6073_v16, 1  ;;  %6050 = vst [vmem:[#allocation7 + $0x18] sm:$0xf] %v9219_v24  ;;  %v7087_v45 = vpack.c.bf16 %v9209_v2, %v9201_v58  ;;  %v7517_v8 = vld [vmem:[#allocation5 + $0x100] sm:$0xff]  }
 0x330   :  { %v6079_v36 = vadd.f32 %v6078_v29, %v6077_v19  ;;  %v6084_v37 = vrot.slane %v6083_v27, 2  ;;  %v6089_v30 = vadd.f32 %v6088_v32, %v6056_v59  ;;  %v6094_v38 = vrot.slane %v6057_v52, 4  ;;  %7196 = vmatpush3.bf16.msra.mxu0 %v7502_v22  ;;  %7387 = vmatpush3.bf16.msra.mxu1 %v7503_v23  ;;  %v7515_v19 = vld [vmem:[#allocation5 + $0x190] sm:$0xff]   ;;  %v7518_v22 = vld [vmem:[#allocation5 + $0x188] sm:$0xff]  }
 0x331   :  { %v6101_v40 = vmax.f32 %v6069_v28, 1e-24  ;;  %v6075_v41 = vadd.f32 %v6074_v34, %v6073_v16  ;;  %7197 = vmatprep.subr.bf16.mxu0 %v7504_v26  ;;  %7388 = vmatprep.subr.bf16.mxu1 %v7664_v31  ;;  %7520 = vrsqrt.f32 %v6100_v25  ;;  %6049 = vst [vmem:[#allocation7 + $0x10] sm:$0xff] %v7087_v45  ;;  %v7519_v26 = vld [vmem:[#allocation5 + $0x180] sm:$0xff]  }
 0x332   :  { %v6080_v43 = vrot.slane %v6079_v36, 1  ;;  %v6085_v47 = vadd.f32 %v6084_v37, %v6083_v27  ;;  %v6090_v4 = vrot.slane %v6089_v30, 2  ;;  %v6095_v49 = vadd.f32 %v6094_v38, %v6057_v52 }
 0x333   :  { %7522 = vrsqrt.f32 %v6101_v40  ;;  %v6102_v50 = vmax.f32 %v6075_v41, 1e-24  ;;  %v6022_v27 = vpack.c.bf16 %v9201_v58, %v9201_v58 }
 0x334   :  { %v6081_v51 = vadd.f32 %v6080_v43, %v6079_v36  ;;  %v6086_v53 = vrot.slane %v6085_v47, 1  ;;  %v6091_v55 = vadd.f32 %v6090_v4, %v6089_v30  ;;  %v6096_v57 = vrot.slane %v6095_v49, 2  ;;  %7198 = vmatpush3.bf16.msra.mxu0 %v7505_v33  ;;  %7389 = vmatpush3.bf16.msra.mxu1 %v7506_v39 }
 0x335   :  { %7524 = vrsqrt.f32 %v6102_v50  ;;  %7199 = vmatprep.subr.bf16.mxu0 %v7507_v42  ;;  %7390 = vmatprep.subr.bf16.mxu1 %v7664_v31 }
 0x336   :  { %v6103_v63 = vmax.f32 %v6081_v51, 1e-24  ;;  %v6087_v1 = vadd.f32 %v6086_v53, %v6085_v47  ;;  %v6092_v44 = vrot.slane %v6091_v55, 1  ;;  %v6097_v54 = vadd.f32 %v6096_v57, %v6095_v49 }
 0x338   :  { %7526 = vrsqrt.f32 %v6103_v63  ;;  %v6104_v3 = vmax.f32 %v6087_v1, 1e-24  ;;  %v6093_v6 = vadd.f32 %v6092_v44, %v6091_v55  ;;  %v6098_v0 = vrot.slane %v6097_v54, 1  ;;  %7200 = vmatpush3.bf16.msra.mxu0 %v7508_v10  ;;  %7391 = vmatpush3.bf16.msra.mxu1 %v7509_v60 }
 0x339   :  { %7201 = vmatprep.subr.bf16.mxu0 %v7510_v61  ;;  %7392 = vmatprep.subr.bf16.mxu1 %v7664_v31 }
 0x33a   :  { %7528 = vrsqrt.f32 %v6104_v3  ;;  %v6105_v15 = vmax.f32 %v6093_v6, 1e-24  ;;  %v6099_v14 = vadd.f32 %v6098_v0, %v6097_v54 }
 0x33c   :  { %7530 = vrsqrt.f32 %v6105_v15  ;;  %v6106_v11 = vmax.f32 %v6099_v14, 1e-24  ;;  %7202 = vmatpush3.bf16.msra.mxu0 %v7511_v62  ;;  %7393 = vmatpush3.bf16.msra.mxu1 %v7512_v17 }
 0x33d   :  { %7203 = vmatprep.subr.bf16.mxu0 %v7513_v48  ;;  %7394 = vmatprep.subr.bf16.mxu1 %v7664_v31 }
 0x33e   :  { %v7521_v59 = vpop.eup %7520  ;;  %7532 = vrsqrt.f32 %v6106_v11 }
 0x33f   :  { %v6114_v56 = vmul.f32 %v7521_v59, %v9172_v12 }
 0x340   :  { %v7523_v21 = vpop.eup %7522  ;;  %7204 = vmatpush3.bf16.msra.mxu0 %v7514_v7  ;;  %7395 = vmatpush3.bf16.msra.mxu1 %v7515_v19 }
 0x341   :  { %v6115_v23 = vmul.f32 %v7523_v21, %v9178_v5  ;;  %7205 = vmatprep.subr.bf16.mxu0 %v7516_v20  ;;  %7396 = vmatprep.subr.bf16.mxu1 %v7664_v31 }
 0x342   :  { %v7525_v9 = vpop.eup %7524 }
 0x343   :  { %v7089_v16 = vpack.c.bf16 %v6115_v23, %v6114_v56  ;;  %v6116_v32 = vmul.f32 %v7525_v9, %v9183_v18 }
 0x344   :  { %7206 = vmatpush3.bf16.msra.mxu0 %v7517_v8  ;;  %7397 = vmatpush3.bf16.msra.mxu1 %v7518_v22 }
 0x345   :  { %v7527_v29 = vpop.eup %7526  ;;  %7398 = vmatprep.subr.bf16.mxu1 %v7664_v31  ;;  %6150 = vst [vmem:[#allocation8] sm:$0xff] %v7089_v16 }
 0x346   :  { %v6117_v5 = vmul.f32 %v7527_v29, %v9196_v46 }
 0x347   :  { %v7529_v52 = vpop.eup %7528  ;;  %6721 = vmatmul.mubr.bf16.vlgmr.msra.gmra.mxu0 %v6022_v27 }
 0x348   :  { %7399 = vmatpush3.bf16.msra.mxu1 %v7519_v26  ;;  %v7090_v12 = vpack.c.bf16 %v6117_v5, %v6116_v32  ;;  %v6118_v28 = vmul.f32 %v7529_v52, %v9201_v58 }
 0x349   :  { %v7531_v25 = vpop.eup %7530 }
 0x34a   :  { %v6119_v34 = vmul.f32 %v7531_v25, %v9209_v2  ;;  %6151 = vst [vmem:[#allocation8 + $0x8] sm:$0xff] %v7090_v12 }
 0x34b   :  { %v7533_v35 = vpop.eup %7532  ;;  %7401 = vmatmul.mubr.bf16.vlgmr.msra.gmra.mxu1 %v9219_v24 }
 0x34c   :  { %v6120_v31 = vmul.f32 %v7533_v35, %v9211_v13  ;;  %v7091_v36 = vpack.c.bf16 %v6119_v34, %v6118_v28 }
 0x34e   :  { %v7092_v37 = vpack.c.bf16 %v6120_v31, %v6120_v31  ;;  %6152 = vst [vmem:[#allocation8 + $0x10] sm:$0xff] %v7091_v36 }
 0x350   :  { %6153 = vst [vmem:[#allocation8 + $0x18] sm:$0xf] %v7092_v37 }
 0x351   :  { %7587 = shalt.err (!%p7584_p0)
}
 0x352   :  { %6797 = dma.vmem_to_hbm [thread:$0]  %s6795_s23, 448, %s9261_s5, [#allocation9]  }
 0x353   :  { %s7689_s27 = smov [#allocation7]  }
 0x354   :  { %s6780_s28 = sshll.u32 %s7689_s27, 4  ;;  %s6781_s28 = int_to_ptr.vmem [resolvable:$true] %s6780_s28 }
 0x355   :  { %s7596_s30 = scalar_lea.vmem %s6781_s28, 448  ;;  %p7601_p2 = scmp.lt.s32.totalorder %s6781_s28, %s6781_s28 }
 0x356   :  { %p7597_p1 = scmp.ne.s32.totalorder %s6781_s28, %s7596_s30  ;;  %p7602_p3 = scmp.lt.s32.totalorder %s7596_s30, %s7596_s30 }
 0x358   :  { %p7603_p4 = por %p7602_p3, %p7601_p2 }
 0x35a   :  { %p7604_p5 = pnand %p7603_p4, %p7597_p1 }
 0x35c   :  { %7607 = shalt.err (!%p7604_p5)
}
 0x35d   :  { %6783 = dma.vmem_to_hbm [thread:$0]  %s6781_s28, 448, %s9260_s4, [#allocation4]  }
 0x35e   :  { %s7690_s4 = smov [#allocation10]  }
 0x35f   :  { %s6804_s5 = sshll.u32 %s7690_s4, 4  ;;  %s6805_s5 = int_to_ptr.vmem [resolvable:$true] %s6804_s5 }
 0x360   :  { %s7616_s2 = scalar_lea.vmem %s6805_s5, 128  ;;  %p7621_p7 = scmp.lt.s32.totalorder %s6805_s5, %s6805_s5 }
 0x361   :  { %p7617_p6 = scmp.ne.s32.totalorder %s6805_s5, %s7616_s2  ;;  %p7622_p8 = scmp.lt.s32.totalorder %s7616_s2, %s7616_s2 }
 0x363   :  { %p7623_p9 = por %p7622_p8, %p7621_p7 }
 0x365   :  { %p7624_p10 = pnand %p7623_p9, %p7617_p6 }
 0x3e7   :  { %v7163_v18 = vpop.f32.mrf.mxu0 }
 0x3e9   :  { %v7164_v46 = vpop.f32.mrf.mxu0 }
 0x3ea   :  { %v7165_v40 = vadd.f32 %v7164_v46, %v7163_v18 }
 0x3eb   :  { %v7166_v58 = vpop.f32.mrf.mxu0  ;;  %v7185_v2 = vpop.f32.mrf.mxu1 }
 0x3ed   :  { %v7167_v13 = vpop.f32.mrf.mxu0  ;;  %v7186_v24 = vpop.f32.mrf.mxu1 }
 0x3ee   :  { %v7187_v33 = vadd.f32 %v7186_v24, %v7185_v2 }
 0x3ef   :  { %v7188_v30 = vpop.f32.mrf.mxu1 }
 0x3f0   :  { %v6683_v42 = vadd.f32 %v7187_v33, %v7165_v40 }
 0x3f1   :  { %v7189_v38 = vpop.f32.mrf.mxu1 }
 0x407   :  { %v7207_v39 = vpop.f32.mrf.mxu0 }
 0x409   :  { %v7208_v41 = vpop.f32.mrf.mxu0 }
 0x40a   :  { %v7209_v45 = vadd.f32 %v7208_v41, %v7207_v39 }
 0x40b   :  { %v7210_v43 = vpop.f32.mrf.mxu0  ;;  %v6762_v47 = vpop.f32.mrf.mxu1 }
 0x40c   :  { %v6723_v4 = vadd.f32 %v7209_v45, %v6683_v42 }
 0x40d   :  { %v7211_v49 = vpop.f32.mrf.mxu0  ;;  %v7402_v50 = vpop.f32.mrf.mxu1 }
 0x40e   :  { %v6763_v51 = vadd.f32 %v6762_v47, %v6723_v4 }
 0x40f   :  { %v6765_v53 = vpop.f32.mrf.mxu1 }
 0x410   :  { %6769 = vst [vmem:[#allocation10] sm:$0xff] %v6763_v51 }
 0x411   :  { %v7403_v55 = vpop.f32.mrf.mxu1 }
 0x412   :  { %7627 = shalt.err (!%p7624_p10)
}
 0x413   :  { %6807 = dma.vmem_to_hbm [thread:$0]  %s6805_s5, 128, %s9262_s6, [#allocation9]  }
 0x414   :  { %7640 = dma.done.wait [#allocation4], 448  }
 0x415   :  { %7641 = vsyncadd [#allocation4], 4294966848 }
 0x416   :  { %7642 = dma.done.wait [#allocation9], 576  }
 0x417   :  { %7643 = vsyncadd [#allocation9], 4294966720 }
 0x418   :  { %6817 = vsyncpa [#allocation3], 1 }
 0x419   :  { %6818 = vsyncpa [#allocation6], 1 }
 0x41a   :  { %6819 = vsyncpa [#allocation4], 1 }
 0x41b   :  { %6820 = vsyncpa [#allocation9], 1 }

</bundles_post_ra>
